<compile_context>
chip_gen: v7x
topology: tpu7x:2x2x1
jax: 0.10.0
libtpu: 0.0.40
codegen_flags: <defaults>
</compile_context>

<pallas_src>
import functools

import jax
import jax.numpy as jnp
from jax import lax
from jax.experimental import pallas as pl
from jax.experimental.pallas import tpu as pltpu


def _round_up(x, m):
    return ((x + m - 1) // m) * m


def _pick_tile(dim, max_tile, align):
    """Pick a tile <= max_tile (aligned to `align`) minimizing padding of `dim`."""
    d = _round_up(dim, align)
    n = -(-d // max_tile)
    t = _round_up(-(-d // n), align)
    return t, t * n


# ---------------------------------------------------------------------------
# Matmul with fused BN-statistics epilogue
# ---------------------------------------------------------------------------

def _matmul_stats_kernel(a_ref, b_ref, o_ref, st_ref, acc_ref):
    k = pl.program_id(2)

    @pl.when(k == 0)
    def _():
        acc_ref[...] = jnp.zeros_like(acc_ref)

    acc_ref[...] += jnp.dot(a_ref[...], b_ref[...],
                            preferred_element_type=jnp.float32)

    @pl.when(k == pl.num_programs(2) - 1)
    def _():
        acc = acc_ref[...]
        o_ref[...] = acc.astype(o_ref.dtype)
        # Per-column sum / sum-of-squares over this M tile (rides the resident acc tile
        # on the VPU). Row 0 = sum, row 1 = sum of squares, rows 2..7 = 0.
        srow = jnp.sum(acc, axis=0, keepdims=True)
        qrow = jnp.sum(acc * acc, axis=0, keepdims=True)
        rid = lax.broadcasted_iota(jnp.int32, st_ref.shape, 0)
        st_ref[...] = jnp.where(rid == 0, srow, jnp.where(rid == 1, qrow, 0.0))


def pallas_matmul_stats(a, b):
    """(M,K) @ (K,N) -> (f32 out, per-M-tile column sums, column sums of squares).

    Inputs are expected in bf16 (producers emit bf16); f32 MXU accumulation. Zero-padded
    rows/cols contribute zero to both the product and the statistics.
    """
    M, K = a.shape
    K2, N = b.shape
    assert K == K2
    if a.dtype != jnp.bfloat16:
        a = a.astype(jnp.bfloat16)
    if b.dtype != jnp.bfloat16:
        b = b.astype(jnp.bfloat16)

    # M: 16-aligned (bf16 sublane packing); prefer >=2 row blocks so the second v7x
    # TensorCore has work even when the k axis is a single step.
    Mp0 = _round_up(M, 16)
    n_m = max(pl.cdiv(Mp0, 512), 2 if Mp0 >= 32 else 1)
    tm = _round_up(pl.cdiv(Mp0, n_m), 16)
    Mp = tm * n_m

    # K: single exact contraction panel when it fits VMEM (no pad / no k loop for
    # 128-multiples, e.g. conv2's K=3200); otherwise an exact 128-multiple divisor.
    Kp = _round_up(K, 128)
    if Kp <= 4096:
        tk = Kp
    else:
        q = Kp // 128
        t = max(d for d in range(1, 17) if q % d == 0)
        tk = 128 * t
    n_k = Kp // tk

    tn, Np = _pick_tile(N, 512, 128)
    n_n = Np // tn

    if (Mp, Kp) != (M, K):
        a = jnp.pad(a, ((0, Mp - M), (0, Kp - K)))
    if (Kp, Np) != (K, N):
        b = jnp.pad(b, ((0, Kp - K), (0, Np - N)))

    y, stats = pl.pallas_call(
        _matmul_stats_kernel,
        out_shape=[jax.ShapeDtypeStruct((Mp, Np), jnp.float32),
                   jax.ShapeDtypeStruct((n_m * 8, Np), jnp.float32)],
        grid=(n_m, n_n, n_k),
        in_specs=[pl.BlockSpec((tm, tk), lambda i, j, k: (i, k)),
                  pl.BlockSpec((tk, tn), lambda i, j, k: (k, j))],
        out_specs=[pl.BlockSpec((tm, tn), lambda i, j, k: (i, j)),
                   pl.BlockSpec((8, tn), lambda i, j, k: (i, j))],
        scratch_shapes=[pltpu.VMEM((tm, tn), jnp.float32)],
        compiler_params=pltpu.CompilerParams(
            dimension_semantics=("parallel", "parallel", "arbitrary")),
    )(a, b)

    if (Mp, Np) != (M, N):
        y = y[:M, :N]
    st = stats.reshape(n_m, 8, Np)
    return y, st[:, 0, :N], st[:, 1, :N]


# ---------------------------------------------------------------------------
# BN apply (+ ReLU), bf16 output
# ---------------------------------------------------------------------------

def _scale_bias_kernel(x_ref, s_ref, b_ref, o_ref, *, relu):
    y = x_ref[...].astype(jnp.float32) * s_ref[...] + b_ref[...]
    if relu:
        y = jnp.maximum(y, 0.0)
    o_ref[...] = y.astype(o_ref.dtype)


def pallas_scale_bias(x, scale, bias, relu, out_dtype=jnp.bfloat16):
    """Per-column y = x*scale + bias (+ optional ReLU); computes in f32, stores bf16."""
    R, C = x.shape
    tr, Rp = _pick_tile(R, 1024, 8)
    tc, Cp = _pick_tile(C, 512, 128)

    s = scale.astype(jnp.float32).reshape(1, C)
    b = bias.astype(jnp.float32).reshape(1, C)
    if (Rp, Cp) != (R, C):
        x = jnp.pad(x, ((0, Rp - R), (0, Cp - C)))
    if Cp != C:
        s = jnp.pad(s, ((0, 0), (0, Cp - C)))
        b = jnp.pad(b, ((0, 0), (0, Cp - C)))

    out = pl.pallas_call(
        functools.partial(_scale_bias_kernel, relu=relu),
        out_shape=jax.ShapeDtypeStruct((Rp, Cp), out_dtype),
        grid=(Rp // tr, Cp // tc),
        in_specs=[pl.BlockSpec((tr, tc), lambda i, j: (i, j)),
                  pl.BlockSpec((1, tc), lambda i, j: (0, j)),
                  pl.BlockSpec((1, tc), lambda i, j: (0, j))],
        out_specs=pl.BlockSpec((tr, tc), lambda i, j: (i, j)),
        compiler_params=pltpu.CompilerParams(
            dimension_semantics=("parallel", "parallel")),
    )(x, s, b)
    if (Rp, Cp) != (R, C):
        out = out[:R, :C]
    return out


def bn_apply_from_stats(y, colsum, colsq, m_valid, gamma, beta, eps, relu):
    """Finalize mean/var from the matmul epilogue stats, then run only the apply pass."""
    mean = jnp.sum(colsum, axis=0) / m_valid
    ex2 = jnp.sum(colsq, axis=0) / m_valid
    var = jnp.maximum(ex2 - mean * mean, 0.0)
    scale = gamma * lax.rsqrt(var + eps)
    bias = beta - mean * scale
    return pallas_scale_bias(y, scale, bias, relu)


# ---------------------------------------------------------------------------
# Fused projector: fc1 -> bn3 -> relu -> fc2 -> bn4 -> relu -> fc3 -> bnlast
# Both branches processed in one call; weights & activations stay resident in VMEM.
# ---------------------------------------------------------------------------

def _projector_kernel(h1_ref, hv_ref, w1_ref, w2_ref, w3_ref,
                      g3_ref, b3_ref, g4_ref, b4_ref,
                      z1_ref, zv_ref, *, eps_bn, eps_last):
    def bn(x, gamma, beta, eps, relu):
        mean = jnp.mean(x, axis=0, keepdims=True)
        var = jnp.maximum(jnp.mean(x * x, axis=0, keepdims=True) - mean * mean, 0.0)
        y = (x - mean) * lax.rsqrt(var + eps)
        if gamma is not None:
            y = y * gamma + beta
        if relu:
            y = jnp.maximum(y, 0.0)
        return y

    def branch(h):
        z = jnp.dot(h, w1_ref[...], preferred_element_type=jnp.float32)
        z = bn(z, g3_ref[...], b3_ref[...], eps_bn, True)
        z = jnp.dot(z.astype(jnp.bfloat16), w2_ref[...],
                    preferred_element_type=jnp.float32)
        z = bn(z, g4_ref[...], b4_ref[...], eps_bn, True)
        z = jnp.dot(z.astype(jnp.bfloat16), w3_ref[...],
                    preferred_element_type=jnp.float32)
        return bn(z, None, None, eps_last, False)          # bnlast (no affine)

    z1_ref[...] = branch(h1_ref[...]).astype(z1_ref.dtype)
    zv_ref[...] = branch(hv_ref[...]).astype(zv_ref.dtype)


def pallas_projector(params, h1, hv):
    # TODO(synk): at the real 2048->8192 projector widths the weights no longer fit
    # VMEM; switch to pallas_matmul_stats on the row-concatenated (2B, F) batch there.
    B, _ = h1.shape
    P = params["fc1_w"].shape[1]
    g3 = params["bn3_g"].reshape(1, P).astype(jnp.float32)
    b3 = params["bn3_b"].reshape(1, P).astype(jnp.float32)
    g4 = params["bn4_g"].reshape(1, P).astype(jnp.float32)
    b4 = params["bn4_b"].reshape(1, P).astype(jnp.float32)
    z1, zv = pl.pallas_call(
        functools.partial(_projector_kernel, eps_bn=1e-5, eps_last=1e-5),
        out_shape=[jax.ShapeDtypeStruct((B, P), jnp.bfloat16),
                   jax.ShapeDtypeStruct((B, P), jnp.bfloat16)],
    )(h1, hv, params["fc1_w"], params["fc2_w"], params["fc3_w"], g3, b3, g4, b4)
    return z1, zv


# ---------------------------------------------------------------------------
# Barlow-Twins cross-correlation loss (never materializes the DxD matrix in HBM)
# ---------------------------------------------------------------------------

def _bt_loss_kernel(z1_ref, zv_ref, on_ref, off_ref, *, d_valid, d_pad, tile):
    i = pl.program_id(0)
    j = pl.program_id(1)

    @pl.when(j == 0)
    def _():
        on_ref[...] = jnp.zeros_like(on_ref)
        off_ref[...] = jnp.zeros_like(off_ref)

    # c tile = z1[:, i_blk].T @ zv[:, j_blk] / 64  (contract over the batch dim).
    # Constants 1/64, 1/32 and 0.0039 are hard-coded in the PyTorch reference.
    c = lax.dot_general(z1_ref[...], zv_ref[...],
                        (((0,), (0,)), ((), ())),
                        preferred_element_type=jnp.float32) * (1.0 / 64.0)
    csq = c * c           # zero-padded columns contribute exactly zero here

    @pl.when(i != j)
    def _():
        off_ref[...] += jnp.sum(csq, axis=0, keepdims=True)

    @pl.when(i == j)
    def _():
        rl = lax.broadcasted_iota(jnp.int32, (tile, tile), 0)
        cl = lax.broadcasted_iota(jnp.int32, (tile, tile), 1)
        diag = rl == cl
        if d_valid != d_pad:          # mask compiled out when D is a 128-multiple
            diag = jnp.logical_and(diag, rl + i * tile < d_valid)
        on_ref[...] += jnp.sum(jnp.where(diag, (c - 1.0) ** 2, 0.0),
                               axis=0, keepdims=True)
        off_ref[...] += jnp.sum(jnp.where(diag, 0.0, csq), axis=0, keepdims=True)


def pallas_barlow_loss(z1, zv):
    """c = z1.T @ zv / 64 ; loss = sum((diag-1)^2)/32 + 0.0039*sum(offdiag^2)/32."""
    B, D = z1.shape
    Dp = _round_up(D, 128)
    tile = next(t for t in (512, 256, 128) if Dp % t == 0)
    n_d = Dp // tile
    Bp = _round_up(B, 16)                    # bf16 sublane packing; zero rows are inert

    z1 = z1.astype(jnp.bfloat16)
    zv = zv.astype(jnp.bfloat16)
    if (Bp, Dp) != (B, D):
        z1 = jnp.pad(z1, ((0, Bp - B), (0, Dp - D)))
        zv = jnp.pad(zv, ((0, Bp - B), (0, Dp - D)))

    on, off = pl.pallas_call(
        functools.partial(_bt_loss_kernel, d_valid=D, d_pad=Dp, tile=tile),
        out_shape=[jax.ShapeDtypeStruct((n_d * 8, tile), jnp.float32),
                   jax.ShapeDtypeStruct((n_d * 8, tile), jnp.float32)],
        grid=(n_d, n_d),
        in_specs=[pl.BlockSpec((Bp, tile), lambda i, j: (0, i)),
                  pl.BlockSpec((Bp, tile), lambda i, j: (0, j))],
        out_specs=[pl.BlockSpec((8, tile), lambda i, j: (i, 0)),
                   pl.BlockSpec((8, tile), lambda i, j: (i, 0))],
        compiler_params=pltpu.CompilerParams(
            dimension_semantics=("parallel", "arbitrary")),
    )(z1, zv)

    on_diag = jnp.sum(on.reshape(n_d, 8, tile)[:, 0, :]) * (1.0 / 32.0)
    off_diag = jnp.sum(off.reshape(n_d, 8, tile)[:, 0, :]) * (1.0 / 32.0)
    return on_diag + 0.0039 * off_diag


# ---------------------------------------------------------------------------
# Model glue (plain JAX) around the Pallas kernels
# ---------------------------------------------------------------------------

def conv_bn_relu(x_nhwc_bf16, w_mat, gamma, beta, eps, kh, kw, stride):
    """Valid conv (im2col matmul, fused BN stats) -> BN apply -> ReLU, bf16 output."""
    # TODO(synk): at real 224x224 inputs the im2col matrix should not be materialized
    # in HBM (use an in-kernel tap-accumulation axis or lax.conv_general_dilated).
    B, H, W, Cin = x_nhwc_bf16.shape
    oh = (H - kh) // stride + 1
    ow = (W - kw) // stride + 1
    cols = []
    for di in range(kh):
        for dj in range(kw):
            cols.append(x_nhwc_bf16[:, di:di + stride * oh:stride,
                                    dj:dj + stride * ow:stride, :])
    patches = jnp.stack(cols, axis=3)                      # (B, oh, ow, kh*kw, Cin)
    a = patches.reshape(B * oh * ow, kh * kw * Cin)
    kdim = w_mat.shape[0]
    if a.shape[1] != kdim:                                 # weight K was pre-padded to 128
        a = jnp.pad(a, ((0, 0), (0, kdim - a.shape[1])))
    y, colsum, colsq = pallas_matmul_stats(a, w_mat)
    y = bn_apply_from_stats(y, colsum, colsq, B * oh * ow, gamma, beta, eps, relu=True)
    return y.reshape(B, oh, ow, w_mat.shape[1])


def _trans_rot(trans, rot):
    B = rot.shape[0]
    cos_r, sin_r = jnp.cos(rot), jnp.sin(rot)
    zeros = jnp.zeros((B, 1), rot.dtype)
    ones = jnp.ones((B, 1), rot.dtype)
    r1 = jnp.stack((ones, zeros, zeros), axis=-1)
    rx2 = jnp.stack((zeros, cos_r[:, 0:1], sin_r[:, 0:1]), axis=-1)
    rx3 = jnp.stack((zeros, -sin_r[:, 0:1], cos_r[:, 0:1]), axis=-1)
    rx = jnp.concatenate((r1, rx2, rx3), axis=1)
    ry1 = jnp.stack((cos_r[:, 1:2], zeros, -sin_r[:, 1:2]), axis=-1)
    r2 = jnp.stack((zeros, ones, zeros), axis=-1)
    ry3 = jnp.stack((sin_r[:, 1:2], zeros, cos_r[:, 1:2]), axis=-1)
    ry = jnp.concatenate((ry1, r2, ry3), axis=1)
    rz1 = jnp.stack((cos_r[:, 2:3], sin_r[:, 2:3], zeros), axis=-1)
    r3 = jnp.stack((zeros, zeros, ones), axis=-1)
    rz2 = jnp.stack((-sin_r[:, 2:3], cos_r[:, 2:3], zeros), axis=-1)
    rz = jnp.concatenate((rz1, rz2, r3), axis=1)
    rot_m = jnp.matmul(jnp.matmul(rz, ry), rx)
    rt1 = jnp.stack((ones, zeros, zeros, trans[:, 0:1]), axis=-1)
    rt2 = jnp.stack((zeros, ones, zeros, trans[:, 1:2]), axis=-1)
    rt3 = jnp.stack((zeros, zeros, ones, trans[:, 2:3]), axis=-1)
    trans_m = jnp.concatenate((rt1, rt2, rt3), axis=1)
    return trans_m, rot_m


def _transform(x, mat, maxmin, img_size):
    B = x.shape[0]
    rot = mat[:, 0:3]
    trans = mat[:, 3:6]
    xf = x.reshape(B, x.shape[1], x.shape[2] * x.shape[3])
    max_val = jnp.tile(maxmin[:, 0].reshape(-1, 1), (1, 3))
    min_val = jnp.tile(maxmin[:, 1].reshape(-1, 1), (1, 3))
    trans_m, rot_m = _trans_rot(trans, rot)
    x1 = jnp.matmul(rot_m, xf)
    min_val1 = jnp.concatenate(
        (min_val, jnp.ones((B, 1), min_val.dtype)), axis=-1)[..., None]
    min_val1 = jnp.matmul(trans_m, min_val1)
    min_val = (jnp.squeeze(jnp.matmul(rot_m, min_val1), -1) - min_val) / \
              (max_val - min_val)
    min_val = min_val * 255.0
    xo = x1 + min_val[..., None]
    return xo.reshape(B, 3, img_size, img_size)


def classifier_stub(x_nchw, w):
    # TODO(synk): torchvision resnet50(pretrained=True) backbone is not reimplemented;
    # replaced by a deterministic GAP + linear projection to the same feature width.
    feats = jnp.mean(x_nchw, axis=(2, 3))              # (B, 3)
    return jnp.dot(feats, w)                           # degenerate matmul -> plain XLA


def forward(params, x_nchw, maxmin):
    B, _, H, _ = x_nchw.shape
    x_nhwc = jnp.transpose(x_nchw, (0, 2, 3, 1)).astype(jnp.bfloat16)

    # conv1 -> bn1 (eps=1e-3) -> relu ; conv2 -> bn2 (eps=1e-3) -> relu  (all bf16 out)
    y = conv_bn_relu(x_nhwc, params["conv1_wm"], params["bn1_g"], params["bn1_b"],
                     1e-3, 5, 5, 2)
    y = conv_bn_relu(y, params["conv2_wm"], params["bn2_g"], params["bn2_b"],
                     1e-3, 5, 5, 2)

    # MaxPool2d(7) (kernel=stride=7, floor mode)
    b, oh, ow, co = y.shape
    ph, pw = oh // 7, ow // 7
    yc = y[:, :ph * 7, :pw * 7, :].reshape(b, ph, 7, pw, 7, co)
    pooled = jnp.max(yc, axis=(2, 4))                           # (B, ph, pw, C)
    flat = jnp.transpose(pooled, (0, 3, 1, 2)).reshape(B, -1)   # NCHW flatten order

    # fc (weights & bias zero-initialised in init_weight) — degenerate matmul, plain XLA.
    trans = jnp.dot(flat.astype(jnp.float32), params["fc_w"]) + params["fc_b"][None, :]

    xv = _transform(x_nchw, trans, maxmin, H)

    h1 = classifier_stub(x_nchw, params["cls_w"]).astype(jnp.bfloat16)
    hv = classifier_stub(xv, params["cls_w"]).astype(jnp.bfloat16)

    # Projector (fc1/bn3/relu, fc2/bn4/relu, fc3, bnlast) fully fused; both branches in
    # one call so each weight is streamed from HBM exactly once.
    z1, zv = pallas_projector(params, h1, hv)

    return pallas_barlow_loss(z1, zv)


# ---------------------------------------------------------------------------
# Deterministic parameter initialisation (shapes scaled down from resnet.__init__)
# Weights stored pre-transposed into matmul layout, K-padded to 128 and in bf16 (MXU
# input dtype) so no per-forward cast / pad copies are needed.
# ---------------------------------------------------------------------------

def init_params(key, conv_ch, feat_dim, proj_dim, img_size):
    ks = jax.random.split(key, 6)

    def conv_w_mat(k, cout, cin, kh, kw):
        fan_in, fan_out = cin * kh * kw, cout * kh * kw
        bound = (6.0 / (fan_in + fan_out)) ** 0.5           # xavier_uniform_
        w = jax.random.uniform(k, (cout, cin, kh, kw), jnp.float32, -bound, bound)
        wm = jnp.transpose(w, (2, 3, 1, 0)).reshape(kh * kw * cin, cout)
        kp = _round_up(kh * kw * cin, 128)
        if kp != kh * kw * cin:
            wm = jnp.pad(wm, ((0, kp - kh * kw * cin), (0, 0)))
        return wm.astype(jnp.bfloat16)

    # output geometry: conv1(k5,s2) -> conv2(k5,s2) -> maxpool(7)
    oh1 = (img_size - 5) // 2 + 1
    oh2 = (oh1 - 5) // 2 + 1
    ph = oh2 // 7
    assert ph >= 1, "image too small for MaxPool2d(7)"
    flat_dim = conv_ch * ph * ph

    p = {}
    p["conv1_wm"] = conv_w_mat(ks[0], conv_ch, 3, 5, 5)
    p["conv2_wm"] = conv_w_mat(ks[1], conv_ch, conv_ch, 5, 5)
    p["bn1_g"], p["bn1_b"] = jnp.ones((conv_ch,)), jnp.zeros((conv_ch,))
    p["bn2_g"], p["bn2_b"] = jnp.ones((conv_ch,)), jnp.zeros((conv_ch,))
    p["fc_w"] = jnp.zeros((flat_dim, 6), jnp.float32)       # zeroed in init_weight
    p["fc_b"] = jnp.zeros((6,), jnp.float32)
    p["cls_w"] = jax.random.normal(ks[2], (3, feat_dim)) * 0.02   # classifier stub
    p["fc1_w"] = (jax.random.normal(ks[3], (feat_dim, proj_dim)) *
                  (feat_dim ** -0.5)).astype(jnp.bfloat16)
    p["fc2_w"] = (jax.random.normal(ks[4], (proj_dim, proj_dim)) *
                  (proj_dim ** -0.5)).astype(jnp.bfloat16)
    p["fc3_w"] = (jax.random.normal(ks[5], (proj_dim, proj_dim)) *
                  (proj_dim ** -0.5)).astype(jnp.bfloat16)
    p["bn3_g"], p["bn3_b"] = jnp.ones((proj_dim,)), jnp.zeros((proj_dim,))
    p["bn4_g"], p["bn4_b"] = jnp.ones((proj_dim,)), jnp.zeros((proj_dim,))
    return p


if __name__ == "__main__":
    key = jax.random.PRNGKey(0)
    k_p, k_x, k_max, k_min = jax.random.split(key, 4)

    # Small shapes consistent with the module's forward (scaled-down 224/2048/8192 dims).
    B, IMG = 2, 40            # conv1 -> 18x18, conv2 -> 7x7, maxpool(7) -> 1x1
    CONV_CH, FEAT, PROJ = 128, 128, 256

    params = init_params(k_p, conv_ch=CONV_CH, feat_dim=FEAT, proj_dim=PROJ,
                         img_size=IMG)

    x = jax.random.normal(k_x, (B, 3, IMG, IMG), jnp.float32)
    max_v = jax.random.uniform(k_max, (B, 1), minval=1.0, maxval=2.0)
    min_v = jax.random.uniform(k_min, (B, 1), minval=-1.0, maxval=0.0)
    maxmin = jnp.concatenate([max_v, min_v], axis=1)      # (B, 2): [max, min]

    loss = jax.jit(forward)(params, x, maxmin)
    loss = jax.block_until_ready(loss)
    assert jnp.isfinite(loss), "loss is not finite"
    print("KERNEL_OK")
</pallas_src>

<mosaic_0001>
module attributes {stable_mosaic.version = 11 : i64} {
  func.func @_matmul_stats_kernel(%arg0: i32, %arg1: i32, %arg2: i32, %arg3: memref<336x128xbf16, #tpu.memory_space<vmem>>, %arg4: memref<128x128xbf16, #tpu.memory_space<vmem>>, %arg5: memref<336x128xf32, #tpu.memory_space<vmem>>, %arg6: memref<8x128xf32, #tpu.memory_space<vmem>>, %arg7: memref<336x128xf32, #tpu.memory_space<vmem>>) attributes {dimension_semantics = [#tpu.dimension_semantics<parallel>, #tpu.dimension_semantics<parallel>, #tpu.dimension_semantics<arbitrary>], iteration_bounds = array<i64: 2, 1, 1>, scalar_prefetch = 0 : i64, scratch_operands = 1 : i64, tpu.core_type = #tpu.core_type<tc>, window_params = [{transform_indices = @transform_0, window_bounds = array<i64: 336, 128>}, {transform_indices = @transform_1, window_bounds = array<i64: 128, 128>}, {transform_indices = @transform_2, window_bounds = array<i64: 336, 128>}, {transform_indices = @transform_3, window_bounds = array<i64: 8, 128>}]} {
    %c0_i32 = arith.constant 0 : i32
    %0 = arith.cmpi eq, %arg2, %c0_i32 : i32
    %1 = arith.extui %0 : i1 to i32
    %c0_i32_0 = arith.constant 0 : i32
    %2 = arith.cmpi ne, %1, %c0_i32_0 : i32
    scf.if %2 {
      %cst_10 = arith.constant 0.000000e+00 : f32
      %12 = vector.broadcast %cst_10 : f32 to vector<336x128xf32>
      %c0_11 = arith.constant 0 : index
      %c0_12 = arith.constant 0 : index
      %13 = vector.load %arg7[%c0_11, %c0_12] : memref<336x128xf32, #tpu.memory_space<vmem>>, vector<336x128xf32>
      tpu.vector_store %arg7[%c0_11, %c0_12], %12 {strides = array<i32>} : memref<336x128xf32, #tpu.memory_space<vmem>>, vector<336x128xf32>,
    } else {
    }
    %c0 = arith.constant 0 : index
    %c0_1 = arith.constant 0 : index
    %3 = vector.load %arg7[%c0, %c0_1] : memref<336x128xf32, #tpu.memory_space<vmem>>, vector<336x128xf32>
    %c0_2 = arith.constant 0 : index
    %c0_3 = arith.constant 0 : index
    %4 = vector.load %arg3[%c0_2, %c0_3] : memref<336x128xbf16, #tpu.memory_space<vmem>>, vector<336x128xbf16>
    %c0_4 = arith.constant 0 : index
    %c0_5 = arith.constant 0 : index
    %5 = vector.load %arg4[%c0_4, %c0_5] : memref<128x128xbf16, #tpu.memory_space<vmem>>, vector<128x128xbf16>
    %cst = arith.constant dense<0.000000e+00> : vector<336x128xf32>
    %6 = tpu.matmul %4, %5, %cst {dimension_numbers = #tpu.dot_dimension_numbers<[1], [0], [0], [1], [0, 0, 1, 1], [], []>} : vector<336x128xbf16>, vector<128x128xbf16>, vector<336x128xf32> -> vector<336x128xf32>
    %7 = arith.addf %3, %6 : vector<336x128xf32>
    %c0_6 = arith.constant 0 : index
    %c0_7 = arith.constant 0 : index
    %8 = vector.load %arg7[%c0_6, %c0_7] : memref<336x128xf32, #tpu.memory_space<vmem>>, vector<336x128xf32>
    tpu.vector_store %arg7[%c0_6, %c0_7], %7 {strides = array<i32>} : memref<336x128xf32, #tpu.memory_space<vmem>>, vector<336x128xf32>,
    %c0_i32_8 = arith.constant 0 : i32
    %9 = arith.cmpi eq, %arg2, %c0_i32_8 : i32
    %10 = arith.extui %9 : i1 to i32
    %c0_i32_9 = arith.constant 0 : i32
    %11 = arith.cmpi ne, %10, %c0_i32_9 : i32
    scf.if %11 {
      %c0_10 = arith.constant 0 : index
      %c0_11 = arith.constant 0 : index
      %12 = vector.load %arg7[%c0_10, %c0_11] : memref<336x128xf32, #tpu.memory_space<vmem>>, vector<336x128xf32>
      %c0_12 = arith.constant 0 : index
      %c0_13 = arith.constant 0 : index
      %13 = vector.load %arg5[%c0_12, %c0_13] : memref<336x128xf32, #tpu.memory_space<vmem>>, vector<336x128xf32>
      tpu.vector_store %arg5[%c0_12, %c0_13], %12 {strides = array<i32>} : memref<336x128xf32, #tpu.memory_space<vmem>>, vector<336x128xf32>,
      %cst_14 = arith.constant dense<0.000000e+00> : vector<128xf32>
      %14 = vector.multi_reduction <add>, %12, %cst_14 [0] : vector<336x128xf32> to vector<128xf32>
      %15 = vector.shape_cast %14 : vector<128xf32> to vector<1x128xf32>
      %16 = arith.mulf %12, %12 : vector<336x128xf32>
      %cst_15 = arith.constant dense<0.000000e+00> : vector<128xf32>
      %17 = vector.multi_reduction <add>, %16, %cst_15 [0] : vector<336x128xf32> to vector<128xf32>
      %18 = vector.shape_cast %17 : vector<128xf32> to vector<1x128xf32>
      %19 = tpu.iota {dimensions = array<i32: 0>} : vector<8x128xi32>
      %c0_i32_16 = arith.constant 0 : i32
      %20 = vector.broadcast %c0_i32_16 : i32 to vector<8x128xi32>
      %21 = arith.cmpi eq, %19, %20 : vector<8x128xi32>
      %c1_i32 = arith.constant 1 : i32
      %22 = vector.broadcast %c1_i32 : i32 to vector<8x128xi32>
      %23 = arith.cmpi eq, %19, %22 : vector<8x128xi32>
      %cst_17 = arith.constant 0.000000e+00 : f32
      %24 = vector.shape_cast %18 : vector<1x128xf32> to vector<1x128xf32>
      %25 = vector.broadcast %24 : vector<1x128xf32> to vector<8x128xf32>
      %26 = vector.broadcast %cst_17 : f32 to vector<8x128xf32>
      %27 = arith.select %23, %25, %26 : vector<8x128xi1>, vector<8x128xf32>
      %28 = vector.shape_cast %15 : vector<1x128xf32> to vector<1x128xf32>
      %29 = vector.broadcast %28 : vector<1x128xf32> to vector<8x128xf32>
      %30 = arith.select %21, %29, %27 : vector<8x128xi1>, vector<8x128xf32>
      %c0_18 = arith.constant 0 : index
      %c0_19 = arith.constant 0 : index
      %31 = vector.load %arg6[%c0_18, %c0_19] : memref<8x128xf32, #tpu.memory_space<vmem>>, vector<8x128xf32>
      tpu.vector_store %arg6[%c0_18, %c0_19], %30 {strides = array<i32>} : memref<8x128xf32, #tpu.memory_space<vmem>>, vector<8x128xf32>,
    } else {
    }
    return
  }
  func.func @transform_0(%arg0: i32, %arg1: i32, %arg2: i32) -> (i32, i32) {
    %c0_i32 = arith.constant 0 : i32
    return %arg0, %arg2 : i32, i32
  }
  func.func @transform_1(%arg0: i32, %arg1: i32, %arg2: i32) -> (i32, i32) {
    %c0_i32 = arith.constant 0 : i32
    return %arg2, %arg1 : i32, i32
  }
  func.func @transform_2(%arg0: i32, %arg1: i32, %arg2: i32) -> (i32, i32) {
    %c0_i32 = arith.constant 0 : i32
    return %arg0, %arg1 : i32, i32
  }
  func.func @transform_3(%arg0: i32, %arg1: i32, %arg2: i32) -> (i32, i32) {
    %c0_i32 = arith.constant 0 : i32
    return %arg0, %arg1 : i32, i32
  }
}

module attributes {stable_mosaic.version = 11 : i64} {
  func.func @_scale_bias_kernel(%arg0: i32, %arg1: i32, %arg2: memref<648x128xf32, #tpu.memory_space<vmem>>, %arg3: memref<1x128xf32, #tpu.memory_space<vmem>>, %arg4: memref<1x128xf32, #tpu.memory_space<vmem>>, %arg5: memref<648x128xbf16, #tpu.memory_space<vmem>>) attributes {dimension_semantics = [#tpu.dimension_semantics<parallel>, #tpu.dimension_semantics<parallel>], iteration_bounds = array<i64: 1, 1>, scalar_prefetch = 0 : i64, scratch_operands = 0 : i64, tpu.core_type = #tpu.core_type<tc>, window_params = [{transform_indices = @transform_0, window_bounds = array<i64: 648, 128>}, {transform_indices = @transform_1, window_bounds = array<i64: 1, 128>}, {transform_indices = @transform_2, window_bounds = array<i64: 1, 128>}, {transform_indices = @transform_3, window_bounds = array<i64: 648, 128>}]} {
    %c0 = arith.constant 0 : index
    %c0_0 = arith.constant 0 : index
    %0 = vector.load %arg2[%c0, %c0_0] : memref<648x128xf32, #tpu.memory_space<vmem>>, vector<648x128xf32>
    %c0_1 = arith.constant 0 : index
    %c0_2 = arith.constant 0 : index
    %1 = vector.load %arg3[%c0_1, %c0_2] : memref<1x128xf32, #tpu.memory_space<vmem>>, vector<1x128xf32>
    %2 = vector.broadcast %1 : vector<1x128xf32> to vector<648x128xf32>
    %3 = arith.mulf %0, %2 : vector<648x128xf32>
    %c0_3 = arith.constant 0 : index
    %c0_4 = arith.constant 0 : index
    %4 = vector.load %arg4[%c0_3, %c0_4] : memref<1x128xf32, #tpu.memory_space<vmem>>, vector<1x128xf32>
    %5 = vector.broadcast %4 : vector<1x128xf32> to vector<648x128xf32>
    %6 = arith.addf %3, %5 : vector<648x128xf32>
    %cst = arith.constant 0.000000e+00 : f32
    %7 = vector.broadcast %cst : f32 to vector<648x128xf32>
    %8 = arith.maximumf %6, %7 : vector<648x128xf32>
    %9 = arith.truncf %8 : vector<648x128xf32> to vector<648x128xbf16>
    %c0_5 = arith.constant 0 : index
    %c0_6 = arith.constant 0 : index
    %10 = vector.load %arg5[%c0_5, %c0_6] : memref<648x128xbf16, #tpu.memory_space<vmem>>, vector<648x128xbf16>
    tpu.vector_store %arg5[%c0_5, %c0_6], %9 {strides = array<i32>} : memref<648x128xbf16, #tpu.memory_space<vmem>>, vector<648x128xbf16>,
    return
  }
  func.func @transform_0(%arg0: i32, %arg1: i32) -> (i32, i32) {
    %c0_i32 = arith.constant 0 : i32
    return %arg0, %arg1 : i32, i32
  }
  func.func @transform_1(%arg0: i32, %arg1: i32) -> (i32, i32) {
    %c0_i32 = arith.constant 0 : i32
    %c0_i32_0 = arith.constant 0 : i32
    return %c0_i32, %arg1 : i32, i32
  }
  func.func @transform_2(%arg0: i32, %arg1: i32) -> (i32, i32) {
    %c0_i32 = arith.constant 0 : i32
    %c0_i32_0 = arith.constant 0 : i32
    return %c0_i32, %arg1 : i32, i32
  }
  func.func @transform_3(%arg0: i32, %arg1: i32) -> (i32, i32) {
    %c0_i32 = arith.constant 0 : i32
    return %arg0, %arg1 : i32, i32
  }
}

module attributes {stable_mosaic.version = 11 : i64} {
  func.func @_matmul_stats_kernel(%arg0: i32, %arg1: i32, %arg2: i32, %arg3: memref<64x3200xbf16, #tpu.memory_space<vmem>>, %arg4: memref<3200x128xbf16, #tpu.memory_space<vmem>>, %arg5: memref<64x128xf32, #tpu.memory_space<vmem>>, %arg6: memref<8x128xf32, #tpu.memory_space<vmem>>, %arg7: memref<64x128xf32, #tpu.memory_space<vmem>>) attributes {dimension_semantics = [#tpu.dimension_semantics<parallel>, #tpu.dimension_semantics<parallel>, #tpu.dimension_semantics<arbitrary>], iteration_bounds = array<i64: 2, 1, 1>, scalar_prefetch = 0 : i64, scratch_operands = 1 : i64, tpu.core_type = #tpu.core_type<tc>, window_params = [{transform_indices = @transform_0, window_bounds = array<i64: 64, 3200>}, {transform_indices = @transform_1, window_bounds = array<i64: 3200, 128>}, {transform_indices = @transform_2, window_bounds = array<i64: 64, 128>}, {transform_indices = @transform_3, window_bounds = array<i64: 8, 128>}]} {
    %c0_i32 = arith.constant 0 : i32
    %0 = arith.cmpi eq, %arg2, %c0_i32 : i32
    %1 = arith.extui %0 : i1 to i32
    %c0_i32_0 = arith.constant 0 : i32
    %2 = arith.cmpi ne, %1, %c0_i32_0 : i32
    scf.if %2 {
      %cst_10 = arith.constant 0.000000e+00 : f32
      %12 = vector.broadcast %cst_10 : f32 to vector<64x128xf32>
      %c0_11 = arith.constant 0 : index
      %c0_12 = arith.constant 0 : index
      %13 = vector.load %arg7[%c0_11, %c0_12] : memref<64x128xf32, #tpu.memory_space<vmem>>, vector<64x128xf32>
      tpu.vector_store %arg7[%c0_11, %c0_12], %12 {strides = array<i32>} : memref<64x128xf32, #tpu.memory_space<vmem>>, vector<64x128xf32>,
    } else {
    }
    %c0 = arith.constant 0 : index
    %c0_1 = arith.constant 0 : index
    %3 = vector.load %arg7[%c0, %c0_1] : memref<64x128xf32, #tpu.memory_space<vmem>>, vector<64x128xf32>
    %c0_2 = arith.constant 0 : index
    %c0_3 = arith.constant 0 : index
    %4 = vector.load %arg3[%c0_2, %c0_3] : memref<64x3200xbf16, #tpu.memory_space<vmem>>, vector<64x3200xbf16>
    %c0_4 = arith.constant 0 : index
    %c0_5 = arith.constant 0 : index
    %5 = vector.load %arg4[%c0_4, %c0_5] : memref<3200x128xbf16, #tpu.memory_space<vmem>>, vector<3200x128xbf16>
    %cst = arith.constant dense<0.000000e+00> : vector<64x128xf32>
    %6 = tpu.matmul %4, %5, %cst {dimension_numbers = #tpu.dot_dimension_numbers<[1], [0], [0], [1], [0, 0, 1, 1], [], []>} : vector<64x3200xbf16>, vector<3200x128xbf16>, vector<64x128xf32> -> vector<64x128xf32>
    %7 = arith.addf %3, %6 : vector<64x128xf32>
    %c0_6 = arith.constant 0 : index
    %c0_7 = arith.constant 0 : index
    %8 = vector.load %arg7[%c0_6, %c0_7] : memref<64x128xf32, #tpu.memory_space<vmem>>, vector<64x128xf32>
    tpu.vector_store %arg7[%c0_6, %c0_7], %7 {strides = array<i32>} : memref<64x128xf32, #tpu.memory_space<vmem>>, vector<64x128xf32>,
    %c0_i32_8 = arith.constant 0 : i32
    %9 = arith.cmpi eq, %arg2, %c0_i32_8 : i32
    %10 = arith.extui %9 : i1 to i32
    %c0_i32_9 = arith.constant 0 : i32
    %11 = arith.cmpi ne, %10, %c0_i32_9 : i32
    scf.if %11 {
      %c0_10 = arith.constant 0 : index
      %c0_11 = arith.constant 0 : index
      %12 = vector.load %arg7[%c0_10, %c0_11] : memref<64x128xf32, #tpu.memory_space<vmem>>, vector<64x128xf32>
      %c0_12 = arith.constant 0 : index
      %c0_13 = arith.constant 0 : index
      %13 = vector.load %arg5[%c0_12, %c0_13] : memref<64x128xf32, #tpu.memory_space<vmem>>, vector<64x128xf32>
      tpu.vector_store %arg5[%c0_12, %c0_13], %12 {strides = array<i32>} : memref<64x128xf32, #tpu.memory_space<vmem>>, vector<64x128xf32>,
      %cst_14 = arith.constant dense<0.000000e+00> : vector<128xf32>
      %14 = vector.multi_reduction <add>, %12, %cst_14 [0] : vector<64x128xf32> to vector<128xf32>
      %15 = vector.shape_cast %14 : vector<128xf32> to vector<1x128xf32>
      %16 = arith.mulf %12, %12 : vector<64x128xf32>
      %cst_15 = arith.constant dense<0.000000e+00> : vector<128xf32>
      %17 = vector.multi_reduction <add>, %16, %cst_15 [0] : vector<64x128xf32> to vector<128xf32>
      %18 = vector.shape_cast %17 : vector<128xf32> to vector<1x128xf32>
      %19 = tpu.iota {dimensions = array<i32: 0>} : vector<8x128xi32>
      %c0_i32_16 = arith.constant 0 : i32
      %20 = vector.broadcast %c0_i32_16 : i32 to vector<8x128xi32>
      %21 = arith.cmpi eq, %19, %20 : vector<8x128xi32>
      %c1_i32 = arith.constant 1 : i32
      %22 = vector.broadcast %c1_i32 : i32 to vector<8x128xi32>
      %23 = arith.cmpi eq, %19, %22 : vector<8x128xi32>
      %cst_17 = arith.constant 0.000000e+00 : f32
      %24 = vector.shape_cast %18 : vector<1x128xf32> to vector<1x128xf32>
      %25 = vector.broadcast %24 : vector<1x128xf32> to vector<8x128xf32>
      %26 = vector.broadcast %cst_17 : f32 to vector<8x128xf32>
      %27 = arith.select %23, %25, %26 : vector<8x128xi1>, vector<8x128xf32>
      %28 = vector.shape_cast %15 : vector<1x128xf32> to vector<1x128xf32>
      %29 = vector.broadcast %28 : vector<1x128xf32> to vector<8x128xf32>
      %30 = arith.select %21, %29, %27 : vector<8x128xi1>, vector<8x128xf32>
      %c0_18 = arith.constant 0 : index
      %c0_19 = arith.constant 0 : index
      %31 = vector.load %arg6[%c0_18, %c0_19] : memref<8x128xf32, #tpu.memory_space<vmem>>, vector<8x128xf32>
      tpu.vector_store %arg6[%c0_18, %c0_19], %30 {strides = array<i32>} : memref<8x128xf32, #tpu.memory_space<vmem>>, vector<8x128xf32>,
    } else {
    }
    return
  }
  func.func @transform_0(%arg0: i32, %arg1: i32, %arg2: i32) -> (i32, i32) {
    %c0_i32 = arith.constant 0 : i32
    return %arg0, %arg2 : i32, i32
  }
  func.func @transform_1(%arg0: i32, %arg1: i32, %arg2: i32) -> (i32, i32) {
    %c0_i32 = arith.constant 0 : i32
    return %arg2, %arg1 : i32, i32
  }
  func.func @transform_2(%arg0: i32, %arg1: i32, %arg2: i32) -> (i32, i32) {
    %c0_i32 = arith.constant 0 : i32
    return %arg0, %arg1 : i32, i32
  }
  func.func @transform_3(%arg0: i32, %arg1: i32, %arg2: i32) -> (i32, i32) {
    %c0_i32 = arith.constant 0 : i32
    return %arg0, %arg1 : i32, i32
  }
}

module attributes {stable_mosaic.version = 11 : i64} {
  func.func @_scale_bias_kernel(%arg0: i32, %arg1: i32, %arg2: memref<104x128xf32, #tpu.memory_space<vmem>>, %arg3: memref<1x128xf32, #tpu.memory_space<vmem>>, %arg4: memref<1x128xf32, #tpu.memory_space<vmem>>, %arg5: memref<104x128xbf16, #tpu.memory_space<vmem>>) attributes {dimension_semantics = [#tpu.dimension_semantics<parallel>, #tpu.dimension_semantics<parallel>], iteration_bounds = array<i64: 1, 1>, scalar_prefetch = 0 : i64, scratch_operands = 0 : i64, tpu.core_type = #tpu.core_type<tc>, window_params = [{transform_indices = @transform_0, window_bounds = array<i64: 104, 128>}, {transform_indices = @transform_1, window_bounds = array<i64: 1, 128>}, {transform_indices = @transform_2, window_bounds = array<i64: 1, 128>}, {transform_indices = @transform_3, window_bounds = array<i64: 104, 128>}]} {
    %c0 = arith.constant 0 : index
    %c0_0 = arith.constant 0 : index
    %0 = vector.load %arg2[%c0, %c0_0] : memref<104x128xf32, #tpu.memory_space<vmem>>, vector<104x128xf32>
    %c0_1 = arith.constant 0 : index
    %c0_2 = arith.constant 0 : index
    %1 = vector.load %arg3[%c0_1, %c0_2] : memref<1x128xf32, #tpu.memory_space<vmem>>, vector<1x128xf32>
    %2 = vector.broadcast %1 : vector<1x128xf32> to vector<104x128xf32>
    %3 = arith.mulf %0, %2 : vector<104x128xf32>
    %c0_3 = arith.constant 0 : index
    %c0_4 = arith.constant 0 : index
    %4 = vector.load %arg4[%c0_3, %c0_4] : memref<1x128xf32, #tpu.memory_space<vmem>>, vector<1x128xf32>
    %5 = vector.broadcast %4 : vector<1x128xf32> to vector<104x128xf32>
    %6 = arith.addf %3, %5 : vector<104x128xf32>
    %cst = arith.constant 0.000000e+00 : f32
    %7 = vector.broadcast %cst : f32 to vector<104x128xf32>
    %8 = arith.maximumf %6, %7 : vector<104x128xf32>
    %9 = arith.truncf %8 : vector<104x128xf32> to vector<104x128xbf16>
    %c0_5 = arith.constant 0 : index
    %c0_6 = arith.constant 0 : index
    %10 = vector.load %arg5[%c0_5, %c0_6] : memref<104x128xbf16, #tpu.memory_space<vmem>>, vector<104x128xbf16>
    tpu.vector_store %arg5[%c0_5, %c0_6], %9 {strides = array<i32>} : memref<104x128xbf16, #tpu.memory_space<vmem>>, vector<104x128xbf16>,
    return
  }
  func.func @transform_0(%arg0: i32, %arg1: i32) -> (i32, i32) {
    %c0_i32 = arith.constant 0 : i32
    return %arg0, %arg1 : i32, i32
  }
  func.func @transform_1(%arg0: i32, %arg1: i32) -> (i32, i32) {
    %c0_i32 = arith.constant 0 : i32
    %c0_i32_0 = arith.constant 0 : i32
    return %c0_i32, %arg1 : i32, i32
  }
  func.func @transform_2(%arg0: i32, %arg1: i32) -> (i32, i32) {
    %c0_i32 = arith.constant 0 : i32
    %c0_i32_0 = arith.constant 0 : i32
    return %c0_i32, %arg1 : i32, i32
  }
  func.func @transform_3(%arg0: i32, %arg1: i32) -> (i32, i32) {
    %c0_i32 = arith.constant 0 : i32
    return %arg0, %arg1 : i32, i32
  }
}

module attributes {stable_mosaic.version = 11 : i64} {
  func.func @_bt_loss_kernel(%arg0: i32, %arg1: i32, %arg2: memref<16x256xbf16, #tpu.memory_space<vmem>>, %arg3: memref<16x256xbf16, #tpu.memory_space<vmem>>, %arg4: memref<8x256xf32, #tpu.memory_space<vmem>>, %arg5: memref<8x256xf32, #tpu.memory_space<vmem>>) attributes {dimension_semantics = [#tpu.dimension_semantics<parallel>, #tpu.dimension_semantics<arbitrary>], iteration_bounds = array<i64: 1, 1>, scalar_prefetch = 0 : i64, scratch_operands = 0 : i64, tpu.core_type = #tpu.core_type<tc>, window_params = [{transform_indices = @transform_0, window_bounds = array<i64: 16, 256>}, {transform_indices = @transform_1, window_bounds = array<i64: 16, 256>}, {transform_indices = @transform_2, window_bounds = array<i64: 8, 256>}, {transform_indices = @transform_3, window_bounds = array<i64: 8, 256>}]} {
    %c0_i32 = arith.constant 0 : i32
    %0 = arith.cmpi eq, %arg1, %c0_i32 : i32
    %1 = arith.extui %0 : i1 to i32
    %c0_i32_0 = arith.constant 0 : i32
    %2 = arith.cmpi ne, %1, %c0_i32_0 : i32
    scf.if %2 {
      %cst_7 = arith.constant 0.000000e+00 : f32
      %15 = vector.broadcast %cst_7 : f32 to vector<8x256xf32>
      %c0_8 = arith.constant 0 : index
      %c0_9 = arith.constant 0 : index
      %16 = vector.load %arg4[%c0_8, %c0_9] : memref<8x256xf32, #tpu.memory_space<vmem>>, vector<8x256xf32>
      tpu.vector_store %arg4[%c0_8, %c0_9], %15 {strides = array<i32>} : memref<8x256xf32, #tpu.memory_space<vmem>>, vector<8x256xf32>,
      %cst_10 = arith.constant 0.000000e+00 : f32
      %17 = vector.broadcast %cst_10 : f32 to vector<8x256xf32>
      %c0_11 = arith.constant 0 : index
      %c0_12 = arith.constant 0 : index
      %18 = vector.load %arg5[%c0_11, %c0_12] : memref<8x256xf32, #tpu.memory_space<vmem>>, vector<8x256xf32>
      tpu.vector_store %arg5[%c0_11, %c0_12], %17 {strides = array<i32>} : memref<8x256xf32, #tpu.memory_space<vmem>>, vector<8x256xf32>,
    } else {
    }
    %c0 = arith.constant 0 : index
    %c0_1 = arith.constant 0 : index
    %3 = vector.load %arg2[%c0, %c0_1] : memref<16x256xbf16, #tpu.memory_space<vmem>>, vector<16x256xbf16>
    %c0_2 = arith.constant 0 : index
    %c0_3 = arith.constant 0 : index
    %4 = vector.load %arg3[%c0_2, %c0_3] : memref<16x256xbf16, #tpu.memory_space<vmem>>, vector<16x256xbf16>
    %cst = arith.constant dense<0.000000e+00> : vector<256x256xf32>
    %5 = tpu.matmul %3, %4, %cst {dimension_numbers = #tpu.dot_dimension_numbers<[0], [0], [1], [1], [0, 1, 1, 1], [], []>} : vector<16x256xbf16>, vector<16x256xbf16>, vector<256x256xf32> -> vector<256x256xf32>
    %cst_4 = arith.constant 1.562500e-02 : f32
    %6 = vector.broadcast %cst_4 : f32 to vector<256x256xf32>
    %7 = arith.mulf %5, %6 : vector<256x256xf32>
    %8 = arith.mulf %7, %7 : vector<256x256xf32>
    %9 = arith.cmpi ne, %arg0, %arg1 : i32
    %10 = arith.extui %9 : i1 to i32
    %c0_i32_5 = arith.constant 0 : i32
    %11 = arith.cmpi ne, %10, %c0_i32_5 : i32
    scf.if %11 {
      %c0_7 = arith.constant 0 : index
      %c0_8 = arith.constant 0 : index
      %15 = vector.load %arg5[%c0_7, %c0_8] : memref<8x256xf32, #tpu.memory_space<vmem>>, vector<8x256xf32>
      %cst_9 = arith.constant dense<0.000000e+00> : vector<256xf32>
      %16 = vector.multi_reduction <add>, %8, %cst_9 [0] : vector<256x256xf32> to vector<256xf32>
      %17 = vector.shape_cast %16 : vector<256xf32> to vector<1x256xf32>
      %18 = vector.broadcast %17 : vector<1x256xf32> to vector<8x256xf32>
      %19 = arith.addf %15, %18 : vector<8x256xf32>
      %c0_10 = arith.constant 0 : index
      %c0_11 = arith.constant 0 : index
      %20 = vector.load %arg5[%c0_10, %c0_11] : memref<8x256xf32, #tpu.memory_space<vmem>>, vector<8x256xf32>
      tpu.vector_store %arg5[%c0_10, %c0_11], %19 {strides = array<i32>} : memref<8x256xf32, #tpu.memory_space<vmem>>, vector<8x256xf32>,
    } else {
    }
    %12 = arith.cmpi eq, %arg0, %arg1 : i32
    %13 = arith.extui %12 : i1 to i32
    %c0_i32_6 = arith.constant 0 : i32
    %14 = arith.cmpi ne, %13, %c0_i32_6 : i32
    scf.if %14 {
      %15 = tpu.iota {dimensions = array<i32: 0>} : vector<256x256xi32>
      %16 = tpu.iota {dimensions = array<i32: 1>} : vector<256x256xi32>
      %17 = arith.cmpi eq, %15, %16 : vector<256x256xi32>
      %c0_7 = arith.constant 0 : index
      %c0_8 = arith.constant 0 : index
      %18 = vector.load %arg4[%c0_7, %c0_8] : memref<8x256xf32, #tpu.memory_space<vmem>>, vector<8x256xf32>
      %cst_9 = arith.constant 1.000000e+00 : f32
      %19 = vector.broadcast %cst_9 : f32 to vector<256x256xf32>
      %20 = arith.subf %7, %19 : vector<256x256xf32>
      %21 = arith.mulf %20, %20 : vector<256x256xf32>
      %cst_10 = arith.constant 0.000000e+00 : f32
      %22 = vector.broadcast %cst_10 : f32 to vector<256x256xf32>
      %23 = arith.select %17, %21, %22 : vector<256x256xi1>, vector<256x256xf32>
      %cst_11 = arith.constant dense<0.000000e+00> : vector<256xf32>
      %24 = vector.multi_reduction <add>, %23, %cst_11 [0] : vector<256x256xf32> to vector<256xf32>
      %25 = vector.shape_cast %24 : vector<256xf32> to vector<1x256xf32>
      %26 = vector.broadcast %25 : vector<1x256xf32> to vector<8x256xf32>
      %27 = arith.addf %18, %26 : vector<8x256xf32>
      %c0_12 = arith.constant 0 : index
      %c0_13 = arith.constant 0 : index
      %28 = vector.load %arg4[%c0_12, %c0_13] : memref<8x256xf32, #tpu.memory_space<vmem>>, vector<8x256xf32>
      tpu.vector_store %arg4[%c0_12, %c0_13], %27 {strides = array<i32>} : memref<8x256xf32, #tpu.memory_space<vmem>>, vector<8x256xf32>,
      %c0_14 = arith.constant 0 : index
      %c0_15 = arith.constant 0 : index
      %29 = vector.load %arg5[%c0_14, %c0_15] : memref<8x256xf32, #tpu.memory_space<vmem>>, vector<8x256xf32>
      %cst_16 = arith.constant 0.000000e+00 : f32
      %30 = vector.broadcast %cst_16 : f32 to vector<256x256xf32>
      %31 = arith.select %17, %30, %8 : vector<256x256xi1>, vector<256x256xf32>
      %cst_17 = arith.constant dense<0.000000e+00> : vector<256xf32>
      %32 = vector.multi_reduction <add>, %31, %cst_17 [0] : vector<256x256xf32> to vector<256xf32>
      %33 = vector.shape_cast %32 : vector<256xf32> to vector<1x256xf32>
      %34 = vector.broadcast %33 : vector<1x256xf32> to vector<8x256xf32>
      %35 = arith.addf %29, %34 : vector<8x256xf32>
      %c0_18 = arith.constant 0 : index
      %c0_19 = arith.constant 0 : index
      %36 = vector.load %arg5[%c0_18, %c0_19] : memref<8x256xf32, #tpu.memory_space<vmem>>, vector<8x256xf32>
      tpu.vector_store %arg5[%c0_18, %c0_19], %35 {strides = array<i32>} : memref<8x256xf32, #tpu.memory_space<vmem>>, vector<8x256xf32>,
    } else {
    }
    return
  }
  func.func @transform_0(%arg0: i32, %arg1: i32) -> (i32, i32) {
    %c0_i32 = arith.constant 0 : i32
    %c0_i32_0 = arith.constant 0 : i32
    return %c0_i32, %arg0 : i32, i32
  }
  func.func @transform_1(%arg0: i32, %arg1: i32) -> (i32, i32) {
    %c0_i32 = arith.constant 0 : i32
    %c0_i32_0 = arith.constant 0 : i32
    return %c0_i32, %arg1 : i32, i32
  }
  func.func @transform_2(%arg0: i32, %arg1: i32) -> (i32, i32) {
    %c0_i32 = arith.constant 0 : i32
    %c0_i32_0 = arith.constant 0 : i32
    return %arg0, %c0_i32 : i32, i32
  }
  func.func @transform_3(%arg0: i32, %arg1: i32) -> (i32, i32) {
    %c0_i32 = arith.constant 0 : i32
    %c0_i32_0 = arith.constant 0 : i32
    return %arg0, %c0_i32 : i32, i32
  }
}

module attributes {stable_mosaic.version = 11 : i64} {
  func.func @_projector_kernel(%arg0: memref<2x128xbf16, #tpu.memory_space<vmem>>, %arg1: memref<2x128xbf16, #tpu.memory_space<vmem>>, %arg2: memref<128x256xbf16, #tpu.memory_space<vmem>>, %arg3: memref<256x256xbf16, #tpu.memory_space<vmem>>, %arg4: memref<256x256xbf16, #tpu.memory_space<vmem>>, %arg5: memref<1x256xf32, #tpu.memory_space<vmem>>, %arg6: memref<1x256xf32, #tpu.memory_space<vmem>>, %arg7: memref<1x256xf32, #tpu.memory_space<vmem>>, %arg8: memref<1x256xf32, #tpu.memory_space<vmem>>, %arg9: memref<2x256xbf16, #tpu.memory_space<vmem>>, %arg10: memref<2x256xbf16, #tpu.memory_space<vmem>>) attributes {dimension_semantics = [], scalar_prefetch = 0 : i64, scratch_operands = 0 : i64, tpu.core_type = #tpu.core_type<tc>} {
    %c0 = arith.constant 0 : index
    %c0_0 = arith.constant 0 : index
    %0 = vector.load %arg0[%c0, %c0_0] : memref<2x128xbf16, #tpu.memory_space<vmem>>, vector<2x128xbf16>
    %c0_1 = arith.constant 0 : index
    %c0_2 = arith.constant 0 : index
    %1 = vector.load %arg2[%c0_1, %c0_2] : memref<128x256xbf16, #tpu.memory_space<vmem>>, vector<128x256xbf16>
    %cst = arith.constant dense<0.000000e+00> : vector<2x256xf32>
    %2 = tpu.matmul %0, %1, %cst {dimension_numbers = #tpu.dot_dimension_numbers<[1], [0], [0], [1], [0, 0, 1, 1], [], []>} : vector<2x128xbf16>, vector<128x256xbf16>, vector<2x256xf32> -> vector<2x256xf32>
    %c0_3 = arith.constant 0 : index
    %c0_4 = arith.constant 0 : index
    %3 = vector.load %arg5[%c0_3, %c0_4] : memref<1x256xf32, #tpu.memory_space<vmem>>, vector<1x256xf32>
    %c0_5 = arith.constant 0 : index
    %c0_6 = arith.constant 0 : index
    %4 = vector.load %arg6[%c0_5, %c0_6] : memref<1x256xf32, #tpu.memory_space<vmem>>, vector<1x256xf32>
    %cst_7 = arith.constant dense<0.000000e+00> : vector<256xf32>
    %5 = vector.multi_reduction <add>, %2, %cst_7 [0] : vector<2x256xf32> to vector<256xf32>
    %6 = vector.shape_cast %5 : vector<256xf32> to vector<1x256xf32>
    %cst_8 = arith.constant 2.000000e+00 : f32
    %7 = vector.broadcast %cst_8 : f32 to vector<1x256xf32>
    %8 = arith.divf %6, %7 : vector<1x256xf32>
    %9 = arith.mulf %2, %2 : vector<2x256xf32>
    %cst_9 = arith.constant dense<0.000000e+00> : vector<256xf32>
    %10 = vector.multi_reduction <add>, %9, %cst_9 [0] : vector<2x256xf32> to vector<256xf32>
    %11 = vector.shape_cast %10 : vector<256xf32> to vector<1x256xf32>
    %cst_10 = arith.constant 2.000000e+00 : f32
    %12 = vector.broadcast %cst_10 : f32 to vector<1x256xf32>
    %13 = arith.divf %11, %12 : vector<1x256xf32>
    %14 = arith.mulf %8, %8 : vector<1x256xf32>
    %15 = arith.subf %13, %14 : vector<1x256xf32>
    %cst_11 = arith.constant 0.000000e+00 : f32
    %16 = vector.broadcast %cst_11 : f32 to vector<1x256xf32>
    %17 = arith.maximumf %15, %16 : vector<1x256xf32>
    %18 = vector.broadcast %8 : vector<1x256xf32> to vector<2x256xf32>
    %19 = arith.subf %2, %18 : vector<2x256xf32>
    %cst_12 = arith.constant 9.99999974E-6 : f32
    %20 = vector.broadcast %cst_12 : f32 to vector<1x256xf32>
    %21 = arith.addf %17, %20 : vector<1x256xf32>
    %22 = math.rsqrt %21 : vector<1x256xf32>
    %23 = vector.broadcast %22 : vector<1x256xf32> to vector<2x256xf32>
    %24 = arith.mulf %19, %23 : vector<2x256xf32>
    %25 = vector.broadcast %3 : vector<1x256xf32> to vector<2x256xf32>
    %26 = arith.mulf %24, %25 : vector<2x256xf32>
    %27 = vector.broadcast %4 : vector<1x256xf32> to vector<2x256xf32>
    %28 = arith.addf %26, %27 : vector<2x256xf32>
    %cst_13 = arith.constant 0.000000e+00 : f32
    %29 = vector.broadcast %cst_13 : f32 to vector<2x256xf32>
    %30 = arith.maximumf %28, %29 : vector<2x256xf32>
    %31 = arith.truncf %30 : vector<2x256xf32> to vector<2x256xbf16>
    %c0_14 = arith.constant 0 : index
    %c0_15 = arith.constant 0 : index
    %32 = vector.load %arg3[%c0_14, %c0_15] : memref<256x256xbf16, #tpu.memory_space<vmem>>, vector<256x256xbf16>
    %cst_16 = arith.constant dense<0.000000e+00> : vector<2x256xf32>
    %33 = tpu.matmul %31, %32, %cst_16 {dimension_numbers = #tpu.dot_dimension_numbers<[1], [0], [0], [1], [0, 0, 1, 1], [], []>} : vector<2x256xbf16>, vector<256x256xbf16>, vector<2x256xf32> -> vector<2x256xf32>
    %c0_17 = arith.constant 0 : index
    %c0_18 = arith.constant 0 : index
    %34 = vector.load %arg7[%c0_17, %c0_18] : memref<1x256xf32, #tpu.memory_space<vmem>>, vector<1x256xf32>
    %c0_19 = arith.constant 0 : index
    %c0_20 = arith.constant 0 : index
    %35 = vector.load %arg8[%c0_19, %c0_20] : memref<1x256xf32, #tpu.memory_space<vmem>>, vector<1x256xf32>
    %cst_21 = arith.constant dense<0.000000e+00> : vector<256xf32>
    %36 = vector.multi_reduction <add>, %33, %cst_21 [0] : vector<2x256xf32> to vector<256xf32>
    %37 = vector.shape_cast %36 : vector<256xf32> to vector<1x256xf32>
    %cst_22 = arith.constant 2.000000e+00 : f32
    %38 = vector.broadcast %cst_22 : f32 to vector<1x256xf32>
    %39 = arith.divf %37, %38 : vector<1x256xf32>
    %40 = arith.mulf %33, %33 : vector<2x256xf32>
    %cst_23 = arith.constant dense<0.000000e+00> : vector<256xf32>
    %41 = vector.multi_reduction <add>, %40, %cst_23 [0] : vector<2x256xf32> to vector<256xf32>
    %42 = vector.shape_cast %41 : vector<256xf32> to vector<1x256xf32>
    %cst_24 = arith.constant 2.000000e+00 : f32
    %43 = vector.broadcast %cst_24 : f32 to vector<1x256xf32>
    %44 = arith.divf %42, %43 : vector<1x256xf32>
    %45 = arith.mulf %39, %39 : vector<1x256xf32>
    %46 = arith.subf %44, %45 : vector<1x256xf32>
    %cst_25 = arith.constant 0.000000e+00 : f32
    %47 = vector.broadcast %cst_25 : f32 to vector<1x256xf32>
    %48 = arith.maximumf %46, %47 : vector<1x256xf32>
    %49 = vector.broadcast %39 : vector<1x256xf32> to vector<2x256xf32>
    %50 = arith.subf %33, %49 : vector<2x256xf32>
    %cst_26 = arith.constant 9.99999974E-6 : f32
    %51 = vector.broadcast %cst_26 : f32 to vector<1x256xf32>
    %52 = arith.addf %48, %51 : vector<1x256xf32>
    %53 = math.rsqrt %52 : vector<1x256xf32>
    %54 = vector.broadcast %53 : vector<1x256xf32> to vector<2x256xf32>
    %55 = arith.mulf %50, %54 : vector<2x256xf32>
    %56 = vector.broadcast %34 : vector<1x256xf32> to vector<2x256xf32>
    %57 = arith.mulf %55, %56 : vector<2x256xf32>
    %58 = vector.broadcast %35 : vector<1x256xf32> to vector<2x256xf32>
    %59 = arith.addf %57, %58 : vector<2x256xf32>
    %cst_27 = arith.constant 0.000000e+00 : f32
    %60 = vector.broadcast %cst_27 : f32 to vector<2x256xf32>
    %61 = arith.maximumf %59, %60 : vector<2x256xf32>
    %62 = arith.truncf %61 : vector<2x256xf32> to vector<2x256xbf16>
    %c0_28 = arith.constant 0 : index
    %c0_29 = arith.constant 0 : index
    %63 = vector.load %arg4[%c0_28, %c0_29] : memref<256x256xbf16, #tpu.memory_space<vmem>>, vector<256x256xbf16>
    %cst_30 = arith.constant dense<0.000000e+00> : vector<2x256xf32>
    %64 = tpu.matmul %62, %63, %cst_30 {dimension_numbers = #tpu.dot_dimension_numbers<[1], [0], [0], [1], [0, 0, 1, 1], [], []>} : vector<2x256xbf16>, vector<256x256xbf16>, vector<2x256xf32> -> vector<2x256xf32>
    %cst_31 = arith.constant dense<0.000000e+00> : vector<256xf32>
    %65 = vector.multi_reduction <add>, %64, %cst_31 [0] : vector<2x256xf32> to vector<256xf32>
    %66 = vector.shape_cast %65 : vector<256xf32> to vector<1x256xf32>
    %cst_32 = arith.constant 2.000000e+00 : f32
    %67 = vector.broadcast %cst_32 : f32 to vector<1x256xf32>
    %68 = arith.divf %66, %67 : vector<1x256xf32>
    %69 = arith.mulf %64, %64 : vector<2x256xf32>
    %cst_33 = arith.constant dense<0.000000e+00> : vector<256xf32>
    %70 = vector.multi_reduction <add>, %69, %cst_33 [0] : vector<2x256xf32> to vector<256xf32>
    %71 = vector.shape_cast %70 : vector<256xf32> to vector<1x256xf32>
    %cst_34 = arith.constant 2.000000e+00 : f32
    %72 = vector.broadcast %cst_34 : f32 to vector<1x256xf32>
    %73 = arith.divf %71, %72 : vector<1x256xf32>
    %74 = arith.mulf %68, %68 : vector<1x256xf32>
    %75 = arith.subf %73, %74 : vector<1x256xf32>
    %cst_35 = arith.constant 0.000000e+00 : f32
    %76 = vector.broadcast %cst_35 : f32 to vector<1x256xf32>
    %77 = arith.maximumf %75, %76 : vector<1x256xf32>
    %78 = vector.broadcast %68 : vector<1x256xf32> to vector<2x256xf32>
    %79 = arith.subf %64, %78 : vector<2x256xf32>
    %cst_36 = arith.constant 9.99999974E-6 : f32
    %80 = vector.broadcast %cst_36 : f32 to vector<1x256xf32>
    %81 = arith.addf %77, %80 : vector<1x256xf32>
    %82 = math.rsqrt %81 : vector<1x256xf32>
    %83 = vector.broadcast %82 : vector<1x256xf32> to vector<2x256xf32>
    %84 = arith.mulf %79, %83 : vector<2x256xf32>
    %85 = arith.truncf %84 : vector<2x256xf32> to vector<2x256xbf16>
    %c0_37 = arith.constant 0 : index
    %c0_38 = arith.constant 0 : index
    %86 = vector.load %arg9[%c0_37, %c0_38] : memref<2x256xbf16, #tpu.memory_space<vmem>>, vector<2x256xbf16>
    tpu.vector_store %arg9[%c0_37, %c0_38], %85 {strides = array<i32>} : memref<2x256xbf16, #tpu.memory_space<vmem>>, vector<2x256xbf16>,
    %c0_39 = arith.constant 0 : index
    %c0_40 = arith.constant 0 : index
    %87 = vector.load %arg1[%c0_39, %c0_40] : memref<2x128xbf16, #tpu.memory_space<vmem>>, vector<2x128xbf16>
    %c0_41 = arith.constant 0 : index
    %c0_42 = arith.constant 0 : index
    %88 = vector.load %arg2[%c0_41, %c0_42] : memref<128x256xbf16, #tpu.memory_space<vmem>>, vector<128x256xbf16>
    %cst_43 = arith.constant dense<0.000000e+00> : vector<2x256xf32>
    %89 = tpu.matmul %87, %88, %cst_43 {dimension_numbers = #tpu.dot_dimension_numbers<[1], [0], [0], [1], [0, 0, 1, 1], [], []>} : vector<2x128xbf16>, vector<128x256xbf16>, vector<2x256xf32> -> vector<2x256xf32>
    %c0_44 = arith.constant 0 : index
    %c0_45 = arith.constant 0 : index
    %90 = vector.load %arg5[%c0_44, %c0_45] : memref<1x256xf32, #tpu.memory_space<vmem>>, vector<1x256xf32>
    %c0_46 = arith.constant 0 : index
    %c0_47 = arith.constant 0 : index
    %91 = vector.load %arg6[%c0_46, %c0_47] : memref<1x256xf32, #tpu.memory_space<vmem>>, vector<1x256xf32>
    %cst_48 = arith.constant dense<0.000000e+00> : vector<256xf32>
    %92 = vector.multi_reduction <add>, %89, %cst_48 [0] : vector<2x256xf32> to vector<256xf32>
    %93 = vector.shape_cast %92 : vector<256xf32> to vector<1x256xf32>
    %cst_49 = arith.constant 2.000000e+00 : f32
    %94 = vector.broadcast %cst_49 : f32 to vector<1x256xf32>
    %95 = arith.divf %93, %94 : vector<1x256xf32>
    %96 = arith.mulf %89, %89 : vector<2x256xf32>
    %cst_50 = arith.constant dense<0.000000e+00> : vector<256xf32>
    %97 = vector.multi_reduction <add>, %96, %cst_50 [0] : vector<2x256xf32> to vector<256xf32>
    %98 = vector.shape_cast %97 : vector<256xf32> to vector<1x256xf32>
    %cst_51 = arith.constant 2.000000e+00 : f32
    %99 = vector.broadcast %cst_51 : f32 to vector<1x256xf32>
    %100 = arith.divf %98, %99 : vector<1x256xf32>
    %101 = arith.mulf %95, %95 : vector<1x256xf32>
    %102 = arith.subf %100, %101 : vector<1x256xf32>
    %cst_52 = arith.constant 0.000000e+00 : f32
    %103 = vector.broadcast %cst_52 : f32 to vector<1x256xf32>
    %104 = arith.maximumf %102, %103 : vector<1x256xf32>
    %105 = vector.broadcast %95 : vector<1x256xf32> to vector<2x256xf32>
    %106 = arith.subf %89, %105 : vector<2x256xf32>
    %cst_53 = arith.constant 9.99999974E-6 : f32
    %107 = vector.broadcast %cst_53 : f32 to vector<1x256xf32>
    %108 = arith.addf %104, %107 : vector<1x256xf32>
    %109 = math.rsqrt %108 : vector<1x256xf32>
    %110 = vector.broadcast %109 : vector<1x256xf32> to vector<2x256xf32>
    %111 = arith.mulf %106, %110 : vector<2x256xf32>
    %112 = vector.broadcast %90 : vector<1x256xf32> to vector<2x256xf32>
    %113 = arith.mulf %111, %112 : vector<2x256xf32>
    %114 = vector.broadcast %91 : vector<1x256xf32> to vector<2x256xf32>
    %115 = arith.addf %113, %114 : vector<2x256xf32>
    %cst_54 = arith.constant 0.000000e+00 : f32
    %116 = vector.broadcast %cst_54 : f32 to vector<2x256xf32>
    %117 = arith.maximumf %115, %116 : vector<2x256xf32>
    %118 = arith.truncf %117 : vector<2x256xf32> to vector<2x256xbf16>
    %c0_55 = arith.constant 0 : index
    %c0_56 = arith.constant 0 : index
    %119 = vector.load %arg3[%c0_55, %c0_56] : memref<256x256xbf16, #tpu.memory_space<vmem>>, vector<256x256xbf16>
    %cst_57 = arith.constant dense<0.000000e+00> : vector<2x256xf32>
    %120 = tpu.matmul %118, %119, %cst_57 {dimension_numbers = #tpu.dot_dimension_numbers<[1], [0], [0], [1], [0, 0, 1, 1], [], []>} : vector<2x256xbf16>, vector<256x256xbf16>, vector<2x256xf32> -> vector<2x256xf32>
    %c0_58 = arith.constant 0 : index
    %c0_59 = arith.constant 0 : index
    %121 = vector.load %arg7[%c0_58, %c0_59] : memref<1x256xf32, #tpu.memory_space<vmem>>, vector<1x256xf32>
    %c0_60 = arith.constant 0 : index
    %c0_61 = arith.constant 0 : index
    %122 = vector.load %arg8[%c0_60, %c0_61] : memref<1x256xf32, #tpu.memory_space<vmem>>, vector<1x256xf32>
    %cst_62 = arith.constant dense<0.000000e+00> : vector<256xf32>
    %123 = vector.multi_reduction <add>, %120, %cst_62 [0] : vector<2x256xf32> to vector<256xf32>
    %124 = vector.shape_cast %123 : vector<256xf32> to vector<1x256xf32>
    %cst_63 = arith.constant 2.000000e+00 : f32
    %125 = vector.broadcast %cst_63 : f32 to vector<1x256xf32>
    %126 = arith.divf %124, %125 : vector<1x256xf32>
    %127 = arith.mulf %120, %120 : vector<2x256xf32>
    %cst_64 = arith.constant dense<0.000000e+00> : vector<256xf32>
    %128 = vector.multi_reduction <add>, %127, %cst_64 [0] : vector<2x256xf32> to vector<256xf32>
    %129 = vector.shape_cast %128 : vector<256xf32> to vector<1x256xf32>
    %cst_65 = arith.constant 2.000000e+00 : f32
    %130 = vector.broadcast %cst_65 : f32 to vector<1x256xf32>
    %131 = arith.divf %129, %130 : vector<1x256xf32>
    %132 = arith.mulf %126, %126 : vector<1x256xf32>
    %133 = arith.subf %131, %132 : vector<1x256xf32>
    %cst_66 = arith.constant 0.000000e+00 : f32
    %134 = vector.broadcast %cst_66 : f32 to vector<1x256xf32>
    %135 = arith.maximumf %133, %134 : vector<1x256xf32>
    %136 = vector.broadcast %126 : vector<1x256xf32> to vector<2x256xf32>
    %137 = arith.subf %120, %136 : vector<2x256xf32>
    %cst_67 = arith.constant 9.99999974E-6 : f32
    %138 = vector.broadcast %cst_67 : f32 to vector<1x256xf32>
    %139 = arith.addf %135, %138 : vector<1x256xf32>
    %140 = math.rsqrt %139 : vector<1x256xf32>
    %141 = vector.broadcast %140 : vector<1x256xf32> to vector<2x256xf32>
    %142 = arith.mulf %137, %141 : vector<2x256xf32>
    %143 = vector.broadcast %121 : vector<1x256xf32> to vector<2x256xf32>
    %144 = arith.mulf %142, %143 : vector<2x256xf32>
    %145 = vector.broadcast %122 : vector<1x256xf32> to vector<2x256xf32>
    %146 = arith.addf %144, %145 : vector<2x256xf32>
    %cst_68 = arith.constant 0.000000e+00 : f32
    %147 = vector.broadcast %cst_68 : f32 to vector<2x256xf32>
    %148 = arith.maximumf %146, %147 : vector<2x256xf32>
    %149 = arith.truncf %148 : vector<2x256xf32> to vector<2x256xbf16>
    %c0_69 = arith.constant 0 : index
    %c0_70 = arith.constant 0 : index
    %150 = vector.load %arg4[%c0_69, %c0_70] : memref<256x256xbf16, #tpu.memory_space<vmem>>, vector<256x256xbf16>
    %cst_71 = arith.constant dense<0.000000e+00> : vector<2x256xf32>
    %151 = tpu.matmul %149, %150, %cst_71 {dimension_numbers = #tpu.dot_dimension_numbers<[1], [0], [0], [1], [0, 0, 1, 1], [], []>} : vector<2x256xbf16>, vector<256x256xbf16>, vector<2x256xf32> -> vector<2x256xf32>
    %cst_72 = arith.constant dense<0.000000e+00> : vector<256xf32>
    %152 = vector.multi_reduction <add>, %151, %cst_72 [0] : vector<2x256xf32> to vector<256xf32>
    %153 = vector.shape_cast %152 : vector<256xf32> to vector<1x256xf32>
    %cst_73 = arith.constant 2.000000e+00 : f32
    %154 = vector.broadcast %cst_73 : f32 to vector<1x256xf32>
    %155 = arith.divf %153, %154 : vector<1x256xf32>
    %156 = arith.mulf %151, %151 : vector<2x256xf32>
    %cst_74 = arith.constant dense<0.000000e+00> : vector<256xf32>
    %157 = vector.multi_reduction <add>, %156, %cst_74 [0] : vector<2x256xf32> to vector<256xf32>
    %158 = vector.shape_cast %157 : vector<256xf32> to vector<1x256xf32>
    %cst_75 = arith.constant 2.000000e+00 : f32
    %159 = vector.broadcast %cst_75 : f32 to vector<1x256xf32>
    %160 = arith.divf %158, %159 : vector<1x256xf32>
    %161 = arith.mulf %155, %155 : vector<1x256xf32>
    %162 = arith.subf %160, %161 : vector<1x256xf32>
    %cst_76 = arith.constant 0.000000e+00 : f32
    %163 = vector.broadcast %cst_76 : f32 to vector<1x256xf32>
    %164 = arith.maximumf %162, %163 : vector<1x256xf32>
    %165 = vector.broadcast %155 : vector<1x256xf32> to vector<2x256xf32>
    %166 = arith.subf %151, %165 : vector<2x256xf32>
    %cst_77 = arith.constant 9.99999974E-6 : f32
    %167 = vector.broadcast %cst_77 : f32 to vector<1x256xf32>
    %168 = arith.addf %164, %167 : vector<1x256xf32>
    %169 = math.rsqrt %168 : vector<1x256xf32>
    %170 = vector.broadcast %169 : vector<1x256xf32> to vector<2x256xf32>
    %171 = arith.mulf %166, %170 : vector<2x256xf32>
    %172 = arith.truncf %171 : vector<2x256xf32> to vector<2x256xbf16>
    %c0_78 = arith.constant 0 : index
    %c0_79 = arith.constant 0 : index
    %173 = vector.load %arg10[%c0_78, %c0_79] : memref<2x256xbf16, #tpu.memory_space<vmem>>, vector<2x256xbf16>
    tpu.vector_store %arg10[%c0_78, %c0_79], %172 {strides = array<i32>} : memref<2x256xbf16, #tpu.memory_space<vmem>>, vector<2x256xbf16>,
    return
  }
}

</mosaic_0001>

<bundles_post_ra>
// kernel: forward.6
= control target key start
LH: loop header
LB: loop body
LE: loop exit
PB: predicated region body
PF: predicated region fallthrough
CT: control target
= control target key end

     0   :  { %s1526_s12 = smov 0   ;;  %s1528_s13 = smov 0   ;;  %s1840_s0 = inlined_call_operand.vmem [shape: bf16[672,128], index: 0, kind: input, shape index: {}]   ;;  %s1841_s1 = inlined_call_operand.vmem [shape: bf16[128,128], index: 1, kind: input, shape index: {}]   ;;  %s1842_s2 = inlined_call_operand.vmem [shape: f32[672,128], index: 2, kind: output, shape index: {0}]   ;;  %s1843_s3 = inlined_call_operand.vmem [shape: f32[16,128], index: 3, kind: output, shape index: {1}]  }
   0x1   :  { %s1530_s14 = smov 0  }
   0x2 LB: > { %s33_s15 = sadd.s32 1, %s1498_s13  ;;  %p1245_p0 = scmp.ge.s32.totalorder %s1502_s14, 1  ;;  %s1502_s14 = sphi %s1530_s14, %s14_s14   ;;  %s1498_s13 = sphi %s1528_s13, %s1845_s13   ;;  %s1494_s12 = sphi %s1526_s12, %s1844_s12  }
   0x3   : > { %p35_p1 = scmp.ge.s32.totalorder %s33_s15, 2  ;;  %p185_p2 = scmp.lt.s32.totalorder %s1502_s14, 3 }
   0x5   : > { %s1847_s15 = smov (%p35_p1, %s33_s15), 0  ;;  %p186_p3 = pnand %p1245_p0, %p185_p2 }
   0x6   : > { %v1451_v0 = vld [vmem:[%s1841_s1] sm:$0xff] (!%p186_p3)   ;;  %v1504_v1 = vmov (!%p186_p3), 0.0   ;;  %v1452_v2 = vld [vmem:[%s1841_s1 + $0x8] sm:$0xff] (!%p186_p3)   ;;  %vm1505_vm0 = vmmov (!%p186_p3), 0   ;;  %s230_s20 = smul.u32 (!%p186_p3), 42, %s1494_s12  ;;  %v1453_v3 = vld [vmem:[%s1841_s1 + $0x10] sm:$0xff] (!%p186_p3)  }
   0x7   : > { %189 = sbr.rel (%p186_p3) target bundleno = 392 (0x188), region = 28  ;;  %1309 = vmatprep.subr.bf16.mxu0 (!%p186_p3), %v1504_v1  ;;  %1409 = vmatprep.subr.bf16.mxu1 (!%p186_p3), %v1504_v1  ;;  %v1454_v4 = vld [vmem:[%s1841_s1 + $0x18] sm:$0xff] (!%p186_p3)   ;;  %v1455_v5 = vld [vmem:[%s1841_s1 + $0x20] sm:$0xff] (!%p186_p3)   ;;  %v1456_v6 = vld [vmem:[%s1841_s1 + $0x28] sm:$0xff] (!%p186_p3)   ;;  %p257_p5 = scmp.lt.s32.totalorder (!%p186_p3), %s1494_s12, 1 }
   0x8   : > { %1310 = vmatpush3.bf16.msra.mxu0 (!%p186_p3), %v1451_v0  ;;  %1325 = vmatprep.mubr.msk.bf16.mxu0 (!%p186_p3), %vm1505_vm0, %v1504_v1  ;;  %p231_p4 = scmp.lt.s32.totalorder (!%p186_p3), %s230_s20, 83  ;;  %v1457_v7 = vld [vmem:[%s1841_s1 + $0x30] sm:$0xff] (!%p186_p3)   ;;  %v1458_v8 = vld [vmem:[%s1841_s1 + $0x38] sm:$0xff] (!%p186_p3)  }
   0x9   : > { %1311 = vmatprep.subr.bf16.mxu0 (!%p186_p3), %v1504_v1  ;;  %1417 = vmatpush3.bf16.msra.mxu1 (!%p186_p3), %v1451_v0 }
   0xa   : > { %1410 = vmatprep.subr.bf16.mxu1 (!%p186_p3), %v1504_v1  ;;  %1369 = vmatprep.mubr.msk.bf16.mxu1 (!%p186_p3), %vm1505_vm0, %v1504_v1 }
   0xc   : > { %1312 = vmatpush3.bf16.msra.mxu0 (!%p186_p3), %v1452_v2 }
   0xd   : > { %1313 = vmatprep.subr.bf16.mxu0 (!%p186_p3), %v1504_v1  ;;  %1418 = vmatpush3.bf16.msra.mxu1 (!%p186_p3), %v1452_v2 }
   0xe   : > { %s1849_s20 = smov (!%p231_p4, %s230_s20), 83  ;;  %1411 = vmatprep.subr.bf16.mxu1 %v1504_v1  ;;  %s1851_s12 = smov (!%p257_p5, %s1494_s12), 1 }
   0xf   : > { %s1246_s23 = sshll.u32 %s1849_s20, 2  ;;  %s1247_s10 = sshll.u32 %s1849_s20, 3 }
  0x10   : > { %s1572_s26 = scalar_lea.vmem %s1840_s0, %s1246_s23  ;;  %1314 = vmatpush3.bf16.msra.mxu0 %v1453_v3  ;;  %s1662_s17 = scalar_lea.vmem %s1842_s2, %s1247_s10 }
  0x11   : > { %1315 = vmatprep.subr.bf16.mxu0 %v1504_v1  ;;  %1419 = vmatpush3.bf16.msra.mxu1 %v1453_v3  ;;  %v1459_v9 = vld [vmem:[%s1572_s26] sm:$0xff]   ;;  %v1465_v10 = vld [vmem:[%s1572_s26 + $0x58] sm:$0xff]   ;;  %v1460_v11 = vld [vmem:[%s1572_s26 + $0x8] sm:$0xff]   ;;  %s1248_s18 = sshll.u32 %s1851_s12, 3 }
  0x12   : > { %1412 = vmatprep.subr.bf16.mxu1 %v1504_v1  ;;  %v1467_v12 = vld [vmem:[%s1572_s26 + $0x60] sm:$0xff]   ;;  %v1461_v13 = vld [vmem:[%s1572_s26 + $0x10] sm:$0xff]   ;;  %v1469_v14 = vld [vmem:[%s1572_s26 + $0x68] sm:$0xff]   ;;  %s263_s21 = scalar_lea.vmem %s1843_s3, %s1248_s18 }
  0x13   : > { %v1462_v15 = vld [vmem:[%s1572_s26 + $0x18] sm:$0xff]   ;;  %v1471_v16 = vld [vmem:[%s1572_s26 + $0x70] sm:$0xff]   ;;  %v1463_v17 = vld [vmem:[%s1572_s26 + $0x20] sm:$0xff]  }
  0x14   : > { %1316 = vmatpush3.bf16.msra.mxu0 %v1454_v4  ;;  %v1473_v18 = vld [vmem:[%s1572_s26 + $0x78] sm:$0xff]   ;;  %v1464_v19 = vld [vmem:[%s1572_s26 + $0x28] sm:$0xff]   ;;  %v1475_v20 = vld [vmem:[%s1572_s26 + $0x80] sm:$0xff]  }
  0x15   : > { %1317 = vmatprep.subr.bf16.mxu0 %v1504_v1  ;;  %1420 = vmatpush3.bf16.msra.mxu1 %v1454_v4  ;;  %v1466_v21 = vld [vmem:[%s1572_s26 + $0x30] sm:$0xff]   ;;  %v1476_v22 = vld [vmem:[%s1572_s26 + $0x88] sm:$0xff]   ;;  %v1468_v23 = vld [vmem:[%s1572_s26 + $0x38] sm:$0xff]  }
  0x16   : > { %1413 = vmatprep.subr.bf16.mxu1 %v1504_v1  ;;  %v1477_v24 = vld [vmem:[%s1572_s26 + $0x90] sm:$0xff]   ;;  %v1470_v25 = vld [vmem:[%s1572_s26 + $0x40] sm:$0xff]   ;;  %v1478_v26 = vld [vmem:[%s1572_s26 + $0x98] sm:$0xff]  }
  0x17   : > { %v1472_v27 = vld [vmem:[%s1572_s26 + $0x48] sm:$0xff]   ;;  %v1479_v28 = vld [vmem:[%s1572_s26 + $0xa0] sm:$0xff]   ;;  %v1474_v29 = vld [vmem:[%s1572_s26 + $0x50] sm:$0xff]  }
  0x18   : > { %1318 = vmatpush3.bf16.msra.mxu0 %v1455_v5 }
  0x19   : > { %1319 = vmatprep.subr.bf16.mxu0 %v1504_v1  ;;  %1421 = vmatpush3.bf16.msra.mxu1 %v1455_v5 }
  0x1a   : > { %1414 = vmatprep.subr.bf16.mxu1 %v1504_v1 }
  0x1c   : > { %1320 = vmatpush3.bf16.msra.mxu0 %v1456_v6 }
  0x1d   : > { %1321 = vmatprep.subr.bf16.mxu0 %v1504_v1  ;;  %1422 = vmatpush3.bf16.msra.mxu1 %v1456_v6 }
  0x1e   : > { %1415 = vmatprep.subr.bf16.mxu1 %v1504_v1 }
  0x20   : > { %1322 = vmatpush3.bf16.msra.mxu0 %v1457_v7 }
  0x21   : > { %1323 = vmatprep.subr.bf16.mxu0 %v1504_v1  ;;  %1423 = vmatpush3.bf16.msra.mxu1 %v1457_v7 }
  0x22   : > { %1416 = vmatprep.subr.bf16.mxu1 %v1504_v1 }
  0x24   : > { %1324 = vmatpush3.bf16.msra.mxu0 %v1458_v8 }
  0x25   : > { %1424 = vmatpush3.bf16.msra.mxu1 %v1458_v8 }
  0x27   : > { %1326 = vmatmul.mubr.bf16.vlgmr.msra.gmra.mrb[0].mxu0 %v1459_v9 }
  0x28   : > { %1329 = vmatprep.mubr.msk.bf16.mxu0 %vm1505_vm0, %v1504_v1  ;;  %1370 = vmatmul.mubr.bf16.vlgmr.msra.gmra.mrb[0].mxu1 %v1465_v10 }
  0x29   : > { %1373 = vmatprep.mubr.msk.bf16.mxu1 %vm1505_vm0, %v1504_v1 }
  0x2f   : > { %1330 = vmatmul.mubr.bf16.gmra.mrb[4].mxu0 %v1460_v11 }
  0x30   : > { %1333 = vmatprep.mubr.msk.bf16.mxu0 %vm1505_vm0, %v1504_v1  ;;  %1374 = vmatmul.mubr.bf16.gmra.mrb[4].mxu1 %v1467_v12 }
  0x31   : > { %1377 = vmatprep.mubr.msk.bf16.mxu1 %vm1505_vm0, %v1504_v1 }
  0x37   : > { %1334 = vmatmul.mubr.bf16.gmra.mrb[8].mxu0 %v1461_v13 }
  0x38   : > { %1337 = vmatprep.mubr.msk.bf16.mxu0 %vm1505_vm0, %v1504_v1  ;;  %1378 = vmatmul.mubr.bf16.gmra.mrb[8].mxu1 %v1469_v14 }
  0x39   : > { %1381 = vmatprep.mubr.msk.bf16.mxu1 %vm1505_vm0, %v1504_v1 }
  0x3f   : > { %1338 = vmatmul.mubr.bf16.gmra.mrb[12].mxu0 %v1462_v15 }
  0x40   : > { %1341 = vmatprep.mubr.msk.bf16.mxu0 %vm1505_vm0, %v1504_v1  ;;  %1382 = vmatmul.mubr.bf16.gmra.mrb[12].mxu1 %v1471_v16 }
  0x41   : > { %1385 = vmatprep.mubr.msk.bf16.mxu1 %vm1505_vm0, %v1504_v1 }
  0x47   : > { %1342 = vmatmul.mubr.bf16.gmra.mrb[16].mxu0 %v1463_v17 }
  0x48   : > { %1345 = vmatprep.mubr.msk.bf16.mxu0 %vm1505_vm0, %v1504_v1  ;;  %1386 = vmatmul.mubr.bf16.gmra.mrb[16].mxu1 %v1473_v18 }
  0x49   : > { %1389 = vmatprep.mubr.msk.bf16.mxu1 %vm1505_vm0, %v1504_v1 }
  0x4f   : > { %1346 = vmatmul.mubr.bf16.gmra.mrb[20].mxu0 %v1464_v19 }
  0x50   : > { %1349 = vmatprep.mubr.msk.bf16.mxu0 %vm1505_vm0, %v1504_v1  ;;  %1390 = vmatmul.mubr.bf16.gmra.mrb[20].mxu1 %v1475_v20 }
  0x51   : > { %1393 = vmatprep.mubr.msk.bf16.mxu1 %vm1505_vm0, %v1504_v1 }
  0x57   : > { %1350 = vmatmul.mubr.bf16.gmra.mrb[24].mxu0 %v1466_v21 }
  0x58   : > { %1353 = vmatprep.mubr.msk.bf16.mxu0 %vm1505_vm0, %v1504_v1  ;;  %1394 = vmatmul.mubr.bf16.gmra.mrb[24].mxu1 %v1476_v22 }
  0x59   : > { %1397 = vmatprep.mubr.msk.bf16.mxu1 %vm1505_vm0, %v1504_v1 }
  0x5f   : > { %1354 = vmatmul.mubr.bf16.gmra.mrb[28].mxu0 %v1468_v23 }
  0x60   : > { %1357 = vmatprep.mubr.msk.bf16.mxu0 %vm1505_vm0, %v1504_v1  ;;  %1398 = vmatmul.mubr.bf16.gmra.mrb[28].mxu1 %v1477_v24 }
  0x61   : > { %1401 = vmatprep.mubr.msk.bf16.mxu1 %vm1505_vm0, %v1504_v1 }
  0x67   : > { %1358 = vmatmul.mubr.bf16.gmra.mrb[32].mxu0 %v1470_v25 }
  0x68   : > { %1361 = vmatprep.mubr.msk.bf16.mxu0 %vm1505_vm0, %v1504_v1  ;;  %1402 = vmatmul.mubr.bf16.gmra.mrb[32].mxu1 %v1478_v26 }
  0x69   : > { %1405 = vmatprep.mubr.msk.bf16.mxu1 %vm1505_vm0, %v1504_v1 }
  0x6f   : > { %1362 = vmatmul.mubr.bf16.gmra.mrb[36].mxu0 %v1472_v27 }
  0x70   : > { %1365 = vmatprep.mubr.msk.bf16.mxu0 %vm1505_vm0, %v1504_v1  ;;  %1406 = vmatmul.mubr.bf16.gmra.mrb[36].mxu1 %v1479_v28 }
  0x77   : > { %1366 = vmatmul.mubr.bf16.gmra.mrb[40].mxu0 %v1474_v29 }
  0xfa   : > { %v619_v30 = vpop.f32.mrb[0].mxu0 }
  0xfb   : > { %915 = vst [vmem:[%s1662_s17] sm:$0xff] %v619_v30  ;;  %v1327_v31 = vpop.f32.mrb[1].mxu0  ;;  %v1665_v32 = vpop.f32.mrb[0].mxu1  ;;  %v1004_v35 = vmul.f32 %v619_v30, %v619_v30 }
  0xfc   : > { %v622_v33 = vpop.f32.mrb[2].mxu0  ;;  %937 = vst [vmem:[%s1662_s17 + $0xb0] sm:$0xff] %v1665_v32  ;;  %v1371_v34 = vpop.f32.mrb[1].mxu1 }
  0xfd   : > { %916 = vst [vmem:[%s1662_s17 + $0x8] sm:$0xff] %v622_v33  ;;  %v957_v36 = vadd.f32 %v622_v33, %v619_v30  ;;  %v1005_v37 = vmul.f32 %v622_v33, %v622_v33  ;;  %v1328_v38 = vpop.f32.mrb[3].mxu0  ;;  %v1670_v39 = vpop.f32.mrb[2].mxu1 }
  0xfe   : > { %938 = vst [vmem:[%s1662_s17 + $0xb8] sm:$0xff] %v1670_v39  ;;  %v1372_v40 = vpop.f32.mrb[3].mxu1 }
  0xff   : > { %v1046_v41 = vadd.f32 %v1005_v37, %v1004_v35 }
 0x102   : > { %v627_v42 = vpop.f32.mrb[4].mxu0 }
 0x103   : > { %917 = vst [vmem:[%s1662_s17 + $0x10] sm:$0xff] %v627_v42  ;;  %v958_v43 = vadd.f32 %v957_v36, %v627_v42  ;;  %v1006_v44 = vmul.f32 %v627_v42, %v627_v42  ;;  %v1331_v45 = vpop.f32.mrb[5].mxu0  ;;  %v1675_v46 = vpop.f32.mrb[4].mxu1 }
 0x104   : > { %v630_v47 = vpop.f32.mrb[6].mxu0  ;;  %939 = vst [vmem:[%s1662_s17 + $0xc0] sm:$0xff] %v1675_v46  ;;  %v1375_v48 = vpop.f32.mrb[5].mxu1 }
 0x105   : > { %v1047_v49 = vadd.f32 %v1046_v41, %v1006_v44  ;;  %918 = vst [vmem:[%s1662_s17 + $0x18] sm:$0xff] %v630_v47  ;;  %v959_v50 = vadd.f32 %v958_v43, %v630_v47  ;;  %v1007_v51 = vmul.f32 %v630_v47, %v630_v47  ;;  %v1332_v52 = vpop.f32.mrb[7].mxu0  ;;  %v1680_v53 = vpop.f32.mrb[6].mxu1 }
 0x106   : > { %940 = vst [vmem:[%s1662_s17 + $0xc8] sm:$0xff] %v1680_v53  ;;  %v1376_v54 = vpop.f32.mrb[7].mxu1 }
 0x107   : > { %v1048_v55 = vadd.f32 %v1047_v49, %v1007_v51 }
 0x10a   : > { %v635_v56 = vpop.f32.mrb[8].mxu0 }
 0x10b   : > { %919 = vst [vmem:[%s1662_s17 + $0x20] sm:$0xff] %v635_v56  ;;  %v960_v57 = vadd.f32 %v959_v50, %v635_v56  ;;  %v1008_v58 = vmul.f32 %v635_v56, %v635_v56  ;;  %v1335_v59 = vpop.f32.mrb[9].mxu0  ;;  %v1685_v60 = vpop.f32.mrb[8].mxu1 }
 0x10c   : > { %v638_v61 = vpop.f32.mrb[10].mxu0  ;;  %941 = vst [vmem:[%s1662_s17 + $0xd0] sm:$0xff] %v1685_v60  ;;  %v1379_v62 = vpop.f32.mrb[9].mxu1 }
 0x10d   : > { %v1049_v63 = vadd.f32 %v1048_v55, %v1008_v58  ;;  %920 = vst [vmem:[%s1662_s17 + $0x28] sm:$0xff] %v638_v61  ;;  %v961_v0 = vadd.f32 %v960_v57, %v638_v61  ;;  %v1009_v1 = vmul.f32 %v638_v61, %v638_v61  ;;  %v1336_v2 = vpop.f32.mrb[11].mxu0  ;;  %v1690_v3 = vpop.f32.mrb[10].mxu1 }
 0x10e   : > { %942 = vst [vmem:[%s1662_s17 + $0xd8] sm:$0xff] %v1690_v3  ;;  %v1380_v4 = vpop.f32.mrb[11].mxu1 }
 0x10f   : > { %v1050_v5 = vadd.f32 %v1049_v63, %v1009_v1 }
 0x112   : > { %v643_v6 = vpop.f32.mrb[12].mxu0 }
 0x113   : > { %921 = vst [vmem:[%s1662_s17 + $0x30] sm:$0xff] %v643_v6  ;;  %v962_v7 = vadd.f32 %v961_v0, %v643_v6  ;;  %v1010_v8 = vmul.f32 %v643_v6, %v643_v6  ;;  %v1339_v9 = vpop.f32.mrb[13].mxu0  ;;  %v1695_v10 = vpop.f32.mrb[12].mxu1 }
 0x114   : > { %v646_v11 = vpop.f32.mrb[14].mxu0  ;;  %943 = vst [vmem:[%s1662_s17 + $0xe0] sm:$0xff] %v1695_v10  ;;  %v1383_v12 = vpop.f32.mrb[13].mxu1 }
 0x115   : > { %v1051_v13 = vadd.f32 %v1050_v5, %v1010_v8  ;;  %922 = vst [vmem:[%s1662_s17 + $0x38] sm:$0xff] %v646_v11  ;;  %v963_v14 = vadd.f32 %v962_v7, %v646_v11  ;;  %v1011_v15 = vmul.f32 %v646_v11, %v646_v11  ;;  %v1340_v16 = vpop.f32.mrb[15].mxu0  ;;  %v1700_v17 = vpop.f32.mrb[14].mxu1 }
 0x116   : > { %944 = vst [vmem:[%s1662_s17 + $0xe8] sm:$0xff] %v1700_v17  ;;  %v1384_v18 = vpop.f32.mrb[15].mxu1 }
 0x117   : > { %v1052_v19 = vadd.f32 %v1051_v13, %v1011_v15 }
 0x11a   : > { %v651_v20 = vpop.f32.mrb[16].mxu0 }
 0x11b   : > { %923 = vst [vmem:[%s1662_s17 + $0x40] sm:$0xff] %v651_v20  ;;  %v964_v21 = vadd.f32 %v963_v14, %v651_v20  ;;  %v1012_v22 = vmul.f32 %v651_v20, %v651_v20  ;;  %v1343_v23 = vpop.f32.mrb[17].mxu0  ;;  %v1705_v24 = vpop.f32.mrb[16].mxu1 }
 0x11c   : > { %v654_v25 = vpop.f32.mrb[18].mxu0  ;;  %945 = vst [vmem:[%s1662_s17 + $0xf0] sm:$0xff] %v1705_v24  ;;  %v1387_v26 = vpop.f32.mrb[17].mxu1 }
 0x11d   : > { %v1053_v27 = vadd.f32 %v1052_v19, %v1012_v22  ;;  %924 = vst [vmem:[%s1662_s17 + $0x48] sm:$0xff] %v654_v25  ;;  %v965_v28 = vadd.f32 %v964_v21, %v654_v25  ;;  %v1013_v29 = vmul.f32 %v654_v25, %v654_v25  ;;  %v1344_v30 = vpop.f32.mrb[19].mxu0  ;;  %v1710_v31 = vpop.f32.mrb[18].mxu1 }
 0x11e   : > { %946 = vst [vmem:[%s1662_s17 + $0xf8] sm:$0xff] %v1710_v31  ;;  %v1388_v33 = vpop.f32.mrb[19].mxu1 }
 0x11f   : > { %v1054_v34 = vadd.f32 %v1053_v27, %v1013_v29 }
 0x122   : > { %v659_v35 = vpop.f32.mrb[20].mxu0 }
 0x123   : > { %925 = vst [vmem:[%s1662_s17 + $0x50] sm:$0xff] %v659_v35  ;;  %v966_v36 = vadd.f32 %v965_v28, %v659_v35  ;;  %v1014_v37 = vmul.f32 %v659_v35, %v659_v35  ;;  %v1347_v38 = vpop.f32.mrb[21].mxu0  ;;  %v1715_v40 = vpop.f32.mrb[20].mxu1 }
 0x124   : > { %v662_v41 = vpop.f32.mrb[22].mxu0  ;;  %947 = vst [vmem:[%s1662_s17 + $0x100] sm:$0xff] %v1715_v40  ;;  %v1391_v42 = vpop.f32.mrb[21].mxu1 }
 0x125   : > { %v1055_v43 = vadd.f32 %v1054_v34, %v1014_v37  ;;  %926 = vst [vmem:[%s1662_s17 + $0x58] sm:$0xff] %v662_v41  ;;  %v967_v44 = vadd.f32 %v966_v36, %v662_v41  ;;  %v1015_v45 = vmul.f32 %v662_v41, %v662_v41  ;;  %v1348_v47 = vpop.f32.mrb[23].mxu0  ;;  %v1720_v48 = vpop.f32.mrb[22].mxu1 }
 0x126   : > { %948 = vst [vmem:[%s1662_s17 + $0x108] sm:$0xff] %v1720_v48  ;;  %v1392_v49 = vpop.f32.mrb[23].mxu1 }
 0x127   : > { %v1056_v50 = vadd.f32 %v1055_v43, %v1015_v45 }
 0x12a   : > { %v667_v51 = vpop.f32.mrb[24].mxu0 }
 0x12b   : > { %927 = vst [vmem:[%s1662_s17 + $0x60] sm:$0xff] %v667_v51  ;;  %v968_v52 = vadd.f32 %v967_v44, %v667_v51  ;;  %v1016_v54 = vmul.f32 %v667_v51, %v667_v51  ;;  %v1351_v55 = vpop.f32.mrb[25].mxu0  ;;  %v1725_v56 = vpop.f32.mrb[24].mxu1 }
 0x12c   : > { %v670_v57 = vpop.f32.mrb[26].mxu0  ;;  %949 = vst [vmem:[%s1662_s17 + $0x110] sm:$0xff] %v1725_v56  ;;  %v1395_v58 = vpop.f32.mrb[25].mxu1 }
 0x12d   : > { %v1057_v59 = vadd.f32 %v1056_v50, %v1016_v54  ;;  %928 = vst [vmem:[%s1662_s17 + $0x68] sm:$0xff] %v670_v57  ;;  %v969_v61 = vadd.f32 %v968_v52, %v670_v57  ;;  %v1017_v62 = vmul.f32 %v670_v57, %v670_v57  ;;  %v1352_v63 = vpop.f32.mrb[27].mxu0  ;;  %v1730_v0 = vpop.f32.mrb[26].mxu1 }
 0x12e   : > { %950 = vst [vmem:[%s1662_s17 + $0x118] sm:$0xff] %v1730_v0  ;;  %v1396_v1 = vpop.f32.mrb[27].mxu1 }
 0x12f   : > { %v1058_v2 = vadd.f32 %v1057_v59, %v1017_v62 }
 0x132   : > { %v675_v4 = vpop.f32.mrb[28].mxu0 }
 0x133   : > { %929 = vst [vmem:[%s1662_s17 + $0x70] sm:$0xff] %v675_v4  ;;  %v970_v5 = vadd.f32 %v969_v61, %v675_v4  ;;  %v1018_v6 = vmul.f32 %v675_v4, %v675_v4  ;;  %v1355_v7 = vpop.f32.mrb[29].mxu0  ;;  %v1735_v8 = vpop.f32.mrb[28].mxu1 }
 0x134   : > { %v678_v9 = vpop.f32.mrb[30].mxu0  ;;  %951 = vst [vmem:[%s1662_s17 + $0x120] sm:$0xff] %v1735_v8  ;;  %v1399_v11 = vpop.f32.mrb[29].mxu1 }
 0x135   : > { %v1059_v12 = vadd.f32 %v1058_v2, %v1018_v6  ;;  %930 = vst [vmem:[%s1662_s17 + $0x78] sm:$0xff] %v678_v9  ;;  %v971_v13 = vadd.f32 %v970_v5, %v678_v9  ;;  %v1019_v14 = vmul.f32 %v678_v9, %v678_v9  ;;  %v1356_v15 = vpop.f32.mrb[31].mxu0  ;;  %v1740_v16 = vpop.f32.mrb[30].mxu1  ;;  %v1026_v5 = vmul.f32 %v1665_v32, %v1665_v32 }
 0x136   : > { %952 = vst [vmem:[%s1662_s17 + $0x128] sm:$0xff] %v1740_v16  ;;  %v1400_v18 = vpop.f32.mrb[31].mxu1  ;;  %v1027_v9 = vmul.f32 %v1670_v39, %v1670_v39 }
 0x137   : > { %v1060_v19 = vadd.f32 %v1059_v12, %v1019_v14  ;;  %v1029_v18 = vmul.f32 %v1680_v53, %v1680_v53 }
 0x13a   : > { %v683_v20 = vpop.f32.mrb[32].mxu0 }
 0x13b   : > { %931 = vst [vmem:[%s1662_s17 + $0x80] sm:$0xff] %v683_v20  ;;  %v972_v21 = vadd.f32 %v971_v13, %v683_v20  ;;  %v1020_v22 = vmul.f32 %v683_v20, %v683_v20  ;;  %v1359_v23 = vpop.f32.mrb[33].mxu0  ;;  %v1745_v25 = vpop.f32.mrb[32].mxu1  ;;  %v1028_v13 = vmul.f32 %v1675_v46, %v1675_v46 }
 0x13c   : > { %v686_v26 = vpop.f32.mrb[34].mxu0  ;;  %953 = vst [vmem:[%s1662_s17 + $0x130] sm:$0xff] %v1745_v25  ;;  %v1403_v27 = vpop.f32.mrb[33].mxu1 }
 0x13d   : > { %v1061_v28 = vadd.f32 %v1060_v19, %v1020_v22  ;;  %932 = vst [vmem:[%s1662_s17 + $0x88] sm:$0xff] %v686_v26  ;;  %v973_v29 = vadd.f32 %v972_v21, %v686_v26  ;;  %v1021_v30 = vmul.f32 %v686_v26, %v686_v26  ;;  %v1360_v33 = vpop.f32.mrb[35].mxu0  ;;  %v1750_v34 = vpop.f32.mrb[34].mxu1 }
 0x13e   : > { %954 = vst [vmem:[%s1662_s17 + $0x138] sm:$0xff] %v1750_v34  ;;  %v1404_v35 = vpop.f32.mrb[35].mxu1 }
 0x13f   : > { %v1062_v36 = vadd.f32 %v1061_v28, %v1021_v30 }
 0x142   : > { %v691_v37 = vpop.f32.mrb[36].mxu0 }
 0x143   : > { %933 = vst [vmem:[%s1662_s17 + $0x90] sm:$0xff] %v691_v37  ;;  %v974_v38 = vadd.f32 %v973_v29, %v691_v37  ;;  %v1022_v41 = vmul.f32 %v691_v37, %v691_v37  ;;  %v1363_v42 = vpop.f32.mrb[37].mxu0  ;;  %v1755_v43 = vpop.f32.mrb[36].mxu1 }
 0x144   : > { %v694_v44 = vpop.f32.mrb[38].mxu0  ;;  %955 = vst [vmem:[%s1662_s17 + $0x140] sm:$0xff] %v1755_v43  ;;  %v1407_v45 = vpop.f32.mrb[37].mxu1 }
 0x145   : > { %v1063_v47 = vadd.f32 %v1062_v36, %v1022_v41  ;;  %934 = vst [vmem:[%s1662_s17 + $0x98] sm:$0xff] %v694_v44  ;;  %v975_v49 = vadd.f32 %v974_v38, %v694_v44  ;;  %v1023_v50 = vmul.f32 %v694_v44, %v694_v44  ;;  %v1364_v51 = vpop.f32.mrb[39].mxu0  ;;  %v1760_v52 = vpop.f32.mrb[38].mxu1  ;;  %v1036_v38 = vmul.f32 %v1715_v40, %v1715_v40 }
 0x146   : > { %956 = vst [vmem:[%s1662_s17 + $0x148] sm:$0xff] %v1760_v52  ;;  %v1408_v54 = vpop.f32.mrb[39].mxu1  ;;  %v1037_v44 = vmul.f32 %v1720_v48, %v1720_v48 }
 0x147   : > { %v1064_v55 = vadd.f32 %v1063_v47, %v1023_v50  ;;  %v1038_v47 = vmul.f32 %v1725_v56, %v1725_v56  ;;  %v1039_v50 = vmul.f32 %v1730_v0, %v1730_v0  ;;  %v1040_v54 = vmul.f32 %v1735_v8, %v1735_v8 }
 0x14a   : > { %v699_v57 = vpop.f32.mrb[40].mxu0 }
 0x14b   : > { %935 = vst [vmem:[%s1662_s17 + $0xa0] sm:$0xff] %v699_v57  ;;  %v976_v58 = vadd.f32 %v975_v49, %v699_v57  ;;  %v1024_v59 = vmul.f32 %v699_v57, %v699_v57  ;;  %v1367_v61 = vpop.f32.mrb[41].mxu0  ;;  %v1041_v57 = vmul.f32 %v1740_v16, %v1740_v16 }
 0x14c   : > { %v702_v62 = vpop.f32.mrb[42].mxu0 }
 0x14d   : > { %v1065_v63 = vadd.f32 %v1064_v55, %v1024_v59  ;;  %936 = vst [vmem:[%s1662_s17 + $0xa8] sm:$0xff] %v702_v62  ;;  %v977_v1 = vadd.f32 %v976_v58, %v702_v62  ;;  %v1025_v2 = vmul.f32 %v702_v62, %v702_v62  ;;  %v1368_v4 = vpop.f32.mrb[43].mxu0  ;;  %v1042_v59 = vmul.f32 %v1745_v25, %v1745_v25 }
 0x14e   : > { %v1044_v62 = vmul.f32 %v1755_v43, %v1755_v43  ;;  %v1045_v4 = vmul.f32 %v1760_v52, %v1760_v52 }
 0x14f   : > { %v978_v6 = vadd.f32 %v977_v1, %v1665_v32  ;;  %v1066_v7 = vadd.f32 %v1065_v63, %v1025_v2  ;;  %v1030_v32 = vmul.f32 %v1685_v60, %v1685_v60 }
 0x151   : > { %v979_v11 = vadd.f32 %v978_v6, %v1670_v39  ;;  %v1067_v12 = vadd.f32 %v1066_v7, %v1026_v5  ;;  %v1031_v39 = vmul.f32 %v1690_v3, %v1690_v3 }
 0x153   : > { %v980_v14 = vadd.f32 %v979_v11, %v1675_v46  ;;  %v1068_v15 = vadd.f32 %v1067_v12, %v1027_v9  ;;  %v1032_v46 = vmul.f32 %v1695_v10, %v1695_v10  ;;  %v1093_v9 = vlaneseq }
 0x155   : > { %v981_v19 = vadd.f32 %v980_v14, %v1680_v53  ;;  %v1069_v20 = vadd.f32 %v1068_v15, %v1028_v13  ;;  %v1033_v53 = vmul.f32 %v1700_v17, %v1700_v17  ;;  %v1094_v14 = vshrl.u32 %v1093_v9, 7 }
 0x157   : > { %v982_v21 = vadd.f32 %v981_v19, %v1685_v60  ;;  %v1070_v22 = vadd.f32 %v1069_v20, %v1029_v18  ;;  %v1034_v60 = vmul.f32 %v1705_v24, %v1705_v24  ;;  %vm1096_vm1 = vcmp.eq.s32.totalorder %v1094_v14, 1 }
 0x158   : > { %vm1095_vm2 = vcmp.eq.s32.totalorder %v1094_v14, 0 }
 0x159   : > { %v1071_v23 = vadd.f32 %v1070_v22, %v1030_v32  ;;  %v983_v26 = vadd.f32 %v982_v21, %v1690_v3  ;;  %v1035_v3 = vmul.f32 %v1710_v31, %v1710_v31 }
 0x15b   : > { %v984_v27 = vadd.f32 %v983_v26, %v1695_v10  ;;  %v1072_v28 = vadd.f32 %v1071_v23, %v1031_v39 }
 0x15d   : > { %v985_v29 = vadd.f32 %v984_v27, %v1700_v17  ;;  %v1073_v30 = vadd.f32 %v1072_v28, %v1032_v46 }
 0x15f   : > { %v986_v33 = vadd.f32 %v985_v29, %v1705_v24  ;;  %v1074_v35 = vadd.f32 %v1073_v30, %v1033_v53 }
 0x161   : > { %v987_v36 = vadd.f32 %v986_v33, %v1710_v31  ;;  %v1075_v37 = vadd.f32 %v1074_v35, %v1034_v60 }
 0x163   : > { %v988_v10 = vadd.f32 %v987_v36, %v1715_v40  ;;  %v1076_v41 = vadd.f32 %v1075_v37, %v1035_v3 }
 0x165   : > { %v1077_v17 = vadd.f32 %v1076_v41, %v1036_v38  ;;  %v989_v42 = vadd.f32 %v988_v10, %v1720_v48 }
 0x167   : > { %v1078_v24 = vadd.f32 %v1077_v17, %v1037_v44  ;;  %v990_v45 = vadd.f32 %v989_v42, %v1725_v56 }
 0x169   : > { %v1079_v31 = vadd.f32 %v1078_v24, %v1038_v47  ;;  %v991_v49 = vadd.f32 %v990_v45, %v1730_v0 }
 0x16b   : > { %v1080_v40 = vadd.f32 %v1079_v31, %v1039_v50  ;;  %v992_v51 = vadd.f32 %v991_v49, %v1735_v8  ;;  %v1043_v8 = vmul.f32 %v1750_v34, %v1750_v34 }
 0x16d   : > { %v1081_v55 = vadd.f32 %v1080_v40, %v1040_v54  ;;  %v993_v48 = vadd.f32 %v992_v51, %v1740_v16 }
 0x16f   : > { %v1082_v56 = vadd.f32 %v1081_v55, %v1041_v57  ;;  %v994_v58 = vadd.f32 %v993_v48, %v1745_v25 }
 0x171   : > { %v1083_v0 = vadd.f32 %v1082_v56, %v1042_v59  ;;  %v995_v61 = vadd.f32 %v994_v58, %v1750_v34 }
 0x173   : > { %v1084_v63 = vadd.f32 %v1083_v0, %v1043_v8  ;;  %v996_v1 = vadd.f32 %v995_v61, %v1755_v43 }
 0x175   : > { %v1085_v16 = vadd.f32 %v1084_v63, %v1044_v62  ;;  %v997_v2 = vadd.f32 %v996_v1, %v1760_v52 }
 0x177   : > { %v998_v25 = vrot.slane %v997_v2, 4  ;;  %v1086_v5 = vadd.f32 %v1085_v16, %v1045_v4 }
 0x179   : > { %v999_v6 = vadd.f32 %v998_v25, %v997_v2  ;;  %v1087_v7 = vrot.slane %v1086_v5, 4 }
 0x17b   : > { %v1000_v11 = vrot.slane %v999_v6, 2  ;;  %v1088_v34 = vadd.f32 %v1087_v7, %v1086_v5 }
 0x17d   : > { %v1001_v12 = vadd.f32 %v1000_v11, %v999_v6  ;;  %v1089_v13 = vrot.slane %v1088_v34, 2 }
 0x17f   : > { %v1090_v15 = vadd.f32 %v1089_v13, %v1088_v34  ;;  %v1002_v43 = vrot.slane %v1001_v12, 1 }
 0x181   : > { %v1091_v18 = vrot.slane %v1090_v15, 1  ;;  %v1003_v52 = vadd.f32 %v1002_v43, %v1001_v12 }
 0x183   : > { %v1092_v19 = vadd.f32 %v1091_v18, %v1090_v15 }
 0x185   : > { %v1097_v20 = vsel %vm1096_vm1, %v1092_v19, 0.0 }
 0x186   : > { %v1098_v32 = vsel %vm1095_vm2, %v1003_v52, %v1097_v20 }
 0x187   : > { %1099 = vst [vmem:[%s263_s21] sm:$0xff] %v1098_v32 }
 0x188 PF: > { %s14_s14 = sadd.s32 1, %s1502_s14   ;;  %s1844_s12 = smov %s1498_s13 }
 0x189   : > { %p11_p6 = scmp.ge.s32.totalorder %s14_s14, 4   ;;  %s1845_s13 = smov %s1847_s15 }
 0x18b   :  { %13 = sbr.rel (!%p11_p6) target bundleno = 2 (0x2), region = 81 }

// kernel: forward.7
= control target key start
LH: loop header
LB: loop body
LE: loop exit
PB: predicated region body
PF: predicated region fallthrough
CT: control target
= control target key end

     0   :  { %s1723_s0 = inlined_call_operand.vmem [shape: f32[648,128], index: 0, kind: input, shape index: {}]   ;;  %s1724_s1 = inlined_call_operand.vmem [shape: f32[1,128], index: 1, kind: input, shape index: {}]   ;;  %s1725_s2 = inlined_call_operand.vmem [shape: f32[1,128], index: 2, kind: input, shape index: {}]   ;;  %s1726_s3 = inlined_call_operand.vmem [shape: bf16[648,128], index: 3, kind: output, shape index: {}]  }
   0x1   :  { %v14_v0 = vld [vmem:[%s1723_s0] sm:$0xff]  ;;  %v15_v1 = vld [vmem:[%s1723_s0 + $0x8] sm:$0xff]  ;;  %v16_v6 = vld [vmem:[%s1723_s0 + $0x10] sm:$0xff] }
   0x2   :  { %v1194_v2 = vld [vmem:[%s1724_s1] ss:$0 sm:$0xff]  ;;  %v17_v7 = vld [vmem:[%s1723_s0 + $0x18] sm:$0xff]  ;;  %v19_v11 = vld [vmem:[%s1723_s0 + $0x28] sm:$0xff] }
   0x3   :  { %v102_v3 = vmul.f32 %v1194_v2, %v14_v0  ;;  %v103_v4 = vmul.f32 %v1194_v2, %v15_v1  ;;  %v1201_v5 = vld [vmem:[%s1725_s2] ss:$0 sm:$0xff]  ;;  %v104_v8 = vmul.f32 %v1194_v2, %v16_v6  ;;  %v105_v9 = vmul.f32 %v1194_v2, %v17_v7  ;;  %v20_v12 = vld [vmem:[%s1723_s0 + $0x30] sm:$0xff]  ;;  %v21_v17 = vld [vmem:[%s1723_s0 + $0x38] sm:$0xff] }
   0x4   :  { %v18_v10 = vld [vmem:[%s1723_s0 + $0x20] sm:$0xff]  ;;  %v107_v16 = vmul.f32 %v1194_v2, %v19_v11  ;;  %v108_v20 = vmul.f32 %v1194_v2, %v20_v12  ;;  %v109_v21 = vmul.f32 %v1194_v2, %v21_v17  ;;  %v23_v27 = vld [vmem:[%s1723_s0 + $0x48] sm:$0xff]  ;;  %v24_v32 = vld [vmem:[%s1723_s0 + $0x50] sm:$0xff] }
   0x5   :  { %v190_v13 = vadd.f32 %v1201_v5, %v102_v3  ;;  %v191_v14 = vadd.f32 %v1201_v5, %v103_v4  ;;  %v106_v15 = vmul.f32 %v1194_v2, %v18_v10  ;;  %v192_v18 = vadd.f32 %v1201_v5, %v104_v8  ;;  %v22_v22 = vld [vmem:[%s1723_s0 + $0x40] sm:$0xff]  ;;  %v25_v33 = vld [vmem:[%s1723_s0 + $0x58] sm:$0xff]  ;;  %v27_v39 = vld [vmem:[%s1723_s0 + $0x68] sm:$0xff] }
   0x6   :  { %v193_v19 = vadd.f32 %v1201_v5, %v105_v9  ;;  %v195_v26 = vadd.f32 %v1201_v5, %v107_v16  ;;  %v196_v30 = vadd.f32 %v1201_v5, %v108_v20  ;;  %v197_v31 = vadd.f32 %v1201_v5, %v109_v21  ;;  %v26_v38 = vld [vmem:[%s1723_s0 + $0x60] sm:$0xff]  ;;  %v28_v44 = vld [vmem:[%s1723_s0 + $0x70] sm:$0xff]  ;;  %v29_v49 = vld [vmem:[%s1723_s0 + $0x78] sm:$0xff] }
   0x7   :  { %v271_v23 = vmax.f32 %v190_v13, 0.0  ;;  %v272_v24 = vmax.f32 %v191_v14, 0.0  ;;  %v194_v25 = vadd.f32 %v1201_v5, %v106_v15  ;;  %v273_v28 = vmax.f32 %v192_v18, 0.0  ;;  %v30_v54 = vld [vmem:[%s1723_s0 + $0x80] sm:$0xff]  ;;  %v31_v63 = vld [vmem:[%s1723_s0 + $0x88] sm:$0xff]  ;;  %v32_v6 = vld [vmem:[%s1723_s0 + $0x90] sm:$0xff] }
   0x8   :  { %v274_v29 = vmax.f32 %v193_v19, 0.0  ;;  %v276_v36 = vmax.f32 %v195_v26, 0.0  ;;  %v110_v37 = vmul.f32 %v1194_v2, %v22_v22  ;;  %v277_v41 = vmax.f32 %v196_v30, 0.0  ;;  %v33_v7 = vld [vmem:[%s1723_s0 + $0x98] sm:$0xff]  ;;  %v34_v12 = vld [vmem:[%s1723_s0 + $0xa0] sm:$0xff]  ;;  %v35_v13 = vld [vmem:[%s1723_s0 + $0xa8] sm:$0xff] }
   0x9   :  { %v929_v34 = vpack.c.bf16 %v272_v24, %v271_v23  ;;  %v275_v35 = vmax.f32 %v194_v25, 0.0  ;;  %v278_v42 = vmax.f32 %v197_v31, 0.0  ;;  %v111_v43 = vmul.f32 %v1194_v2, %v23_v27  ;;  %v36_v18 = vld [vmem:[%s1723_s0 + $0xb0] sm:$0xff]  ;;  %v37_v23 = vld [vmem:[%s1723_s0 + $0xb8] sm:$0xff] }
   0xa   :  { %v934_v40 = vpack.c.bf16 %v274_v29, %v273_v28  ;;  %v198_v46 = vadd.f32 %v1201_v5, %v110_v37  ;;  %v112_v47 = vmul.f32 %v1194_v2, %v24_v32  ;;  %v113_v48 = vmul.f32 %v1194_v2, %v25_v33  ;;  %v38_v28 = vld [vmem:[%s1723_s0 + $0xc0] sm:$0xff]  ;;  %v39_v37 = vld [vmem:[%s1723_s0 + $0xc8] sm:$0xff] }
   0xb   :  { %930 = vst [vmem:[%s1726_s3] sm:$0xff] %v929_v34   ;;  %v939_v45 = vpack.c.bf16 %v276_v36, %v275_v35  ;;  %v944_v50 = vpack.c.bf16 %v278_v42, %v277_v41  ;;  %v199_v51 = vadd.f32 %v1201_v5, %v111_v43  ;;  %v114_v52 = vmul.f32 %v1194_v2, %v26_v38  ;;  %v40_v42 = vld [vmem:[%s1723_s0 + $0xd0] sm:$0xff]  ;;  %v41_v43 = vld [vmem:[%s1723_s0 + $0xd8] sm:$0xff] }
   0xc   :  { %1126 = vst [vmem:[%s1726_s3 + $0x8] sm:$0xff] %v934_v40   ;;  %v115_v53 = vmul.f32 %v1194_v2, %v27_v39  ;;  %v279_v55 = vmax.f32 %v198_v46, 0.0  ;;  %v200_v56 = vadd.f32 %v1201_v5, %v112_v47  ;;  %v201_v57 = vadd.f32 %v1201_v5, %v113_v48  ;;  %v42_v48 = vld [vmem:[%s1723_s0 + $0xe0] sm:$0xff] }
   0xd   :  { %1127 = vst [vmem:[%s1726_s3 + $0x10] sm:$0xff] %v939_v45   ;;  %v116_v58 = vmul.f32 %v1194_v2, %v28_v44  ;;  %1128 = vst [vmem:[%s1726_s3 + $0x18] sm:$0xff] %v944_v50   ;;  %v280_v59 = vmax.f32 %v199_v51, 0.0  ;;  %v202_v60 = vadd.f32 %v1201_v5, %v114_v52  ;;  %v117_v62 = vmul.f32 %v1194_v2, %v29_v49  ;;  %v43_v49 = vld [vmem:[%s1723_s0 + $0xe8] sm:$0xff] }
   0xe   :  { %v203_v61 = vadd.f32 %v1201_v5, %v115_v53  ;;  %v281_v0 = vmax.f32 %v200_v56, 0.0  ;;  %v282_v1 = vmax.f32 %v201_v57, 0.0  ;;  %v118_v4 = vmul.f32 %v1194_v2, %v30_v54  ;;  %v44_v54 = vld [vmem:[%s1723_s0 + $0xf0] sm:$0xff] }
   0xf   :  { %v204_v3 = vadd.f32 %v1201_v5, %v116_v58  ;;  %v949_v8 = vpack.c.bf16 %v280_v59, %v279_v55  ;;  %v283_v9 = vmax.f32 %v202_v60, 0.0  ;;  %v205_v11 = vadd.f32 %v1201_v5, %v117_v62  ;;  %v45_v59 = vld [vmem:[%s1723_s0 + $0xf8] sm:$0xff] }
  0x10   :  { %v284_v10 = vmax.f32 %v203_v61, 0.0  ;;  %v954_v14 = vpack.c.bf16 %v282_v1, %v281_v0  ;;  %v119_v16 = vmul.f32 %v1194_v2, %v31_v63  ;;  %v206_v17 = vadd.f32 %v1201_v5, %v118_v4  ;;  %v46_v0 = vld [vmem:[%s1723_s0 + $0x100] sm:$0xff] }
  0x11   :  { %v285_v15 = vmax.f32 %v204_v3, 0.0  ;;  %1129 = vst [vmem:[%s1726_s3 + $0x20] sm:$0xff] %v949_v8   ;;  %v286_v20 = vmax.f32 %v205_v11, 0.0  ;;  %v120_v21 = vmul.f32 %v1194_v2, %v32_v6  ;;  %v121_v22 = vmul.f32 %v1194_v2, %v33_v7  ;;  %v47_v11 = vld [vmem:[%s1723_s0 + $0x108] sm:$0xff] }
  0x12   :  { %v959_v19 = vpack.c.bf16 %v284_v10, %v283_v9  ;;  %1130 = vst [vmem:[%s1726_s3 + $0x28] sm:$0xff] %v954_v14   ;;  %v207_v24 = vadd.f32 %v1201_v5, %v119_v16  ;;  %v287_v25 = vmax.f32 %v206_v17, 0.0  ;;  %v122_v26 = vmul.f32 %v1194_v2, %v34_v12  ;;  %v48_v16 = vld [vmem:[%s1723_s0 + $0x110] sm:$0xff]  ;;  %v49_v17 = vld [vmem:[%s1723_s0 + $0x118] sm:$0xff] }
  0x13   :  { %v123_v27 = vmul.f32 %v1194_v2, %v35_v13  ;;  %v964_v29 = vpack.c.bf16 %v286_v20, %v285_v15  ;;  %v208_v30 = vadd.f32 %v1201_v5, %v120_v21  ;;  %v209_v31 = vadd.f32 %v1201_v5, %v121_v22  ;;  %v50_v22 = vld [vmem:[%s1723_s0 + $0x120] sm:$0xff] }
  0x14   :  { %1131 = vst [vmem:[%s1726_s3 + $0x30] sm:$0xff] %v959_v19   ;;  %v124_v32 = vmul.f32 %v1194_v2, %v36_v18  ;;  %v288_v33 = vmax.f32 %v207_v24, 0.0  ;;  %v210_v34 = vadd.f32 %v1201_v5, %v122_v26  ;;  %v125_v36 = vmul.f32 %v1194_v2, %v37_v23  ;;  %v51_v23 = vld [vmem:[%s1723_s0 + $0x128] sm:$0xff] }
  0x15   :  { %v211_v35 = vadd.f32 %v1201_v5, %v123_v27  ;;  %1132 = vst [vmem:[%s1726_s3 + $0x38] sm:$0xff] %v964_v29   ;;  %v289_v38 = vmax.f32 %v208_v30, 0.0  ;;  %v290_v39 = vmax.f32 %v209_v31, 0.0  ;;  %v126_v41 = vmul.f32 %v1194_v2, %v38_v28  ;;  %v52_v28 = vld [vmem:[%s1723_s0 + $0x130] sm:$0xff] }
  0x16   :  { %v212_v40 = vadd.f32 %v1201_v5, %v124_v32  ;;  %v969_v44 = vpack.c.bf16 %v288_v33, %v287_v25  ;;  %v291_v45 = vmax.f32 %v210_v34, 0.0  ;;  %v213_v47 = vadd.f32 %v1201_v5, %v125_v36  ;;  %v53_v33 = vld [vmem:[%s1723_s0 + $0x138] sm:$0xff] }
  0x17   :  { %v292_v46 = vmax.f32 %v211_v35, 0.0  ;;  %v974_v50 = vpack.c.bf16 %v290_v39, %v289_v38  ;;  %v127_v52 = vmul.f32 %v1194_v2, %v39_v37  ;;  %v214_v53 = vadd.f32 %v1201_v5, %v126_v41  ;;  %v54_v38 = vld [vmem:[%s1723_s0 + $0x140] sm:$0xff] }
  0x18   :  { %v293_v51 = vmax.f32 %v212_v40, 0.0  ;;  %1133 = vst [vmem:[%s1726_s3 + $0x40] sm:$0xff] %v969_v44   ;;  %v294_v56 = vmax.f32 %v213_v47, 0.0  ;;  %v128_v57 = vmul.f32 %v1194_v2, %v40_v42  ;;  %v129_v58 = vmul.f32 %v1194_v2, %v41_v43  ;;  %v55_v47 = vld [vmem:[%s1723_s0 + $0x148] sm:$0xff] }
  0x19   :  { %v979_v55 = vpack.c.bf16 %v292_v46, %v291_v45  ;;  %1134 = vst [vmem:[%s1726_s3 + $0x48] sm:$0xff] %v974_v50   ;;  %v215_v60 = vadd.f32 %v1201_v5, %v127_v52  ;;  %v295_v61 = vmax.f32 %v214_v53, 0.0  ;;  %v130_v62 = vmul.f32 %v1194_v2, %v42_v48  ;;  %v56_v52 = vld [vmem:[%s1723_s0 + $0x150] sm:$0xff]  ;;  %v57_v53 = vld [vmem:[%s1723_s0 + $0x158] sm:$0xff] }
  0x1a   :  { %v131_v63 = vmul.f32 %v1194_v2, %v43_v49  ;;  %v984_v1 = vpack.c.bf16 %v294_v56, %v293_v51  ;;  %v216_v3 = vadd.f32 %v1201_v5, %v128_v57  ;;  %v217_v4 = vadd.f32 %v1201_v5, %v129_v58  ;;  %v58_v58 = vld [vmem:[%s1723_s0 + $0x160] sm:$0xff] }
  0x1b   :  { %1135 = vst [vmem:[%s1726_s3 + $0x50] sm:$0xff] %v979_v55   ;;  %v132_v6 = vmul.f32 %v1194_v2, %v44_v54  ;;  %v296_v7 = vmax.f32 %v215_v60, 0.0  ;;  %v218_v8 = vadd.f32 %v1201_v5, %v130_v62  ;;  %v133_v10 = vmul.f32 %v1194_v2, %v45_v59  ;;  %v59_v59 = vld [vmem:[%s1723_s0 + $0x168] sm:$0xff] }
  0x1c   :  { %v219_v9 = vadd.f32 %v1201_v5, %v131_v63  ;;  %1136 = vst [vmem:[%s1726_s3 + $0x58] sm:$0xff] %v984_v1   ;;  %v297_v12 = vmax.f32 %v216_v3, 0.0  ;;  %v298_v13 = vmax.f32 %v217_v4, 0.0  ;;  %v134_v15 = vmul.f32 %v1194_v2, %v46_v0  ;;  %v60_v0 = vld [vmem:[%s1723_s0 + $0x170] sm:$0xff] }
  0x1d   :  { %v220_v14 = vadd.f32 %v1201_v5, %v132_v6  ;;  %v989_v18 = vpack.c.bf16 %v296_v7, %v295_v61  ;;  %v299_v19 = vmax.f32 %v218_v8, 0.0  ;;  %v221_v21 = vadd.f32 %v1201_v5, %v133_v10  ;;  %v61_v7 = vld [vmem:[%s1723_s0 + $0x178] sm:$0xff] }
  0x1e   :  { %v300_v20 = vmax.f32 %v219_v9, 0.0  ;;  %v994_v24 = vpack.c.bf16 %v298_v13, %v297_v12  ;;  %v135_v26 = vmul.f32 %v1194_v2, %v47_v11  ;;  %v222_v27 = vadd.f32 %v1201_v5, %v134_v15  ;;  %v62_v12 = vld [vmem:[%s1723_s0 + $0x180] sm:$0xff] }
  0x1f   :  { %v301_v25 = vmax.f32 %v220_v14, 0.0  ;;  %1137 = vst [vmem:[%s1726_s3 + $0x60] sm:$0xff] %v989_v18   ;;  %v302_v30 = vmax.f32 %v221_v21, 0.0  ;;  %v136_v31 = vmul.f32 %v1194_v2, %v48_v16  ;;  %v137_v32 = vmul.f32 %v1194_v2, %v49_v17  ;;  %v63_v21 = vld [vmem:[%s1723_s0 + $0x188] sm:$0xff] }
  0x20   :  { %v999_v29 = vpack.c.bf16 %v300_v20, %v299_v19  ;;  %1138 = vst [vmem:[%s1726_s3 + $0x68] sm:$0xff] %v994_v24   ;;  %v223_v34 = vadd.f32 %v1201_v5, %v135_v26  ;;  %v303_v35 = vmax.f32 %v222_v27, 0.0  ;;  %v138_v36 = vmul.f32 %v1194_v2, %v50_v22  ;;  %v64_v26 = vld [vmem:[%s1723_s0 + $0x190] sm:$0xff]  ;;  %v65_v27 = vld [vmem:[%s1723_s0 + $0x198] sm:$0xff] }
  0x21   :  { %v139_v37 = vmul.f32 %v1194_v2, %v51_v23  ;;  %v1004_v39 = vpack.c.bf16 %v302_v30, %v301_v25  ;;  %v224_v40 = vadd.f32 %v1201_v5, %v136_v31  ;;  %v225_v41 = vadd.f32 %v1201_v5, %v137_v32  ;;  %v66_v32 = vld [vmem:[%s1723_s0 + $0x1a0] sm:$0xff] }
  0x22   :  { %1139 = vst [vmem:[%s1726_s3 + $0x70] sm:$0xff] %v999_v29   ;;  %v140_v42 = vmul.f32 %v1194_v2, %v52_v28  ;;  %v304_v43 = vmax.f32 %v223_v34, 0.0  ;;  %v226_v44 = vadd.f32 %v1201_v5, %v138_v36  ;;  %v141_v46 = vmul.f32 %v1194_v2, %v53_v33  ;;  %v67_v33 = vld [vmem:[%s1723_s0 + $0x1a8] sm:$0xff] }
  0x23   :  { %v227_v45 = vadd.f32 %v1201_v5, %v139_v37  ;;  %1140 = vst [vmem:[%s1726_s3 + $0x78] sm:$0xff] %v1004_v39   ;;  %v305_v48 = vmax.f32 %v224_v40, 0.0  ;;  %v306_v49 = vmax.f32 %v225_v41, 0.0  ;;  %v142_v51 = vmul.f32 %v1194_v2, %v54_v38  ;;  %v68_v38 = vld [vmem:[%s1723_s0 + $0x1b0] sm:$0xff] }
  0x24   :  { %v228_v50 = vadd.f32 %v1201_v5, %v140_v42  ;;  %v1009_v54 = vpack.c.bf16 %v304_v43, %v303_v35  ;;  %v307_v55 = vmax.f32 %v226_v44, 0.0  ;;  %v229_v57 = vadd.f32 %v1201_v5, %v141_v46  ;;  %v69_v43 = vld [vmem:[%s1723_s0 + $0x1b8] sm:$0xff] }
  0x25   :  { %v308_v56 = vmax.f32 %v227_v45, 0.0  ;;  %v1014_v60 = vpack.c.bf16 %v306_v49, %v305_v48  ;;  %v143_v62 = vmul.f32 %v1194_v2, %v55_v47  ;;  %v230_v63 = vadd.f32 %v1201_v5, %v142_v51  ;;  %v70_v48 = vld [vmem:[%s1723_s0 + $0x1c0] sm:$0xff] }
  0x26   :  { %v309_v61 = vmax.f32 %v228_v50, 0.0  ;;  %1141 = vst [vmem:[%s1726_s3 + $0x80] sm:$0xff] %v1009_v54   ;;  %v310_v3 = vmax.f32 %v229_v57, 0.0  ;;  %v144_v4 = vmul.f32 %v1194_v2, %v56_v52  ;;  %v145_v6 = vmul.f32 %v1194_v2, %v57_v53  ;;  %v71_v57 = vld [vmem:[%s1723_s0 + $0x1c8] sm:$0xff] }
  0x27   :  { %v1019_v1 = vpack.c.bf16 %v308_v56, %v307_v55  ;;  %1142 = vst [vmem:[%s1726_s3 + $0x88] sm:$0xff] %v1014_v60   ;;  %v231_v8 = vadd.f32 %v1201_v5, %v143_v62  ;;  %v311_v9 = vmax.f32 %v230_v63, 0.0  ;;  %v146_v10 = vmul.f32 %v1194_v2, %v58_v58  ;;  %v72_v62 = vld [vmem:[%s1723_s0 + $0x1d0] sm:$0xff]  ;;  %v73_v63 = vld [vmem:[%s1723_s0 + $0x1d8] sm:$0xff] }
  0x28   :  { %v147_v11 = vmul.f32 %v1194_v2, %v59_v59  ;;  %v1024_v13 = vpack.c.bf16 %v310_v3, %v309_v61  ;;  %v232_v14 = vadd.f32 %v1201_v5, %v144_v4  ;;  %v233_v15 = vadd.f32 %v1201_v5, %v145_v6  ;;  %v74_v6 = vld [vmem:[%s1723_s0 + $0x1e0] sm:$0xff] }
  0x29   :  { %1143 = vst [vmem:[%s1726_s3 + $0x90] sm:$0xff] %v1019_v1   ;;  %v148_v16 = vmul.f32 %v1194_v2, %v60_v0  ;;  %v312_v17 = vmax.f32 %v231_v8, 0.0  ;;  %v234_v18 = vadd.f32 %v1201_v5, %v146_v10  ;;  %v149_v20 = vmul.f32 %v1194_v2, %v61_v7  ;;  %v75_v7 = vld [vmem:[%s1723_s0 + $0x1e8] sm:$0xff] }
  0x2a   :  { %v235_v19 = vadd.f32 %v1201_v5, %v147_v11  ;;  %1144 = vst [vmem:[%s1726_s3 + $0x98] sm:$0xff] %v1024_v13   ;;  %v313_v22 = vmax.f32 %v232_v14, 0.0  ;;  %v314_v23 = vmax.f32 %v233_v15, 0.0  ;;  %v150_v25 = vmul.f32 %v1194_v2, %v62_v12  ;;  %v76_v12 = vld [vmem:[%s1723_s0 + $0x1f0] sm:$0xff] }
  0x2b   :  { %v236_v24 = vadd.f32 %v1201_v5, %v148_v16  ;;  %v1029_v28 = vpack.c.bf16 %v312_v17, %v311_v9  ;;  %v315_v29 = vmax.f32 %v234_v18, 0.0  ;;  %v237_v31 = vadd.f32 %v1201_v5, %v149_v20  ;;  %v77_v17 = vld [vmem:[%s1723_s0 + $0x1f8] sm:$0xff] }
  0x2c   :  { %v316_v30 = vmax.f32 %v235_v19, 0.0  ;;  %v1034_v34 = vpack.c.bf16 %v314_v23, %v313_v22  ;;  %v151_v36 = vmul.f32 %v1194_v2, %v63_v21  ;;  %v238_v37 = vadd.f32 %v1201_v5, %v150_v25  ;;  %v78_v22 = vld [vmem:[%s1723_s0 + $0x200] sm:$0xff] }
  0x2d   :  { %v317_v35 = vmax.f32 %v236_v24, 0.0  ;;  %1145 = vst [vmem:[%s1726_s3 + $0xa0] sm:$0xff] %v1029_v28   ;;  %v318_v40 = vmax.f32 %v237_v31, 0.0  ;;  %v152_v41 = vmul.f32 %v1194_v2, %v64_v26  ;;  %v153_v42 = vmul.f32 %v1194_v2, %v65_v27  ;;  %v79_v31 = vld [vmem:[%s1723_s0 + $0x208] sm:$0xff] }
  0x2e   :  { %v1039_v39 = vpack.c.bf16 %v316_v30, %v315_v29  ;;  %1146 = vst [vmem:[%s1726_s3 + $0xa8] sm:$0xff] %v1034_v34   ;;  %v239_v44 = vadd.f32 %v1201_v5, %v151_v36  ;;  %v319_v45 = vmax.f32 %v238_v37, 0.0  ;;  %v154_v46 = vmul.f32 %v1194_v2, %v66_v32  ;;  %v80_v36 = vld [vmem:[%s1723_s0 + $0x210] sm:$0xff]  ;;  %v81_v37 = vld [vmem:[%s1723_s0 + $0x218] sm:$0xff] }
  0x2f   :  { %v155_v47 = vmul.f32 %v1194_v2, %v67_v33  ;;  %v1044_v49 = vpack.c.bf16 %v318_v40, %v317_v35  ;;  %v240_v50 = vadd.f32 %v1201_v5, %v152_v41  ;;  %v241_v51 = vadd.f32 %v1201_v5, %v153_v42  ;;  %v82_v42 = vld [vmem:[%s1723_s0 + $0x220] sm:$0xff] }
  0x30   :  { %1147 = vst [vmem:[%s1726_s3 + $0xb0] sm:$0xff] %v1039_v39   ;;  %v156_v52 = vmul.f32 %v1194_v2, %v68_v38  ;;  %v320_v53 = vmax.f32 %v239_v44, 0.0  ;;  %v242_v54 = vadd.f32 %v1201_v5, %v154_v46  ;;  %v157_v56 = vmul.f32 %v1194_v2, %v69_v43  ;;  %v83_v43 = vld [vmem:[%s1723_s0 + $0x228] sm:$0xff] }
  0x31   :  { %v243_v55 = vadd.f32 %v1201_v5, %v155_v47  ;;  %1148 = vst [vmem:[%s1726_s3 + $0xb8] sm:$0xff] %v1044_v49   ;;  %v321_v58 = vmax.f32 %v240_v50, 0.0  ;;  %v322_v59 = vmax.f32 %v241_v51, 0.0  ;;  %v158_v61 = vmul.f32 %v1194_v2, %v70_v48  ;;  %v84_v48 = vld [vmem:[%s1723_s0 + $0x230] sm:$0xff] }
  0x32   :  { %v244_v60 = vadd.f32 %v1201_v5, %v156_v52  ;;  %v1049_v0 = vpack.c.bf16 %v320_v53, %v319_v45  ;;  %v323_v1 = vmax.f32 %v242_v54, 0.0  ;;  %v245_v4 = vadd.f32 %v1201_v5, %v157_v56  ;;  %v85_v53 = vld [vmem:[%s1723_s0 + $0x238] sm:$0xff] }
  0x33   :  { %v324_v3 = vmax.f32 %v243_v55, 0.0  ;;  %v1054_v8 = vpack.c.bf16 %v322_v59, %v321_v58  ;;  %v159_v10 = vmul.f32 %v1194_v2, %v71_v57  ;;  %v246_v11 = vadd.f32 %v1201_v5, %v158_v61  ;;  %v86_v58 = vld [vmem:[%s1723_s0 + $0x240] sm:$0xff] }
  0x34   :  { %v325_v9 = vmax.f32 %v244_v60, 0.0  ;;  %1149 = vst [vmem:[%s1726_s3 + $0xc0] sm:$0xff] %v1049_v0   ;;  %v326_v14 = vmax.f32 %v245_v4, 0.0  ;;  %v160_v15 = vmul.f32 %v1194_v2, %v72_v62  ;;  %v161_v16 = vmul.f32 %v1194_v2, %v73_v63  ;;  %v87_v4 = vld [vmem:[%s1723_s0 + $0x248] sm:$0xff] }
  0x35   :  { %v1059_v13 = vpack.c.bf16 %v324_v3, %v323_v1  ;;  %1150 = vst [vmem:[%s1726_s3 + $0xc8] sm:$0xff] %v1054_v8   ;;  %v247_v18 = vadd.f32 %v1201_v5, %v159_v10  ;;  %v327_v19 = vmax.f32 %v246_v11, 0.0  ;;  %v162_v20 = vmul.f32 %v1194_v2, %v74_v6  ;;  %v88_v10 = vld [vmem:[%s1723_s0 + $0x250] sm:$0xff]  ;;  %v89_v11 = vld [vmem:[%s1723_s0 + $0x258] sm:$0xff] }
  0x36   :  { %v163_v21 = vmul.f32 %v1194_v2, %v75_v7  ;;  %v1064_v23 = vpack.c.bf16 %v326_v14, %v325_v9  ;;  %v248_v24 = vadd.f32 %v1201_v5, %v160_v15  ;;  %v249_v25 = vadd.f32 %v1201_v5, %v161_v16  ;;  %v90_v16 = vld [vmem:[%s1723_s0 + $0x260] sm:$0xff] }
  0x37   :  { %1151 = vst [vmem:[%s1726_s3 + $0xd0] sm:$0xff] %v1059_v13   ;;  %v164_v26 = vmul.f32 %v1194_v2, %v76_v12  ;;  %v328_v27 = vmax.f32 %v247_v18, 0.0  ;;  %v250_v28 = vadd.f32 %v1201_v5, %v162_v20  ;;  %v165_v30 = vmul.f32 %v1194_v2, %v77_v17  ;;  %v91_v17 = vld [vmem:[%s1723_s0 + $0x268] sm:$0xff] }
  0x38   :  { %v251_v29 = vadd.f32 %v1201_v5, %v163_v21  ;;  %1152 = vst [vmem:[%s1726_s3 + $0xd8] sm:$0xff] %v1064_v23   ;;  %v329_v32 = vmax.f32 %v248_v24, 0.0  ;;  %v330_v33 = vmax.f32 %v249_v25, 0.0  ;;  %v166_v35 = vmul.f32 %v1194_v2, %v78_v22  ;;  %v92_v22 = vld [vmem:[%s1723_s0 + $0x270] sm:$0xff] }
  0x39   :  { %v252_v34 = vadd.f32 %v1201_v5, %v164_v26  ;;  %v1069_v38 = vpack.c.bf16 %v328_v27, %v327_v19  ;;  %v331_v39 = vmax.f32 %v250_v28, 0.0  ;;  %v253_v41 = vadd.f32 %v1201_v5, %v165_v30  ;;  %v93_v27 = vld [vmem:[%s1723_s0 + $0x278] sm:$0xff] }
  0x3a   :  { %v332_v40 = vmax.f32 %v251_v29, 0.0  ;;  %v1074_v44 = vpack.c.bf16 %v330_v33, %v329_v32  ;;  %v167_v46 = vmul.f32 %v1194_v2, %v79_v31  ;;  %v254_v47 = vadd.f32 %v1201_v5, %v166_v35  ;;  %v94_v32 = vld [vmem:[%s1723_s0 + $0x280] sm:$0xff] }
  0x3b   :  { %v333_v45 = vmax.f32 %v252_v34, 0.0  ;;  %1153 = vst [vmem:[%s1726_s3 + $0xe0] sm:$0xff] %v1069_v38   ;;  %v334_v50 = vmax.f32 %v253_v41, 0.0  ;;  %v168_v51 = vmul.f32 %v1194_v2, %v80_v36  ;;  %v169_v52 = vmul.f32 %v1194_v2, %v81_v37 }
  0x3c   :  { %v1079_v49 = vpack.c.bf16 %v332_v40, %v331_v39  ;;  %1154 = vst [vmem:[%s1726_s3 + $0xe8] sm:$0xff] %v1074_v44   ;;  %v255_v54 = vadd.f32 %v1201_v5, %v167_v46  ;;  %v335_v55 = vmax.f32 %v254_v47, 0.0  ;;  %v170_v56 = vmul.f32 %v1194_v2, %v82_v42 }
  0x3d   :  { %v171_v57 = vmul.f32 %v1194_v2, %v83_v43  ;;  %v1084_v59 = vpack.c.bf16 %v334_v50, %v333_v45  ;;  %v256_v60 = vadd.f32 %v1201_v5, %v168_v51  ;;  %v257_v61 = vadd.f32 %v1201_v5, %v169_v52 }
  0x3e   :  { %1155 = vst [vmem:[%s1726_s3 + $0xf0] sm:$0xff] %v1079_v49   ;;  %v172_v62 = vmul.f32 %v1194_v2, %v84_v48  ;;  %v336_v63 = vmax.f32 %v255_v54, 0.0  ;;  %v258_v0 = vadd.f32 %v1201_v5, %v170_v56  ;;  %v173_v3 = vmul.f32 %v1194_v2, %v85_v53 }
  0x3f   :  { %v259_v1 = vadd.f32 %v1201_v5, %v171_v57  ;;  %1156 = vst [vmem:[%s1726_s3 + $0xf8] sm:$0xff] %v1084_v59   ;;  %v337_v6 = vmax.f32 %v256_v60, 0.0  ;;  %v338_v7 = vmax.f32 %v257_v61, 0.0  ;;  %v174_v9 = vmul.f32 %v1194_v2, %v86_v58 }
  0x40   :  { %v260_v8 = vadd.f32 %v1201_v5, %v172_v62  ;;  %v1089_v12 = vpack.c.bf16 %v336_v63, %v335_v55  ;;  %v339_v13 = vmax.f32 %v258_v0, 0.0  ;;  %v261_v15 = vadd.f32 %v1201_v5, %v173_v3 }
  0x41   :  { %v340_v14 = vmax.f32 %v259_v1, 0.0  ;;  %v1094_v18 = vpack.c.bf16 %v338_v7, %v337_v6  ;;  %v175_v20 = vmul.f32 %v1194_v2, %v87_v4  ;;  %v262_v21 = vadd.f32 %v1201_v5, %v174_v9 }
  0x42   :  { %v341_v19 = vmax.f32 %v260_v8, 0.0  ;;  %1157 = vst [vmem:[%s1726_s3 + $0x100] sm:$0xff] %v1089_v12   ;;  %v342_v24 = vmax.f32 %v261_v15, 0.0  ;;  %v176_v25 = vmul.f32 %v1194_v2, %v88_v10  ;;  %v177_v26 = vmul.f32 %v1194_v2, %v89_v11 }
  0x43   :  { %v1099_v23 = vpack.c.bf16 %v340_v14, %v339_v13  ;;  %1158 = vst [vmem:[%s1726_s3 + $0x108] sm:$0xff] %v1094_v18   ;;  %v263_v28 = vadd.f32 %v1201_v5, %v175_v20  ;;  %v343_v29 = vmax.f32 %v262_v21, 0.0  ;;  %v178_v30 = vmul.f32 %v1194_v2, %v90_v16 }
  0x44   :  { %v179_v31 = vmul.f32 %v1194_v2, %v91_v17  ;;  %v1104_v33 = vpack.c.bf16 %v342_v24, %v341_v19  ;;  %v264_v34 = vadd.f32 %v1201_v5, %v176_v25  ;;  %v265_v35 = vadd.f32 %v1201_v5, %v177_v26 }
  0x45   :  { %1159 = vst [vmem:[%s1726_s3 + $0x110] sm:$0xff] %v1099_v23   ;;  %v180_v36 = vmul.f32 %v1194_v2, %v92_v22  ;;  %v344_v37 = vmax.f32 %v263_v28, 0.0  ;;  %v266_v38 = vadd.f32 %v1201_v5, %v178_v30  ;;  %v181_v40 = vmul.f32 %v1194_v2, %v93_v27 }
  0x46   :  { %v267_v39 = vadd.f32 %v1201_v5, %v179_v31  ;;  %1160 = vst [vmem:[%s1726_s3 + $0x118] sm:$0xff] %v1104_v33   ;;  %v345_v41 = vmax.f32 %v264_v34, 0.0  ;;  %v346_v42 = vmax.f32 %v265_v35, 0.0  ;;  %v182_v44 = vmul.f32 %v1194_v2, %v94_v32 }
  0x47   :  { %v268_v43 = vadd.f32 %v1201_v5, %v180_v36  ;;  %v1109_v45 = vpack.c.bf16 %v344_v37, %v343_v29  ;;  %v347_v46 = vmax.f32 %v266_v38, 0.0  ;;  %v269_v48 = vadd.f32 %v1201_v5, %v181_v40 }
  0x48   :  { %v348_v47 = vmax.f32 %v267_v39, 0.0  ;;  %v1114_v49 = vpack.c.bf16 %v346_v42, %v345_v41  ;;  %v270_v51 = vadd.f32 %v1201_v5, %v182_v44 }
  0x49   :  { %v349_v50 = vmax.f32 %v268_v43, 0.0  ;;  %1161 = vst [vmem:[%s1726_s3 + $0x120] sm:$0xff] %v1109_v45   ;;  %v350_v53 = vmax.f32 %v269_v48, 0.0 }
  0x4a   :  { %v1119_v52 = vpack.c.bf16 %v348_v47, %v347_v46  ;;  %1162 = vst [vmem:[%s1726_s3 + $0x128] sm:$0xff] %v1114_v49   ;;  %v351_v2 = vmax.f32 %v270_v51, 0.0 }
  0x4b   :  { %v1124_v54 = vpack.c.bf16 %v350_v53, %v349_v50 }
  0x4c   :  { %1163 = vst [vmem:[%s1726_s3 + $0x130] sm:$0xff] %v1119_v52   ;;  %v925_v55 = vpack.c.bf16 %v351_v2, %v351_v2 }
  0x4d   :  { %1164 = vst [vmem:[%s1726_s3 + $0x138] sm:$0xff] %v1124_v54  }
  0x4e   :  { %757 = vst [vmem:[%s1726_s3 + $0x140] sm:$0xf] %v925_v55 }

// kernel: forward.9
= control target key start
LH: loop header
LB: loop body
LE: loop exit
PB: predicated region body
PF: predicated region fallthrough
CT: control target
= control target key end

     0   :  { %s299_s0 = inlined_call_operand.vmem [shape: f32[104,128], index: 0, kind: input, shape index: {}]   ;;  %s300_s1 = inlined_call_operand.vmem [shape: f32[1,128], index: 1, kind: input, shape index: {}]   ;;  %s301_s2 = inlined_call_operand.vmem [shape: f32[1,128], index: 2, kind: input, shape index: {}]   ;;  %s302_s3 = inlined_call_operand.vmem [shape: bf16[104,128], index: 3, kind: output, shape index: {}]  }
   0x1   :  { %v14_v0 = vld [vmem:[%s299_s0] sm:$0xff]  ;;  %v15_v1 = vld [vmem:[%s299_s0 + $0x8] sm:$0xff]  ;;  %v16_v6 = vld [vmem:[%s299_s0 + $0x10] sm:$0xff] }
   0x2   :  { %v150_v2 = vld [vmem:[%s300_s1] ss:$0 sm:$0xff]  ;;  %v17_v7 = vld [vmem:[%s299_s0 + $0x18] sm:$0xff]  ;;  %v19_v11 = vld [vmem:[%s299_s0 + $0x28] sm:$0xff] }
   0x3   :  { %v34_v3 = vmul.f32 %v150_v2, %v14_v0  ;;  %v35_v4 = vmul.f32 %v150_v2, %v15_v1  ;;  %v151_v5 = vld [vmem:[%s301_s2] ss:$0 sm:$0xff]  ;;  %v36_v8 = vmul.f32 %v150_v2, %v16_v6  ;;  %v37_v9 = vmul.f32 %v150_v2, %v17_v7  ;;  %v20_v12 = vld [vmem:[%s299_s0 + $0x30] sm:$0xff]  ;;  %v21_v17 = vld [vmem:[%s299_s0 + $0x38] sm:$0xff] }
   0x4   :  { %v18_v10 = vld [vmem:[%s299_s0 + $0x20] sm:$0xff]  ;;  %v39_v16 = vmul.f32 %v150_v2, %v19_v11  ;;  %v40_v20 = vmul.f32 %v150_v2, %v20_v12  ;;  %v41_v21 = vmul.f32 %v150_v2, %v21_v17  ;;  %v23_v27 = vld [vmem:[%s299_s0 + $0x48] sm:$0xff]  ;;  %v24_v32 = vld [vmem:[%s299_s0 + $0x50] sm:$0xff] }
   0x5   :  { %v54_v13 = vadd.f32 %v151_v5, %v34_v3  ;;  %v55_v14 = vadd.f32 %v151_v5, %v35_v4  ;;  %v38_v15 = vmul.f32 %v150_v2, %v18_v10  ;;  %v56_v18 = vadd.f32 %v151_v5, %v36_v8  ;;  %v22_v22 = vld [vmem:[%s299_s0 + $0x40] sm:$0xff]  ;;  %v25_v33 = vld [vmem:[%s299_s0 + $0x58] sm:$0xff] }
   0x6   :  { %v57_v19 = vadd.f32 %v151_v5, %v37_v9  ;;  %v59_v26 = vadd.f32 %v151_v5, %v39_v16  ;;  %v60_v30 = vadd.f32 %v151_v5, %v40_v20  ;;  %v61_v31 = vadd.f32 %v151_v5, %v41_v21  ;;  %v26_v38 = vld [vmem:[%s299_s0 + $0x60] sm:$0xff] }
   0x7   :  { %v67_v23 = vmax.f32 %v54_v13, 0.0  ;;  %v68_v24 = vmax.f32 %v55_v14, 0.0  ;;  %v58_v25 = vadd.f32 %v151_v5, %v38_v15  ;;  %v69_v28 = vmax.f32 %v56_v18, 0.0 }
   0x8   :  { %v70_v29 = vmax.f32 %v57_v19, 0.0  ;;  %v72_v36 = vmax.f32 %v59_v26, 0.0  ;;  %v42_v37 = vmul.f32 %v150_v2, %v22_v22  ;;  %v73_v40 = vmax.f32 %v60_v30, 0.0 }
   0x9   :  { %v181_v34 = vpack.c.bf16 %v68_v24, %v67_v23  ;;  %v71_v35 = vmax.f32 %v58_v25, 0.0  ;;  %v74_v41 = vmax.f32 %v61_v31, 0.0  ;;  %v43_v42 = vmul.f32 %v150_v2, %v23_v27 }
   0xa   :  { %v186_v39 = vpack.c.bf16 %v70_v29, %v69_v28  ;;  %v62_v44 = vadd.f32 %v151_v5, %v42_v37  ;;  %v44_v45 = vmul.f32 %v150_v2, %v24_v32  ;;  %v45_v46 = vmul.f32 %v150_v2, %v25_v33 }
   0xb   :  { %182 = vst [vmem:[%s302_s3] sm:$0xff] %v181_v34   ;;  %v191_v43 = vpack.c.bf16 %v72_v36, %v71_v35  ;;  %v196_v47 = vpack.c.bf16 %v74_v41, %v73_v40  ;;  %v63_v48 = vadd.f32 %v151_v5, %v43_v42  ;;  %v46_v49 = vmul.f32 %v150_v2, %v26_v38 }
   0xc   :  { %208 = vst [vmem:[%s302_s3 + $0x8] sm:$0xff] %v186_v39   ;;  %v75_v50 = vmax.f32 %v62_v44, 0.0  ;;  %v64_v51 = vadd.f32 %v151_v5, %v44_v45  ;;  %v65_v52 = vadd.f32 %v151_v5, %v45_v46 }
   0xd   :  { %209 = vst [vmem:[%s302_s3 + $0x10] sm:$0xff] %v191_v43   ;;  %210 = vst [vmem:[%s302_s3 + $0x18] sm:$0xff] %v196_v47   ;;  %v76_v53 = vmax.f32 %v63_v48, 0.0  ;;  %v66_v54 = vadd.f32 %v151_v5, %v46_v49 }
   0xe   :  { %v77_v55 = vmax.f32 %v64_v51, 0.0  ;;  %v78_v56 = vmax.f32 %v65_v52, 0.0 }
   0xf   :  { %v201_v57 = vpack.c.bf16 %v76_v53, %v75_v50  ;;  %v79_v58 = vmax.f32 %v66_v54, 0.0 }
  0x10   :  { %v206_v59 = vpack.c.bf16 %v78_v56, %v77_v55 }
  0x11   :  { %211 = vst [vmem:[%s302_s3 + $0x20] sm:$0xff] %v201_v57   ;;  %v177_v60 = vpack.c.bf16 %v79_v58, %v79_v58 }
  0x12   :  { %212 = vst [vmem:[%s302_s3 + $0x28] sm:$0xff] %v206_v59  }
  0x13   :  { %145 = vst [vmem:[%s302_s3 + $0x30] sm:$0xf] %v177_v60 }

// kernel: forward.8
= control target key start
LH: loop header
LB: loop body
LE: loop exit
PB: predicated region body
PF: predicated region fallthrough
CT: control target
= control target key end

     0   :  { %s4827_s12 = smov 0   ;;  %s4829_s13 = smov 0   ;;  %s5595_s0 = inlined_call_operand.vmem [shape: bf16[128,3200], index: 0, kind: input, shape index: {}]   ;;  %s5596_s1 = inlined_call_operand.vmem [shape: bf16[3200,128], index: 1, kind: input, shape index: {}]   ;;  %s5597_s2 = inlined_call_operand.vmem [shape: f32[128,128], index: 2, kind: output, shape index: {0}]   ;;  %s5598_s3 = inlined_call_operand.vmem [shape: f32[16,128], index: 3, kind: output, shape index: {1}]  }
   0x1   :  { %s4831_s14 = smov 0  }
   0x2 LB: > { %s33_s15 = sadd.s32 1, %s4801_s13  ;;  %p3570_p0 = scmp.ge.s32.totalorder %s4805_s14, 1  ;;  %s4805_s14 = sphi %s4831_s14, %s14_s14   ;;  %s4801_s13 = sphi %s4829_s13, %s5600_s13   ;;  %s4797_s12 = sphi %s4827_s12, %s5599_s12  }
   0x3   : > { %p35_p1 = scmp.ge.s32.totalorder %s33_s15, 2  ;;  %p188_p2 = scmp.lt.s32.totalorder %s4805_s14, 3 }
   0x5   : > { %s5602_s15 = smov (%p35_p1, %s33_s15), 0  ;;  %p189_p3 = pnand %p3570_p0, %p188_p2 }
   0x6   : > { %v4435_v0 = vld [vmem:[%s5596_s1 + $0x40] sm:$0xff] (!%p189_p3)   ;;  %v4439_v4 = vld [vmem:[%s5596_s1 + $0x48] sm:$0xff] (!%p189_p3)   ;;  %v4443_v8 = vld [vmem:[%s5596_s1 + $0x50] sm:$0xff] (!%p189_p3)   ;;  %s3571_s23 = sshll.u32 (!%p189_p3), %s4797_s12, 3  ;;  %p265_p5 = scmp.lt.s32.totalorder (!%p189_p3), %s4797_s12, 1 }
   0x7   : > { %192 = sbr.rel (%p189_p3) target bundleno = 502 (0x1f6), region = 28  ;;  %v4436_v1 = vld [vmem:[%s5596_s1 + $0xc0] sm:$0xff] (!%p189_p3)   ;;  %3878 = vmatprep.subr.bf16.mxu0 (!%p189_p3), %v4435_v0  ;;  %v4440_v5 = vld [vmem:[%s5596_s1 + $0xc8] sm:$0xff] (!%p189_p3)   ;;  %v4444_v9 = vld [vmem:[%s5596_s1 + $0xd0] sm:$0xff] (!%p189_p3)   ;;  %p237_p4 = scmp.lt.s32.totalorder (!%p189_p3), %s3571_s23, 15 }
   0x8   : > { %v4437_v2 = vld [vmem:[%s5596_s1] sm:$0xff] (!%p189_p3)   ;;  %3918 = vmatprep.subr.bf16.mxu1 (!%p189_p3), %v4436_v1  ;;  %v4441_v6 = vld [vmem:[%s5596_s1 + $0x8] sm:$0xff] (!%p189_p3)   ;;  %v4445_v10 = vld [vmem:[%s5596_s1 + $0x10] sm:$0xff] (!%p189_p3)  }
   0x9   : > { %v4438_v3 = vld [vmem:[%s5596_s1 + $0x80] sm:$0xff] (!%p189_p3)   ;;  %3879 = vmatpush3.bf16.msra.mxu0 (!%p189_p3), %v4437_v2  ;;  %v4442_v7 = vld [vmem:[%s5596_s1 + $0x88] sm:$0xff] (!%p189_p3)   ;;  %v4446_v11 = vld [vmem:[%s5596_s1 + $0x90] sm:$0xff] (!%p189_p3)  }
   0xa   : > { %3919 = vmatpush3.bf16.msra.mxu1 (!%p189_p3), %v4438_v3  ;;  %3880 = vmatprep.subr.bf16.mxu0 (!%p189_p3), %v4439_v4  ;;  %v4447_v12 = vld [vmem:[%s5596_s1 + $0x58] sm:$0xff] (!%p189_p3)   ;;  %v4451_v16 = vld [vmem:[%s5596_s1 + $0x60] sm:$0xff] (!%p189_p3)   ;;  %v4455_v20 = vld [vmem:[%s5596_s1 + $0x68] sm:$0xff] (!%p189_p3)  }
   0xb   : > { %3920 = vmatprep.subr.bf16.mxu1 (!%p189_p3), %v4440_v5  ;;  %v4448_v13 = vld [vmem:[%s5596_s1 + $0xd8] sm:$0xff] (!%p189_p3)   ;;  %v4452_v17 = vld [vmem:[%s5596_s1 + $0xe0] sm:$0xff] (!%p189_p3)   ;;  %v4456_v21 = vld [vmem:[%s5596_s1 + $0xe8] sm:$0xff] (!%p189_p3)  }
   0xc   : > { %v4449_v14 = vld [vmem:[%s5596_s1 + $0x18] sm:$0xff] (!%p189_p3)   ;;  %v4453_v18 = vld [vmem:[%s5596_s1 + $0x20] sm:$0xff] (!%p189_p3)   ;;  %v4457_v22 = vld [vmem:[%s5596_s1 + $0x28] sm:$0xff] (!%p189_p3)  }
   0xd   : > { %3881 = vmatpush3.bf16.msra.mxu0 (!%p189_p3), %v4441_v6  ;;  %v4450_v15 = vld [vmem:[%s5596_s1 + $0x98] sm:$0xff] (!%p189_p3)   ;;  %v4454_v19 = vld [vmem:[%s5596_s1 + $0xa0] sm:$0xff] (!%p189_p3)   ;;  %v4458_v23 = vld [vmem:[%s5596_s1 + $0xa8] sm:$0xff] (!%p189_p3)  }
   0xe   : > { %3921 = vmatpush3.bf16.msra.mxu1 %v4442_v7  ;;  %3882 = vmatprep.subr.bf16.mxu0 %v4443_v8  ;;  %s5604_s23 = smov (!%p237_p4, %s3571_s23), 15  ;;  %v4459_v24 = vld [vmem:[%s5596_s1 + $0x70] sm:$0xff]   ;;  %v4463_v28 = vld [vmem:[%s5596_s1 + $0x78] sm:$0xff]   ;;  %v4473_v36 = vld [vmem:[%s5596_s1 + $0x140] sm:$0xff]   ;;  %s5606_s12 = smov (!%p265_p5, %s4797_s12), 1 }
   0xf   : > { %3922 = vmatprep.subr.bf16.mxu1 %v4444_v9  ;;  %v4460_v25 = vld [vmem:[%s5596_s1 + $0xf0] sm:$0xff]   ;;  %s4410_s24 = smul.u32 100, %s5604_s23  ;;  %v4464_v29 = vld [vmem:[%s5596_s1 + $0xf8] sm:$0xff]   ;;  %v4474_v37 = vld [vmem:[%s5596_s1 + $0x1c0] sm:$0xff]  }
  0x10   : > { %v4461_v26 = vld [vmem:[%s5596_s1 + $0x30] sm:$0xff]   ;;  %v4465_v30 = vld [vmem:[%s5596_s1 + $0x38] sm:$0xff]   ;;  %v4475_v38 = vld [vmem:[%s5596_s1 + $0x100] sm:$0xff]  }
  0x11   : > { %3883 = vmatpush3.bf16.msra.mxu0 %v4445_v10  ;;  %v4462_v27 = vld [vmem:[%s5596_s1 + $0xb0] sm:$0xff]   ;;  %s4944_s8 = scalar_lea.vmem %s5595_s0, %s4410_s24  ;;  %v4466_v31 = vld [vmem:[%s5596_s1 + $0xb8] sm:$0xff]   ;;  %v4476_v39 = vld [vmem:[%s5596_s1 + $0x180] sm:$0xff]  }
  0x12   : > { %3923 = vmatpush3.bf16.msra.mxu1 %v4446_v11  ;;  %3884 = vmatprep.subr.bf16.mxu0 %v4447_v12  ;;  %v4467_v32 = vld [vmem:[%s4944_s8] ss:$100 sps:$4 sm:$0xff]   ;;  %v4470_v34 = vld [vmem:[%s4944_s8 + $0x8] ss:$100 sps:$4 sm:$0xff]   ;;  %v4483_v45 = vld [vmem:[%s4944_s8 + $0xd4] ss:$100 sps:$4 sm:$0xff]  }
  0x13   : > { %3924 = vmatprep.subr.bf16.mxu1 %v4448_v13  ;;  %v4469_v33 = vld [vmem:[%s4944_s8 + $0x4] ss:$100 sps:$4 sm:$0xff]   ;;  %v4472_v35 = vld [vmem:[%s4944_s8 + $0xc] ss:$100 sps:$4 sm:$0xff]   ;;  %v4491_v52 = vld [vmem:[%s5596_s1 + $0x158] sm:$0xff]  }
  0x14   : > { %2533 = vmatprep.mubr.bf16.mxu0 %v4469_v33  ;;  %2598 = vmatprep.mubr.bf16.mxu1 %v4472_v35  ;;  %v4477_v40 = vld [vmem:[%s5596_s1 + $0x148] sm:$0xff]   ;;  %v4486_v47 = vld [vmem:[%s4944_s8 + $0xd0] ss:$100 sps:$4 sm:$0xff]   ;;  %v4492_v53 = vld [vmem:[%s5596_s1 + $0x1d8] sm:$0xff]  }
  0x15   : > { %3885 = vmatpush3.bf16.msra.mxu0 %v4449_v14  ;;  %v4478_v41 = vld [vmem:[%s5596_s1 + $0x1c8] sm:$0xff]   ;;  %v4487_v48 = vld [vmem:[%s5596_s1 + $0x150] sm:$0xff]   ;;  %v4493_v54 = vld [vmem:[%s5596_s1 + $0x118] sm:$0xff]  }
  0x16   : > { %3925 = vmatpush3.bf16.msra.mxu1 %v4450_v15  ;;  %3886 = vmatprep.subr.bf16.mxu0 %v4451_v16  ;;  %v4479_v42 = vld [vmem:[%s5596_s1 + $0x108] sm:$0xff]   ;;  %v4488_v49 = vld [vmem:[%s5596_s1 + $0x1d0] sm:$0xff]   ;;  %v4494_v55 = vld [vmem:[%s5596_s1 + $0x198] sm:$0xff]  }
  0x17   : > { %3926 = vmatprep.subr.bf16.mxu1 %v4452_v17  ;;  %v4480_v43 = vld [vmem:[%s5596_s1 + $0x188] sm:$0xff]   ;;  %v4489_v50 = vld [vmem:[%s5596_s1 + $0x110] sm:$0xff]   ;;  %v4497_v57 = vld [vmem:[%s4944_s8 + $0x19c] ss:$100 sps:$4 sm:$0xff]  }
  0x18   : > { %v4481_v44 = vld [vmem:[%s4944_s8 + $0xcc] ss:$100 sps:$4 sm:$0xff]   ;;  %v4495_v56 = vld [vmem:[%s4944_s8 + $0x194] ss:$100 sps:$4 sm:$0xff]   ;;  %v4501_v60 = vld [vmem:[%s5596_s1 + $0x160] sm:$0xff]  }
  0x19   : > { %3887 = vmatpush3.bf16.msra.mxu0 %v4453_v18  ;;  %v4485_v46 = vld [vmem:[%s4944_s8 + $0xc8] ss:$100 sps:$4 sm:$0xff]   ;;  %v4490_v51 = vld [vmem:[%s5596_s1 + $0x190] sm:$0xff]   ;;  %v4500_v59 = vld [vmem:[%s4944_s8 + $0x198] ss:$100 sps:$4 sm:$0xff]  }
  0x1a   : > { %3927 = vmatpush3.bf16.msra.mxu1 %v4454_v19  ;;  %3888 = vmatprep.subr.bf16.mxu0 %v4455_v20  ;;  %v4499_v58 = vld [vmem:[%s4944_s8 + $0x190] ss:$100 sps:$4 sm:$0xff]   ;;  %v4502_v61 = vld [vmem:[%s5596_s1 + $0x1e0] sm:$0xff]   ;;  %v4505_v0 = vld [vmem:[%s5596_s1 + $0x168] sm:$0xff]  }
  0x1b   : > { %3928 = vmatprep.subr.bf16.mxu1 %v4456_v21  ;;  %v4503_v62 = vld [vmem:[%s5596_s1 + $0x120] sm:$0xff]   ;;  %v4506_v1 = vld [vmem:[%s5596_s1 + $0x1e8] sm:$0xff]   ;;  %v4513_v6 = vld [vmem:[%s4944_s8 + $0x258] ss:$100 sps:$4 sm:$0xff]  }
  0x1c   : > { %v4504_v63 = vld [vmem:[%s5596_s1 + $0x1a0] sm:$0xff]   ;;  %v4507_v2 = vld [vmem:[%s5596_s1 + $0x128] sm:$0xff]   ;;  %v4515_v8 = vld [vmem:[%s5596_s1 + $0x170] sm:$0xff]  }
  0x1d   : > { %3889 = vmatpush3.bf16.msra.mxu0 %v4457_v22  ;;  %v4508_v3 = vld [vmem:[%s5596_s1 + $0x1a8] sm:$0xff]   ;;  %v4509_v4 = vld [vmem:[%s4944_s8 + $0x25c] ss:$100 sps:$4 sm:$0xff]   ;;  %v4516_v9 = vld [vmem:[%s5596_s1 + $0x1f0] sm:$0xff]  }
  0x1e   : > { %3929 = vmatpush3.bf16.msra.mxu1 %v4458_v23  ;;  %3890 = vmatprep.subr.bf16.mxu0 %v4459_v24  ;;  %v4511_v5 = vld [vmem:[%s4944_s8 + $0x264] ss:$100 sps:$4 sm:$0xff]   ;;  %v4517_v10 = vld [vmem:[%s5596_s1 + $0x130] sm:$0xff]   ;;  %v4519_v12 = vld [vmem:[%s5596_s1 + $0x178] sm:$0xff]  }
  0x1f   : > { %3930 = vmatprep.subr.bf16.mxu1 %v4460_v25  ;;  %v4514_v7 = vld [vmem:[%s4944_s8 + $0x260] ss:$100 sps:$4 sm:$0xff]   ;;  %v4518_v11 = vld [vmem:[%s5596_s1 + $0x1b0] sm:$0xff]   ;;  %v4520_v13 = vld [vmem:[%s5596_s1 + $0x1f8] sm:$0xff]  }
  0x20   : > { %v4521_v14 = vld [vmem:[%s5596_s1 + $0x138] sm:$0xff]   ;;  %v4523_v16 = vld [vmem:[%s4944_s8 + $0x10] ss:$100 sps:$4 sm:$0xff]   ;;  %v4529_v20 = vld [vmem:[%s5596_s1 + $0x240] sm:$0xff]  }
  0x21   : > { %3891 = vmatpush3.bf16.msra.mxu0 %v4461_v26  ;;  %v4522_v15 = vld [vmem:[%s5596_s1 + $0x1b8] sm:$0xff]   ;;  %v4530_v21 = vld [vmem:[%s5596_s1 + $0x2c0] sm:$0xff]   ;;  %v4533_v24 = vld [vmem:[%s5596_s1 + $0x248] sm:$0xff]  }
  0x22   : > { %3931 = vmatpush3.bf16.msra.mxu1 %v4462_v27  ;;  %3892 = vmatprep.subr.bf16.mxu0 %v4463_v28  ;;  %v4525_v17 = vld [vmem:[%s4944_s8 + $0x14] ss:$100 sps:$4 sm:$0xff]   ;;  %v4528_v19 = vld [vmem:[%s4944_s8 + $0x1c] ss:$100 sps:$4 sm:$0xff]   ;;  %v4534_v25 = vld [vmem:[%s5596_s1 + $0x2c8] sm:$0xff]  }
  0x23   : > { %3932 = vmatprep.subr.bf16.mxu1 %v4464_v29  ;;  %v4526_v18 = vld [vmem:[%s4944_s8 + $0x18] ss:$100 sps:$4 sm:$0xff]   ;;  %v4531_v22 = vld [vmem:[%s5596_s1 + $0x200] sm:$0xff]   ;;  %v4535_v26 = vld [vmem:[%s5596_s1 + $0x208] sm:$0xff]  }
  0x24   : > { %v4532_v23 = vld [vmem:[%s5596_s1 + $0x280] sm:$0xff]   ;;  %v4536_v27 = vld [vmem:[%s5596_s1 + $0x288] sm:$0xff]   ;;  %v4544_v33 = vld [vmem:[%s5596_s1 + $0x2d0] sm:$0xff]  }
  0x25   : > { %3893 = vmatpush3.bf16.msra.mxu0 %v4465_v30  ;;  %v4537_v28 = vld [vmem:[%s4944_s8 + $0xdc] ss:$100 sps:$4 sm:$0xff]   ;;  %v4539_v29 = vld [vmem:[%s4944_s8 + $0xe4] ss:$100 sps:$4 sm:$0xff]   ;;  %v4546_v35 = vld [vmem:[%s5596_s1 + $0x290] sm:$0xff]  }
  0x26   : > { %3933 = vmatpush3.bf16.msra.mxu1 %v4466_v31  ;;  %3958 = vmatprep.subr.bf16.mxu0 %v4473_v36  ;;  %v4541_v30 = vld [vmem:[%s4944_s8 + $0xd8] ss:$100 sps:$4 sm:$0xff]   ;;  %v4542_v31 = vld [vmem:[%s4944_s8 + $0xe0] ss:$100 sps:$4 sm:$0xff]  }
  0x27   : > { %3998 = vmatprep.subr.bf16.mxu1 %v4474_v37  ;;  %v4547_v36 = vld [vmem:[%s5596_s1 + $0x258] sm:$0xff]  }
  0x28   : > { %2534 = vmatmul.mubr.bf16.vlgmr.msra.gmra.mrb[0].mxu0 %v4467_v32  ;;  %v4543_v32 = vld [vmem:[%s5596_s1 + $0x250] sm:$0xff]   ;;  %v4548_v37 = vld [vmem:[%s5596_s1 + $0x2d8] sm:$0xff]  }
  0x29   : > { %2599 = vmatmul.mubr.bf16.vlgmr.msra.gmra.mrb[0].mxu1 %v4470_v34  ;;  %3959 = vmatpush3.bf16.msra.mxu0 %v4475_v38  ;;  %v4545_v34 = vld [vmem:[%s5596_s1 + $0x210] sm:$0xff]   ;;  %v4549_v38 = vld [vmem:[%s5596_s1 + $0x218] sm:$0xff]  }
  0x2a   : > { %3999 = vmatpush3.bf16.msra.mxu1 %v4476_v39  ;;  %3960 = vmatprep.subr.bf16.mxu0 %v4477_v40  ;;  %v4550_v39 = vld [vmem:[%s5596_s1 + $0x298] sm:$0xff]   ;;  %v4551_v40 = vld [vmem:[%s4944_s8 + $0x1a4] ss:$100 sps:$4 sm:$0xff]  }
  0x2b   : > { %4000 = vmatprep.subr.bf16.mxu1 %v4478_v41  ;;  %2541 = vmatprep.mubr.bf16.mxu0 %v4481_v44  ;;  %v4553_v41 = vld [vmem:[%s4944_s8 + $0x1ac] ss:$100 sps:$4 sm:$0xff]   ;;  %v4557_v44 = vld [vmem:[%s5596_s1 + $0x260] sm:$0xff]  }
  0x2c   : > { %2606 = vmatprep.mubr.bf16.mxu1 %v4483_v45  ;;  %v4558_v45 = vld [vmem:[%s5596_s1 + $0x2e0] sm:$0xff]  }
  0x2d   : > { %3961 = vmatpush3.bf16.msra.mxu0 %v4479_v42  ;;  %v4555_v42 = vld [vmem:[%s4944_s8 + $0x1a0] ss:$100 sps:$4 sm:$0xff]  }
  0x2e   : > { %4001 = vmatpush3.bf16.msra.mxu1 %v4480_v43  ;;  %3962 = vmatprep.subr.bf16.mxu0 %v4487_v48  ;;  %v4556_v43 = vld [vmem:[%s4944_s8 + $0x1a8] ss:$100 sps:$4 sm:$0xff]  }
  0x2f   : > { %4002 = vmatprep.subr.bf16.mxu1 %v4488_v49  ;;  %v4561_v48 = vld [vmem:[%s5596_s1 + $0x268] sm:$0xff]  }
  0x30   : > { %2542 = vmatmul.mubr.bf16.gmra.mrb[4].mxu0 %v4485_v46  ;;  %v4559_v46 = vld [vmem:[%s5596_s1 + $0x220] sm:$0xff]   ;;  %v4562_v49 = vld [vmem:[%s5596_s1 + $0x2e8] sm:$0xff]  }
  0x31   : > { %2607 = vmatmul.mubr.bf16.gmra.mrb[4].mxu1 %v4486_v47  ;;  %3963 = vmatpush3.bf16.msra.mxu0 %v4489_v50  ;;  %v4560_v47 = vld [vmem:[%s5596_s1 + $0x2a0] sm:$0xff]   ;;  %v4563_v50 = vld [vmem:[%s5596_s1 + $0x228] sm:$0xff]  }
  0x32   : > { %4003 = vmatpush3.bf16.msra.mxu1 %v4490_v51  ;;  %3964 = vmatprep.subr.bf16.mxu0 %v4491_v52  ;;  %v4564_v51 = vld [vmem:[%s5596_s1 + $0x2a8] sm:$0xff]  }
  0x33   : > { %4004 = vmatprep.subr.bf16.mxu1 %v4492_v53  ;;  %2549 = vmatprep.mubr.bf16.mxu0 %v4495_v56  ;;  %v4565_v52 = vld [vmem:[%s4944_s8 + $0x26c] ss:$100 sps:$4 sm:$0xff]   ;;  %v4567_v53 = vld [vmem:[%s4944_s8 + $0x274] ss:$100 sps:$4 sm:$0xff]  }
  0x34   : > { %2614 = vmatprep.mubr.bf16.mxu1 %v4497_v57  ;;  %v4571_v56 = vld [vmem:[%s5596_s1 + $0x270] sm:$0xff]  }
  0x35   : > { %3965 = vmatpush3.bf16.msra.mxu0 %v4493_v54  ;;  %v4569_v54 = vld [vmem:[%s4944_s8 + $0x268] ss:$100 sps:$4 sm:$0xff]   ;;  %v4572_v57 = vld [vmem:[%s5596_s1 + $0x2f0] sm:$0xff]  }
  0x36   : > { %4005 = vmatpush3.bf16.msra.mxu1 %v4494_v55  ;;  %3966 = vmatprep.subr.bf16.mxu0 %v4501_v60  ;;  %v4570_v55 = vld [vmem:[%s4944_s8 + $0x270] ss:$100 sps:$4 sm:$0xff]   ;;  %v4575_v60 = vld [vmem:[%s5596_s1 + $0x278] sm:$0xff]  }
  0x37   : > { %4006 = vmatprep.subr.bf16.mxu1 %v4502_v61  ;;  %v4576_v61 = vld [vmem:[%s5596_s1 + $0x2f8] sm:$0xff]  }
  0x38   : > { %2550 = vmatmul.mubr.bf16.gmra.mrb[8].mxu0 %v4499_v58  ;;  %v4573_v58 = vld [vmem:[%s5596_s1 + $0x230] sm:$0xff]  }
  0x39   : > { %2615 = vmatmul.mubr.bf16.gmra.mrb[8].mxu1 %v4500_v59  ;;  %3967 = vmatpush3.bf16.msra.mxu0 %v4503_v62  ;;  %v4574_v59 = vld [vmem:[%s5596_s1 + $0x2b0] sm:$0xff]   ;;  %v4577_v62 = vld [vmem:[%s5596_s1 + $0x238] sm:$0xff]  }
  0x3a   : > { %4007 = vmatpush3.bf16.msra.mxu1 %v4504_v63  ;;  %3968 = vmatprep.subr.bf16.mxu0 %v4505_v0  ;;  %v4578_v63 = vld [vmem:[%s5596_s1 + $0x2b8] sm:$0xff]   ;;  %v4579_v0 = vld [vmem:[%s4944_s8 + $0x20] ss:$100 sps:$4 sm:$0xff]  }
  0x3b   : > { %4008 = vmatprep.subr.bf16.mxu1 %v4506_v1  ;;  %2557 = vmatprep.mubr.bf16.mxu0 %v4509_v4  ;;  %v4581_v1 = vld [vmem:[%s4944_s8 + $0x24] ss:$100 sps:$4 sm:$0xff]  }
  0x3c   : > { %2622 = vmatprep.mubr.bf16.mxu1 %v4511_v5  ;;  %v4585_v4 = vld [vmem:[%s5596_s1 + $0x340] sm:$0xff]  }
  0x3d   : > { %3969 = vmatpush3.bf16.msra.mxu0 %v4507_v2  ;;  %v4582_v2 = vld [vmem:[%s4944_s8 + $0x28] ss:$100 sps:$4 sm:$0xff]   ;;  %v4586_v5 = vld [vmem:[%s5596_s1 + $0x3c0] sm:$0xff]  }
  0x3e   : > { %4009 = vmatpush3.bf16.msra.mxu1 %v4508_v3  ;;  %3970 = vmatprep.subr.bf16.mxu0 %v4515_v8  ;;  %v4584_v3 = vld [vmem:[%s4944_s8 + $0x2c] ss:$100 sps:$4 sm:$0xff]  }
  0x3f   : > { %4010 = vmatprep.subr.bf16.mxu1 %v4516_v9  ;;  %v4589_v8 = vld [vmem:[%s5596_s1 + $0x348] sm:$0xff]  }
  0x40   : > { %2558 = vmatmul.mubr.bf16.gmra.mrb[12].mxu0 %v4513_v6  ;;  %v4587_v6 = vld [vmem:[%s5596_s1 + $0x300] sm:$0xff]   ;;  %v4590_v9 = vld [vmem:[%s5596_s1 + $0x3c8] sm:$0xff]  }
  0x41   : > { %2623 = vmatmul.mubr.bf16.gmra.mrb[12].mxu1 %v4514_v7  ;;  %3971 = vmatpush3.bf16.msra.mxu0 %v4517_v10  ;;  %v4588_v7 = vld [vmem:[%s5596_s1 + $0x380] sm:$0xff]   ;;  %v4591_v10 = vld [vmem:[%s5596_s1 + $0x308] sm:$0xff]  }
  0x42   : > { %4011 = vmatpush3.bf16.msra.mxu1 %v4518_v11  ;;  %3972 = vmatprep.subr.bf16.mxu0 %v4519_v12  ;;  %v4592_v11 = vld [vmem:[%s5596_s1 + $0x388] sm:$0xff]  }
  0x43   : > { %4012 = vmatprep.subr.bf16.mxu1 %v4520_v13  ;;  %2663 = vmatprep.mubr.bf16.mxu0 %v4525_v17  ;;  %v4593_v12 = vld [vmem:[%s4944_s8 + $0xec] ss:$100 sps:$4 sm:$0xff]   ;;  %v4595_v13 = vld [vmem:[%s4944_s8 + $0xf4] ss:$100 sps:$4 sm:$0xff]  }
  0x44   : > { %2728 = vmatprep.mubr.bf16.mxu1 %v4528_v19  ;;  %v4600_v17 = vld [vmem:[%s5596_s1 + $0x3d0] sm:$0xff]  }
  0x45   : > { %3973 = vmatpush3.bf16.msra.mxu0 %v4521_v14  ;;  %v4597_v14 = vld [vmem:[%s4944_s8 + $0xe8] ss:$100 sps:$4 sm:$0xff]   ;;  %v4602_v19 = vld [vmem:[%s5596_s1 + $0x390] sm:$0xff]  }
  0x46   : > { %4013 = vmatpush3.bf16.msra.mxu1 %v4522_v15  ;;  %4038 = vmatprep.subr.bf16.mxu0 %v4529_v20  ;;  %v4598_v15 = vld [vmem:[%s4944_s8 + $0xf0] ss:$100 sps:$4 sm:$0xff]   ;;  %v4603_v20 = vld [vmem:[%s5596_s1 + $0x358] sm:$0xff]  }
  0x47   : > { %4078 = vmatprep.subr.bf16.mxu1 %v4530_v21  ;;  %v4604_v21 = vld [vmem:[%s5596_s1 + $0x3d8] sm:$0xff]  }
  0x48   : > { %2664 = vmatmul.mubr.bf16.vlgmr.msra.gmra.mrb[16].mxu0 %v4523_v16  ;;  %v4599_v16 = vld [vmem:[%s5596_s1 + $0x350] sm:$0xff]  }
  0x49   : > { %2729 = vmatmul.mubr.bf16.vlgmr.msra.gmra.mrb[16].mxu1 %v4526_v18  ;;  %4039 = vmatpush3.bf16.msra.mxu0 %v4531_v22  ;;  %v4601_v18 = vld [vmem:[%s5596_s1 + $0x310] sm:$0xff]   ;;  %v4605_v22 = vld [vmem:[%s5596_s1 + $0x318] sm:$0xff]  }
  0x4a   : > { %4079 = vmatpush3.bf16.msra.mxu1 %v4532_v23  ;;  %4040 = vmatprep.subr.bf16.mxu0 %v4533_v24  ;;  %v4606_v23 = vld [vmem:[%s5596_s1 + $0x398] sm:$0xff]  }
  0x4b   : > { %4080 = vmatprep.subr.bf16.mxu1 %v4534_v25  ;;  %2671 = vmatprep.mubr.bf16.mxu0 %v4537_v28  ;;  %v4607_v24 = vld [vmem:[%s4944_s8 + $0x1b4] ss:$100 sps:$4 sm:$0xff]   ;;  %v4609_v25 = vld [vmem:[%s4944_s8 + $0x1bc] ss:$100 sps:$4 sm:$0xff]  }
  0x4c   : > { %2736 = vmatprep.mubr.bf16.mxu1 %v4539_v29  ;;  %v4613_v28 = vld [vmem:[%s5596_s1 + $0x360] sm:$0xff]  }
  0x4d   : > { %4041 = vmatpush3.bf16.msra.mxu0 %v4535_v26  ;;  %v4611_v26 = vld [vmem:[%s4944_s8 + $0x1b0] ss:$100 sps:$4 sm:$0xff]   ;;  %v4614_v29 = vld [vmem:[%s5596_s1 + $0x3e0] sm:$0xff]  }
  0x4e   : > { %4081 = vmatpush3.bf16.msra.mxu1 %v4536_v27  ;;  %4042 = vmatprep.subr.bf16.mxu0 %v4543_v32  ;;  %v4612_v27 = vld [vmem:[%s4944_s8 + $0x1b8] ss:$100 sps:$4 sm:$0xff]   ;;  %v4617_v32 = vld [vmem:[%s5596_s1 + $0x368] sm:$0xff]  }
  0x4f   : > { %4082 = vmatprep.subr.bf16.mxu1 %v4544_v33  ;;  %v4618_v33 = vld [vmem:[%s5596_s1 + $0x3e8] sm:$0xff]  }
  0x50   : > { %2672 = vmatmul.mubr.bf16.gmra.mrb[20].mxu0 %v4541_v30  ;;  %v4615_v30 = vld [vmem:[%s5596_s1 + $0x320] sm:$0xff]  }
  0x51   : > { %2737 = vmatmul.mubr.bf16.gmra.mrb[20].mxu1 %v4542_v31  ;;  %4043 = vmatpush3.bf16.msra.mxu0 %v4545_v34  ;;  %v4616_v31 = vld [vmem:[%s5596_s1 + $0x3a0] sm:$0xff]   ;;  %v4619_v34 = vld [vmem:[%s5596_s1 + $0x328] sm:$0xff]  }
  0x52   : > { %4083 = vmatpush3.bf16.msra.mxu1 %v4546_v35  ;;  %4044 = vmatprep.subr.bf16.mxu0 %v4547_v36  ;;  %v4620_v35 = vld [vmem:[%s5596_s1 + $0x3a8] sm:$0xff]   ;;  %v4621_v36 = vld [vmem:[%s4944_s8 + $0x27c] ss:$100 sps:$4 sm:$0xff]  }
  0x53   : > { %4084 = vmatprep.subr.bf16.mxu1 %v4548_v37  ;;  %2679 = vmatprep.mubr.bf16.mxu0 %v4551_v40  ;;  %v4623_v37 = vld [vmem:[%s4944_s8 + $0x284] ss:$100 sps:$4 sm:$0xff]   ;;  %v4627_v40 = vld [vmem:[%s5596_s1 + $0x370] sm:$0xff]  }
  0x54   : > { %2744 = vmatprep.mubr.bf16.mxu1 %v4553_v41  ;;  %v4628_v41 = vld [vmem:[%s5596_s1 + $0x3f0] sm:$0xff]  }
  0x55   : > { %4045 = vmatpush3.bf16.msra.mxu0 %v4549_v38  ;;  %v4625_v38 = vld [vmem:[%s4944_s8 + $0x278] ss:$100 sps:$4 sm:$0xff]  }
  0x56   : > { %4085 = vmatpush3.bf16.msra.mxu1 %v4550_v39  ;;  %4046 = vmatprep.subr.bf16.mxu0 %v4557_v44  ;;  %v4626_v39 = vld [vmem:[%s4944_s8 + $0x280] ss:$100 sps:$4 sm:$0xff]   ;;  %v4631_v44 = vld [vmem:[%s5596_s1 + $0x378] sm:$0xff]  }
  0x57   : > { %4086 = vmatprep.subr.bf16.mxu1 %v4558_v45  ;;  %v4632_v45 = vld [vmem:[%s5596_s1 + $0x3f8] sm:$0xff]  }
  0x58   : > { %2680 = vmatmul.mubr.bf16.gmra.mrb[24].mxu0 %v4555_v42  ;;  %v4629_v42 = vld [vmem:[%s5596_s1 + $0x330] sm:$0xff]  }
  0x59   : > { %2745 = vmatmul.mubr.bf16.gmra.mrb[24].mxu1 %v4556_v43  ;;  %4047 = vmatpush3.bf16.msra.mxu0 %v4559_v46  ;;  %v4630_v43 = vld [vmem:[%s5596_s1 + $0x3b0] sm:$0xff]   ;;  %v4633_v46 = vld [vmem:[%s5596_s1 + $0x338] sm:$0xff]  }
  0x5a   : > { %4087 = vmatpush3.bf16.msra.mxu1 %v4560_v47  ;;  %4048 = vmatprep.subr.bf16.mxu0 %v4561_v48  ;;  %v4634_v47 = vld [vmem:[%s5596_s1 + $0x3b8] sm:$0xff]   ;;  %v4635_v48 = vld [vmem:[%s4944_s8 + $0x30] ss:$100 sps:$4 sm:$0xff]  }
  0x5b   : > { %4088 = vmatprep.subr.bf16.mxu1 %v4562_v49  ;;  %2687 = vmatprep.mubr.bf16.mxu0 %v4565_v52  ;;  %v4637_v49 = vld [vmem:[%s4944_s8 + $0x34] ss:$100 sps:$4 sm:$0xff]   ;;  %v4641_v52 = vld [vmem:[%s5596_s1 + $0x440] sm:$0xff]  }
  0x5c   : > { %2752 = vmatprep.mubr.bf16.mxu1 %v4567_v53  ;;  %v4642_v53 = vld [vmem:[%s5596_s1 + $0x4c0] sm:$0xff]  }
  0x5d   : > { %4049 = vmatpush3.bf16.msra.mxu0 %v4563_v50  ;;  %v4638_v50 = vld [vmem:[%s4944_s8 + $0x38] ss:$100 sps:$4 sm:$0xff]  }
  0x5e   : > { %4089 = vmatpush3.bf16.msra.mxu1 %v4564_v51  ;;  %4050 = vmatprep.subr.bf16.mxu0 %v4571_v56  ;;  %v4640_v51 = vld [vmem:[%s4944_s8 + $0x3c] ss:$100 sps:$4 sm:$0xff]   ;;  %v4645_v56 = vld [vmem:[%s5596_s1 + $0x448] sm:$0xff]  }
  0x5f   : > { %4090 = vmatprep.subr.bf16.mxu1 %v4572_v57  ;;  %v4646_v57 = vld [vmem:[%s5596_s1 + $0x4c8] sm:$0xff]  }
  0x60   : > { %2688 = vmatmul.mubr.bf16.gmra.mrb[28].mxu0 %v4569_v54  ;;  %v4643_v54 = vld [vmem:[%s5596_s1 + $0x400] sm:$0xff]  }
  0x61   : > { %2753 = vmatmul.mubr.bf16.gmra.mrb[28].mxu1 %v4570_v55  ;;  %4051 = vmatpush3.bf16.msra.mxu0 %v4573_v58  ;;  %v4644_v55 = vld [vmem:[%s5596_s1 + $0x480] sm:$0xff]   ;;  %v4647_v58 = vld [vmem:[%s5596_s1 + $0x408] sm:$0xff]  }
  0x62   : > { %4091 = vmatpush3.bf16.msra.mxu1 %v4574_v59  ;;  %4052 = vmatprep.subr.bf16.mxu0 %v4575_v60  ;;  %v4648_v59 = vld [vmem:[%s5596_s1 + $0x488] sm:$0xff]   ;;  %v4649_v60 = vld [vmem:[%s4944_s8 + $0xfc] ss:$100 sps:$4 sm:$0xff]  }
  0x63   : > { %4092 = vmatprep.subr.bf16.mxu1 %v4576_v61  ;;  %2793 = vmatprep.mubr.bf16.mxu0 %v4581_v1  ;;  %v4651_v61 = vld [vmem:[%s4944_s8 + $0x104] ss:$100 sps:$4 sm:$0xff]   ;;  %v4656_v1 = vld [vmem:[%s5596_s1 + $0x4d0] sm:$0xff]  }
  0x64   : > { %2858 = vmatprep.mubr.bf16.mxu1 %v4584_v3  ;;  %v4658_v3 = vld [vmem:[%s5596_s1 + $0x490] sm:$0xff]  }
  0x65   : > { %4053 = vmatpush3.bf16.msra.mxu0 %v4577_v62  ;;  %v4653_v62 = vld [vmem:[%s4944_s8 + $0xf8] ss:$100 sps:$4 sm:$0xff]  }
  0x66   : > { %4093 = vmatpush3.bf16.msra.mxu1 %v4578_v63  ;;  %4118 = vmatprep.subr.bf16.mxu0 %v4585_v4  ;;  %v4654_v63 = vld [vmem:[%s4944_s8 + $0x100] ss:$100 sps:$4 sm:$0xff]   ;;  %v4659_v4 = vld [vmem:[%s5596_s1 + $0x458] sm:$0xff]  }
  0x67   : > { %4158 = vmatprep.subr.bf16.mxu1 %v4586_v5  ;;  %v4660_v5 = vld [vmem:[%s5596_s1 + $0x4d8] sm:$0xff]  }
  0x68   : > { %2794 = vmatmul.mubr.bf16.vlgmr.msra.gmra.mrb[32].mxu0 %v4579_v0  ;;  %v4655_v0 = vld [vmem:[%s5596_s1 + $0x450] sm:$0xff]  }
  0x69   : > { %2859 = vmatmul.mubr.bf16.vlgmr.msra.gmra.mrb[32].mxu1 %v4582_v2  ;;  %4119 = vmatpush3.bf16.msra.mxu0 %v4587_v6  ;;  %v4657_v2 = vld [vmem:[%s5596_s1 + $0x410] sm:$0xff]   ;;  %v4661_v6 = vld [vmem:[%s5596_s1 + $0x418] sm:$0xff]  }
  0x6a   : > { %4159 = vmatpush3.bf16.msra.mxu1 %v4588_v7  ;;  %4120 = vmatprep.subr.bf16.mxu0 %v4589_v8  ;;  %v4662_v7 = vld [vmem:[%s5596_s1 + $0x498] sm:$0xff]   ;;  %v4663_v8 = vld [vmem:[%s4944_s8 + $0x1c4] ss:$100 sps:$4 sm:$0xff]  }
  0x6b   : > { %4160 = vmatprep.subr.bf16.mxu1 %v4590_v9  ;;  %2801 = vmatprep.mubr.bf16.mxu0 %v4593_v12  ;;  %v4665_v9 = vld [vmem:[%s4944_s8 + $0x1cc] ss:$100 sps:$4 sm:$0xff]   ;;  %v4669_v12 = vld [vmem:[%s5596_s1 + $0x460] sm:$0xff]  }
  0x6c   : > { %2866 = vmatprep.mubr.bf16.mxu1 %v4595_v13  ;;  %v4670_v13 = vld [vmem:[%s5596_s1 + $0x4e0] sm:$0xff]  }
  0x6d   : > { %4121 = vmatpush3.bf16.msra.mxu0 %v4591_v10  ;;  %v4667_v10 = vld [vmem:[%s4944_s8 + $0x1c0] ss:$100 sps:$4 sm:$0xff]  }
  0x6e   : > { %4161 = vmatpush3.bf16.msra.mxu1 %v4592_v11  ;;  %4122 = vmatprep.subr.bf16.mxu0 %v4599_v16  ;;  %v4668_v11 = vld [vmem:[%s4944_s8 + $0x1c8] ss:$100 sps:$4 sm:$0xff]  }
  0x6f   : > { %4162 = vmatprep.subr.bf16.mxu1 %v4600_v17  ;;  %v4673_v16 = vld [vmem:[%s5596_s1 + $0x468] sm:$0xff]  }
  0x70   : > { %2802 = vmatmul.mubr.bf16.gmra.mrb[36].mxu0 %v4597_v14  ;;  %v4671_v14 = vld [vmem:[%s5596_s1 + $0x420] sm:$0xff]   ;;  %v4674_v17 = vld [vmem:[%s5596_s1 + $0x4e8] sm:$0xff]  }
  0x71   : > { %2867 = vmatmul.mubr.bf16.gmra.mrb[36].mxu1 %v4598_v15  ;;  %4123 = vmatpush3.bf16.msra.mxu0 %v4601_v18  ;;  %v4672_v15 = vld [vmem:[%s5596_s1 + $0x4a0] sm:$0xff]   ;;  %v4675_v18 = vld [vmem:[%s5596_s1 + $0x428] sm:$0xff]  }
  0x72   : > { %4163 = vmatpush3.bf16.msra.mxu1 %v4602_v19  ;;  %4124 = vmatprep.subr.bf16.mxu0 %v4603_v20  ;;  %v4676_v19 = vld [vmem:[%s5596_s1 + $0x4a8] sm:$0xff]  }
  0x73   : > { %4164 = vmatprep.subr.bf16.mxu1 %v4604_v21  ;;  %2809 = vmatprep.mubr.bf16.mxu0 %v4607_v24  ;;  %v4677_v20 = vld [vmem:[%s4944_s8 + $0x28c] ss:$100 sps:$4 sm:$0xff]   ;;  %v4679_v21 = vld [vmem:[%s4944_s8 + $0x294] ss:$100 sps:$4 sm:$0xff]  }
  0x74   : > { %2874 = vmatprep.mubr.bf16.mxu1 %v4609_v25  ;;  %v4683_v24 = vld [vmem:[%s5596_s1 + $0x470] sm:$0xff]  }
  0x75   : > { %4125 = vmatpush3.bf16.msra.mxu0 %v4605_v22  ;;  %v4681_v22 = vld [vmem:[%s4944_s8 + $0x288] ss:$100 sps:$4 sm:$0xff]   ;;  %v4684_v25 = vld [vmem:[%s5596_s1 + $0x4f0] sm:$0xff]  }
  0x76   : > { %4165 = vmatpush3.bf16.msra.mxu1 %v4606_v23  ;;  %4126 = vmatprep.subr.bf16.mxu0 %v4613_v28  ;;  %v4682_v23 = vld [vmem:[%s4944_s8 + $0x290] ss:$100 sps:$4 sm:$0xff]   ;;  %v4687_v28 = vld [vmem:[%s5596_s1 + $0x478] sm:$0xff]  }
  0x77   : > { %4166 = vmatprep.subr.bf16.mxu1 %v4614_v29  ;;  %v4688_v29 = vld [vmem:[%s5596_s1 + $0x4f8] sm:$0xff]  }
  0x78   : > { %2810 = vmatmul.mubr.bf16.gmra.mrb[40].mxu0 %v4611_v26  ;;  %v4685_v26 = vld [vmem:[%s5596_s1 + $0x430] sm:$0xff]  }
  0x79   : > { %2875 = vmatmul.mubr.bf16.gmra.mrb[40].mxu1 %v4612_v27  ;;  %4127 = vmatpush3.bf16.msra.mxu0 %v4615_v30  ;;  %v4686_v27 = vld [vmem:[%s5596_s1 + $0x4b0] sm:$0xff]   ;;  %v4689_v30 = vld [vmem:[%s5596_s1 + $0x438] sm:$0xff]  }
  0x7a   : > { %4167 = vmatpush3.bf16.msra.mxu1 %v4616_v31  ;;  %4128 = vmatprep.subr.bf16.mxu0 %v4617_v32  ;;  %v4690_v31 = vld [vmem:[%s5596_s1 + $0x4b8] sm:$0xff]   ;;  %v4691_v32 = vld [vmem:[%s4944_s8 + $0x40] ss:$100 sps:$4 sm:$0xff]  }
  0x7b   : > { %4168 = vmatprep.subr.bf16.mxu1 %v4618_v33  ;;  %2817 = vmatprep.mubr.bf16.mxu0 %v4621_v36  ;;  %v4693_v33 = vld [vmem:[%s4944_s8 + $0x44] ss:$100 sps:$4 sm:$0xff]  }
  0x7c   : > { %2882 = vmatprep.mubr.bf16.mxu1 %v4623_v37  ;;  %v4697_v36 = vld [vmem:[%s5596_s1 + $0x540] sm:$0xff]  }
  0x7d   : > { %4129 = vmatpush3.bf16.msra.mxu0 %v4619_v34  ;;  %v4694_v34 = vld [vmem:[%s4944_s8 + $0x48] ss:$100 sps:$4 sm:$0xff]   ;;  %v4698_v37 = vld [vmem:[%s5596_s1 + $0x5c0] sm:$0xff]  }
  0x7e   : > { %4169 = vmatpush3.bf16.msra.mxu1 %v4620_v35  ;;  %4130 = vmatprep.subr.bf16.mxu0 %v4627_v40  ;;  %v4696_v35 = vld [vmem:[%s4944_s8 + $0x4c] ss:$100 sps:$4 sm:$0xff]  }
  0x7f   : > { %4170 = vmatprep.subr.bf16.mxu1 %v4628_v41  ;;  %v4701_v40 = vld [vmem:[%s5596_s1 + $0x548] sm:$0xff]  }
  0x80   : > { %2818 = vmatmul.mubr.bf16.gmra.mrb[44].mxu0 %v4625_v38  ;;  %v4699_v38 = vld [vmem:[%s5596_s1 + $0x500] sm:$0xff]   ;;  %v4702_v41 = vld [vmem:[%s5596_s1 + $0x5c8] sm:$0xff]  }
  0x81   : > { %2883 = vmatmul.mubr.bf16.gmra.mrb[44].mxu1 %v4626_v39  ;;  %4131 = vmatpush3.bf16.msra.mxu0 %v4629_v42  ;;  %v4700_v39 = vld [vmem:[%s5596_s1 + $0x580] sm:$0xff]   ;;  %v4703_v42 = vld [vmem:[%s5596_s1 + $0x508] sm:$0xff]  }
  0x82   : > { %4171 = vmatpush3.bf16.msra.mxu1 %v4630_v43  ;;  %4132 = vmatprep.subr.bf16.mxu0 %v4631_v44  ;;  %v4704_v43 = vld [vmem:[%s5596_s1 + $0x588] sm:$0xff]  }
  0x83   : > { %4172 = vmatprep.subr.bf16.mxu1 %v4632_v45  ;;  %2923 = vmatprep.mubr.bf16.mxu0 %v4637_v49  ;;  %v4705_v44 = vld [vmem:[%s4944_s8 + $0x10c] ss:$100 sps:$4 sm:$0xff]   ;;  %v4707_v45 = vld [vmem:[%s4944_s8 + $0x114] ss:$100 sps:$4 sm:$0xff]  }
  0x84   : > { %2988 = vmatprep.mubr.bf16.mxu1 %v4640_v51  ;;  %v4712_v49 = vld [vmem:[%s5596_s1 + $0x5d0] sm:$0xff]  }
  0x85   : > { %4133 = vmatpush3.bf16.msra.mxu0 %v4633_v46  ;;  %v4709_v46 = vld [vmem:[%s4944_s8 + $0x108] ss:$100 sps:$4 sm:$0xff]   ;;  %v4714_v51 = vld [vmem:[%s5596_s1 + $0x590] sm:$0xff]  }
  0x86   : > { %4173 = vmatpush3.bf16.msra.mxu1 %v4634_v47  ;;  %4198 = vmatprep.subr.bf16.mxu0 %v4641_v52  ;;  %v4710_v47 = vld [vmem:[%s4944_s8 + $0x110] ss:$100 sps:$4 sm:$0xff]   ;;  %v4715_v52 = vld [vmem:[%s5596_s1 + $0x558] sm:$0xff]  }
  0x87   : > { %4238 = vmatprep.subr.bf16.mxu1 %v4642_v53  ;;  %v4716_v53 = vld [vmem:[%s5596_s1 + $0x5d8] sm:$0xff]  }
  0x88   : > { %2924 = vmatmul.mubr.bf16.vlgmr.msra.gmra.mrb[48].mxu0 %v4635_v48  ;;  %v4711_v48 = vld [vmem:[%s5596_s1 + $0x550] sm:$0xff]  }
  0x89   : > { %2989 = vmatmul.mubr.bf16.vlgmr.msra.gmra.mrb[48].mxu1 %v4638_v50  ;;  %4199 = vmatpush3.bf16.msra.mxu0 %v4643_v54  ;;  %v4713_v50 = vld [vmem:[%s5596_s1 + $0x510] sm:$0xff]   ;;  %v4717_v54 = vld [vmem:[%s5596_s1 + $0x518] sm:$0xff]  }
  0x8a   : > { %4239 = vmatpush3.bf16.msra.mxu1 %v4644_v55  ;;  %4200 = vmatprep.subr.bf16.mxu0 %v4645_v56  ;;  %v4718_v55 = vld [vmem:[%s5596_s1 + $0x598] sm:$0xff]  }
  0x8b   : > { %4240 = vmatprep.subr.bf16.mxu1 %v4646_v57  ;;  %2931 = vmatprep.mubr.bf16.mxu0 %v4649_v60  ;;  %v4719_v56 = vld [vmem:[%s4944_s8 + $0x1d4] ss:$100 sps:$4 sm:$0xff]   ;;  %v4721_v57 = vld [vmem:[%s4944_s8 + $0x1dc] ss:$100 sps:$4 sm:$0xff]  }
  0x8c   : > { %2996 = vmatprep.mubr.bf16.mxu1 %v4651_v61  ;;  %v4725_v60 = vld [vmem:[%s5596_s1 + $0x560] sm:$0xff]  }
  0x8d   : > { %4201 = vmatpush3.bf16.msra.mxu0 %v4647_v58  ;;  %v4723_v58 = vld [vmem:[%s4944_s8 + $0x1d0] ss:$100 sps:$4 sm:$0xff]   ;;  %v4726_v61 = vld [vmem:[%s5596_s1 + $0x5e0] sm:$0xff]  }
  0x8e   : > { %4241 = vmatpush3.bf16.msra.mxu1 %v4648_v59  ;;  %4202 = vmatprep.subr.bf16.mxu0 %v4655_v0  ;;  %v4724_v59 = vld [vmem:[%s4944_s8 + $0x1d8] ss:$100 sps:$4 sm:$0xff]   ;;  %v4729_v0 = vld [vmem:[%s5596_s1 + $0x568] sm:$0xff]  }
  0x8f   : > { %4242 = vmatprep.subr.bf16.mxu1 %v4656_v1  ;;  %v4730_v1 = vld [vmem:[%s5596_s1 + $0x5e8] sm:$0xff]  }
  0x90   : > { %2932 = vmatmul.mubr.bf16.gmra.mrb[52].mxu0 %v4653_v62  ;;  %v4727_v62 = vld [vmem:[%s5596_s1 + $0x520] sm:$0xff]  }
  0x91   : > { %2997 = vmatmul.mubr.bf16.gmra.mrb[52].mxu1 %v4654_v63  ;;  %4203 = vmatpush3.bf16.msra.mxu0 %v4657_v2  ;;  %v4728_v63 = vld [vmem:[%s5596_s1 + $0x5a0] sm:$0xff]   ;;  %v4731_v2 = vld [vmem:[%s5596_s1 + $0x528] sm:$0xff]  }
  0x92   : > { %4243 = vmatpush3.bf16.msra.mxu1 %v4658_v3  ;;  %4204 = vmatprep.subr.bf16.mxu0 %v4659_v4  ;;  %v4732_v3 = vld [vmem:[%s5596_s1 + $0x5a8] sm:$0xff]   ;;  %v4733_v4 = vld [vmem:[%s4944_s8 + $0x29c] ss:$100 sps:$4 sm:$0xff]  }
  0x93   : > { %4244 = vmatprep.subr.bf16.mxu1 %v4660_v5  ;;  %2939 = vmatprep.mubr.bf16.mxu0 %v4663_v8  ;;  %v4735_v5 = vld [vmem:[%s4944_s8 + $0x2a4] ss:$100 sps:$4 sm:$0xff]   ;;  %v4739_v8 = vld [vmem:[%s5596_s1 + $0x570] sm:$0xff]  }
  0x94   : > { %3004 = vmatprep.mubr.bf16.mxu1 %v4665_v9  ;;  %v4740_v9 = vld [vmem:[%s5596_s1 + $0x5f0] sm:$0xff]  }
  0x95   : > { %4205 = vmatpush3.bf16.msra.mxu0 %v4661_v6  ;;  %v4737_v6 = vld [vmem:[%s4944_s8 + $0x298] ss:$100 sps:$4 sm:$0xff]  }
  0x96   : > { %4245 = vmatpush3.bf16.msra.mxu1 %v4662_v7  ;;  %4206 = vmatprep.subr.bf16.mxu0 %v4669_v12  ;;  %v4738_v7 = vld [vmem:[%s4944_s8 + $0x2a0] ss:$100 sps:$4 sm:$0xff]   ;;  %v4743_v12 = vld [vmem:[%s5596_s1 + $0x578] sm:$0xff]  }
  0x97   : > { %4246 = vmatprep.subr.bf16.mxu1 %v4670_v13  ;;  %v4744_v13 = vld [vmem:[%s5596_s1 + $0x5f8] sm:$0xff]  }
  0x98   : > { %2940 = vmatmul.mubr.bf16.gmra.mrb[56].mxu0 %v4667_v10  ;;  %v4741_v10 = vld [vmem:[%s5596_s1 + $0x530] sm:$0xff]  }
  0x99   : > { %3005 = vmatmul.mubr.bf16.gmra.mrb[56].mxu1 %v4668_v11  ;;  %4207 = vmatpush3.bf16.msra.mxu0 %v4671_v14  ;;  %v4742_v11 = vld [vmem:[%s5596_s1 + $0x5b0] sm:$0xff]   ;;  %v4745_v14 = vld [vmem:[%s5596_s1 + $0x538] sm:$0xff]  }
  0x9a   : > { %4247 = vmatpush3.bf16.msra.mxu1 %v4672_v15  ;;  %4208 = vmatprep.subr.bf16.mxu0 %v4673_v16  ;;  %v4746_v15 = vld [vmem:[%s5596_s1 + $0x5b8] sm:$0xff]   ;;  %v4747_v16 = vld [vmem:[%s4944_s8 + $0x50] ss:$100 sps:$4 sm:$0xff]  }
  0x9b   : > { %4248 = vmatprep.subr.bf16.mxu1 %v4674_v17  ;;  %2947 = vmatprep.mubr.bf16.mxu0 %v4677_v20  ;;  %v4749_v17 = vld [vmem:[%s4944_s8 + $0x54] ss:$100 sps:$4 sm:$0xff]  }
  0x9c   : > { %3012 = vmatprep.mubr.bf16.mxu1 %v4679_v21  ;;  %v4753_v21 = vld [vmem:[%s5596_s1 + $0x600] sm:$0xff]  }
  0x9d   : > { %4209 = vmatpush3.bf16.msra.mxu0 %v4675_v18  ;;  %v4750_v18 = vld [vmem:[%s4944_s8 + $0x58] ss:$100 sps:$4 sm:$0xff]  }
  0x9e   : > { %4249 = vmatpush3.bf16.msra.mxu1 %v4676_v19  ;;  %4210 = vmatprep.subr.bf16.mxu0 %v4683_v24  ;;  %v4752_v19 = vld [vmem:[%s4944_s8 + $0x5c] ss:$100 sps:$4 sm:$0xff]  }
  0x9f   : > { %4250 = vmatprep.subr.bf16.mxu1 %v4684_v25  ;;  %v4755_v25 = vld [vmem:[%s4944_s8 + $0x11c] ss:$100 sps:$4 sm:$0xff]  }
  0xa0   : > { %2948 = vmatmul.mubr.bf16.gmra.mrb[60].mxu0 %v4681_v22 }
  0xa1   : > { %3013 = vmatmul.mubr.bf16.gmra.mrb[60].mxu1 %v4682_v23  ;;  %4211 = vmatpush3.bf16.msra.mxu0 %v4685_v26  ;;  %v4754_v23 = vld [vmem:[%s5596_s1 + $0x608] sm:$0xff]  }
  0xa2   : > { %4251 = vmatpush3.bf16.msra.mxu1 %v4686_v27  ;;  %4212 = vmatprep.subr.bf16.mxu0 %v4687_v28 }
  0xa3   : > { %4252 = vmatprep.subr.bf16.mxu1 %v4688_v29  ;;  %3053 = vmatprep.mubr.bf16.mxu0 %v4693_v33  ;;  %v4757_v29 = vld [vmem:[%s4944_s8 + $0x124] ss:$100 sps:$4 sm:$0xff]   ;;  %v4759_v33 = vld [vmem:[%s4944_s8 + $0x118] ss:$100 sps:$4 sm:$0xff]  }
  0xa4   : > { %3118 = vmatprep.mubr.bf16.mxu1 %v4696_v35  ;;  %v4761_v35 = vld [vmem:[%s5596_s1 + $0x610] sm:$0xff]  }
  0xa5   : > { %4213 = vmatpush3.bf16.msra.mxu0 %v4689_v30 }
  0xa6   : > { %4253 = vmatpush3.bf16.msra.mxu1 %v4690_v31  ;;  %4278 = vmatprep.subr.bf16.mxu0 %v4697_v36 }
  0xa7   : > { %4318 = vmatprep.subr.bf16.mxu1 %v4698_v37 }
  0xa8   : > { %3054 = vmatmul.mubr.bf16.vlgmr.msra.gmra.mrb[64].mxu0 %v4691_v32 }
  0xa9   : > { %3119 = vmatmul.mubr.bf16.vlgmr.msra.gmra.mrb[64].mxu1 %v4694_v34  ;;  %4279 = vmatpush3.bf16.msra.mxu0 %v4699_v38  ;;  %v4760_v38 = vld [vmem:[%s4944_s8 + $0x120] ss:$100 sps:$4 sm:$0xff]  }
  0xaa   : > { %4319 = vmatpush3.bf16.msra.mxu1 %v4700_v39  ;;  %4280 = vmatprep.subr.bf16.mxu0 %v4701_v40  ;;  %v4763_v40 = vld [vmem:[%s4944_s8 + $0x1e4] ss:$100 sps:$4 sm:$0xff]  }
  0xab   : > { %4320 = vmatprep.subr.bf16.mxu1 %v4702_v41  ;;  %3061 = vmatprep.mubr.bf16.mxu0 %v4705_v44  ;;  %v4762_v41 = vld [vmem:[%s5596_s1 + $0x618] sm:$0xff]  }
  0xac   : > { %3126 = vmatprep.mubr.bf16.mxu1 %v4707_v45  ;;  %v4767_v45 = vld [vmem:[%s4944_s8 + $0x1e0] ss:$100 sps:$4 sm:$0xff]  }
  0xad   : > { %4281 = vmatpush3.bf16.msra.mxu0 %v4703_v42  ;;  %v4765_v42 = vld [vmem:[%s4944_s8 + $0x1ec] ss:$100 sps:$4 sm:$0xff]  }
  0xae   : > { %4321 = vmatpush3.bf16.msra.mxu1 %v4704_v43  ;;  %4282 = vmatprep.subr.bf16.mxu0 %v4711_v48  ;;  %v4769_v48 = vld [vmem:[%s5596_s1 + $0x620] sm:$0xff]  }
  0xaf   : > { %4322 = vmatprep.subr.bf16.mxu1 %v4712_v49 }
  0xb0   : > { %3062 = vmatmul.mubr.bf16.gmra.mrb[68].mxu0 %v4709_v46 }
  0xb1   : > { %3127 = vmatmul.mubr.bf16.gmra.mrb[68].mxu1 %v4710_v47  ;;  %4283 = vmatpush3.bf16.msra.mxu0 %v4713_v50 }
  0xb2   : > { %4323 = vmatpush3.bf16.msra.mxu1 %v4714_v51  ;;  %4284 = vmatprep.subr.bf16.mxu0 %v4715_v52  ;;  %v4768_v52 = vld [vmem:[%s4944_s8 + $0x1e8] ss:$100 sps:$4 sm:$0xff]  }
  0xb3   : > { %4324 = vmatprep.subr.bf16.mxu1 %v4716_v53  ;;  %3069 = vmatprep.mubr.bf16.mxu0 %v4719_v56  ;;  %v4771_v53 = vld [vmem:[%s4944_s8 + $0x2ac] ss:$100 sps:$4 sm:$0xff]  }
  0xb4   : > { %3134 = vmatprep.mubr.bf16.mxu1 %v4721_v57 }
  0xb5   : > { %4285 = vmatpush3.bf16.msra.mxu0 %v4717_v54  ;;  %v4773_v54 = vld [vmem:[%s4944_s8 + $0x2b4] ss:$100 sps:$4 sm:$0xff]  }
  0xb6   : > { %4325 = vmatpush3.bf16.msra.mxu1 %v4718_v55  ;;  %4286 = vmatprep.subr.bf16.mxu0 %v4725_v60 }
  0xb7   : > { %4326 = vmatprep.subr.bf16.mxu1 %v4726_v61  ;;  %v4777_v61 = vld [vmem:[%s5596_s1 + $0x630] sm:$0xff]  }
  0xb8   : > { %3070 = vmatmul.mubr.bf16.gmra.mrb[72].mxu0 %v4723_v58 }
  0xb9   : > { %3135 = vmatmul.mubr.bf16.gmra.mrb[72].mxu1 %v4724_v59  ;;  %4287 = vmatpush3.bf16.msra.mxu0 %v4727_v62  ;;  %v4770_v59 = vld [vmem:[%s5596_s1 + $0x628] sm:$0xff]  }
  0xba   : > { %4327 = vmatpush3.bf16.msra.mxu1 %v4728_v63  ;;  %4288 = vmatprep.subr.bf16.mxu0 %v4729_v0  ;;  %v4775_v0 = vld [vmem:[%s4944_s8 + $0x2a8] ss:$100 sps:$4 sm:$0xff]  }
  0xbb   : > { %4328 = vmatprep.subr.bf16.mxu1 %v4730_v1  ;;  %3077 = vmatprep.mubr.bf16.mxu0 %v4733_v4  ;;  %v4776_v4 = vld [vmem:[%s4944_s8 + $0x2b0] ss:$100 sps:$4 sm:$0xff]  }
  0xbc   : > { %3142 = vmatprep.mubr.bf16.mxu1 %v4735_v5  ;;  %v4779_v5 = vld [vmem:[%s4944_s8 + $0x60] ss:$100 sps:$4 sm:$0xff]  }
  0xbd   : > { %4289 = vmatpush3.bf16.msra.mxu0 %v4731_v2 }
  0xbe   : > { %4329 = vmatpush3.bf16.msra.mxu1 %v4732_v3  ;;  %4290 = vmatprep.subr.bf16.mxu0 %v4739_v8 }
  0xbf   : > { %4330 = vmatprep.subr.bf16.mxu1 %v4740_v9  ;;  %v4780_v9 = vld [vmem:[%s4944_s8 + $0x1f0] ss:$100 sps:$4 sm:$0xff]  }
  0xc0   : > { %3078 = vmatmul.mubr.bf16.gmra.mrb[76].mxu0 %v4737_v6 }
  0xc1   : > { %3143 = vmatmul.mubr.bf16.gmra.mrb[76].mxu1 %v4738_v7  ;;  %4291 = vmatpush3.bf16.msra.mxu0 %v4741_v10 }
  0xc2   : > { %4331 = vmatpush3.bf16.msra.mxu1 %v4742_v11  ;;  %4292 = vmatprep.subr.bf16.mxu0 %v4743_v12 }
  0xc3   : > { %4332 = vmatprep.subr.bf16.mxu1 %v4744_v13  ;;  %3183 = vmatprep.mubr.bf16.mxu0 %v4749_v17 }
  0xc4   : > { %3248 = vmatprep.mubr.bf16.mxu1 %v4752_v19 }
  0xc5   : > { %4293 = vmatpush3.bf16.msra.mxu0 %v4745_v14  ;;  %v4778_v14 = vld [vmem:[%s5596_s1 + $0x638] sm:$0xff]  }
  0xc6   : > { %4333 = vmatpush3.bf16.msra.mxu1 %v4746_v15  ;;  %4370 = vmatprep.subr.bf16.mxu0 %v4753_v21 }
  0xc7   : > { %4394 = vmatprep.subr.bf16.mxu1 %v4753_v21 }
  0xc8   : > { %3184 = vmatmul.mubr.bf16.vlgmr.msra.gmra.mrb[80].mxu0 %v4747_v16 }
  0xc9   : > { %3249 = vmatmul.mubr.bf16.vlgmr.msra.gmra.mrb[80].mxu1 %v4750_v18  ;;  %4371 = vmatpush3.bf16.msra.mxu0 %v4753_v21 }
  0xca   : > { %4402 = vmatpush3.bf16.msra.mxu1 %v4753_v21  ;;  %4372 = vmatprep.subr.bf16.mxu0 %v4754_v23  ;;  %v4782_v21 = vld [vmem:[%s4944_s8 + $0x2b8] ss:$100 sps:$4 sm:$0xff]  }
  0xcb   : > { %4395 = vmatprep.subr.bf16.mxu1 %v4754_v23  ;;  %3191 = vmatprep.mubr.bf16.mxu0 %v4755_v25 }
  0xcc   : > { %3256 = vmatprep.mubr.bf16.mxu1 %v4757_v29 }
  0xcd   : > { %4373 = vmatpush3.bf16.msra.mxu0 %v4754_v23 }
  0xce   : > { %4403 = vmatpush3.bf16.msra.mxu1 %v4754_v23  ;;  %4374 = vmatprep.subr.bf16.mxu0 %v4761_v35 }
  0xcf   : > { %4396 = vmatprep.subr.bf16.mxu1 %v4761_v35 }
  0xd0   : > { %3192 = vmatmul.mubr.bf16.gmra.mrb[84].mxu0 %v4759_v33 }
  0xd1   : > { %3257 = vmatmul.mubr.bf16.gmra.mrb[84].mxu1 %v4760_v38  ;;  %3199 = vmatprep.mubr.bf16.mxu0 %v4763_v40 }
  0xd2   : > { %4375 = vmatpush3.bf16.msra.mxu0 %v4761_v35  ;;  %3264 = vmatprep.mubr.bf16.mxu1 %v4765_v42 }
  0xd3   : > { %4404 = vmatpush3.bf16.msra.mxu1 %v4761_v35  ;;  %4376 = vmatprep.subr.bf16.mxu0 %v4762_v41 }
  0xd4   : > { %4397 = vmatprep.subr.bf16.mxu1 %v4762_v41 }
  0xd6   : > { %4377 = vmatpush3.bf16.msra.mxu0 %v4762_v41 }
  0xd7   : > { %4405 = vmatpush3.bf16.msra.mxu1 %v4762_v41  ;;  %4378 = vmatprep.subr.bf16.mxu0 %v4769_v48 }
  0xd8   : > { %3200 = vmatmul.mubr.bf16.gmra.mrb[88].mxu0 %v4767_v45  ;;  %4398 = vmatprep.subr.bf16.mxu1 %v4769_v48 }
  0xd9   : > { %3265 = vmatmul.mubr.bf16.gmra.mrb[88].mxu1 %v4768_v52  ;;  %3207 = vmatprep.mubr.bf16.mxu0 %v4771_v53 }
  0xda   : > { %4379 = vmatpush3.bf16.msra.mxu0 %v4769_v48  ;;  %3272 = vmatprep.mubr.bf16.mxu1 %v4773_v54 }
  0xdb   : > { %4406 = vmatpush3.bf16.msra.mxu1 %v4769_v48  ;;  %4380 = vmatprep.subr.bf16.mxu0 %v4770_v59 }
  0xdc   : > { %4399 = vmatprep.subr.bf16.mxu1 %v4770_v59 }
  0xde   : > { %4381 = vmatpush3.bf16.msra.mxu0 %v4770_v59 }
  0xdf   : > { %4407 = vmatpush3.bf16.msra.mxu1 %v4770_v59  ;;  %4382 = vmatprep.subr.bf16.mxu0 %v4777_v61 }
  0xe0   : > { %3208 = vmatmul.mubr.bf16.gmra.mrb[92].mxu0 %v4775_v0  ;;  %4400 = vmatprep.subr.bf16.mxu1 %v4777_v61 }
  0xe1   : > { %3273 = vmatmul.mubr.bf16.gmra.mrb[92].mxu1 %v4776_v4  ;;  %4386 = vmatprep.mubr.bf16.mxu0 %v4779_v5 }
  0xe2   : > { %4383 = vmatpush3.bf16.msra.mxu0 %v4777_v61  ;;  %4390 = vmatprep.mubr.bf16.mxu1 %v4780_v9 }
  0xe3   : > { %4408 = vmatpush3.bf16.msra.mxu1 %v4777_v61  ;;  %4384 = vmatprep.subr.bf16.mxu0 %v4778_v14 }
  0xe4   : > { %4401 = vmatprep.subr.bf16.mxu1 %v4778_v14 }
  0xe6   : > { %4385 = vmatpush3.bf16.msra.mxu0 %v4778_v14 }
  0xe7   : > { %4409 = vmatpush3.bf16.msra.mxu1 %v4778_v14 }
  0xea   : > { %4391 = vmatmul.mubr.bf16.vlgmr.msra.gmra.mrb[96].mxu1 %v4782_v21 }
  0xfb   : > { %v3894_v20 = vpop.f32.mrb[0].mxu0 }
  0xfc   : > { %v3934_v22 = vpop.f32.mrb[0].mxu1  ;;  %v3895_v24 = vpop.f32.mrb[1].mxu0 }
  0xfd   : > { %v3896_v26 = vadd.f32 %v3895_v24, %v3894_v20  ;;  %v3935_v27 = vpop.f32.mrb[1].mxu1  ;;  %v3897_v28 = vpop.f32.mrb[2].mxu0  ;;  %v4781_v20 = vld [vmem:[%s4944_s8 + $0x128] ss:$100 sps:$4 sm:$0xff]   ;;  %s3574_s8 = sshll.u32 %s5604_s23, 3  ;;  %s3575_s23 = sshll.u32 %s5606_s12, 3 }
  0xfe   : > { %v3936_v30 = vadd.f32 %v3935_v27, %v3934_v22  ;;  %v3937_v31 = vpop.f32.mrb[2].mxu1  ;;  %v3898_v32 = vpop.f32.mrb[3].mxu0  ;;  %4387 = vmatmul.mubr.bf16.vlgmr.msra.gmra.mrb[96].mxu0 %v4781_v20  ;;  %s263_s19 = scalar_lea.vmem %s5597_s2, %s3574_s8  ;;  %s271_s22 = scalar_lea.vmem %s5598_s3, %s3575_s23 }
  0xff   : > { %v3899_v34 = vadd.f32 %v3898_v32, %v3897_v28  ;;  %v3938_v37 = vpop.f32.mrb[3].mxu1 }
 0x100   : > { %v5528_v36 = vadd.f32 %v3936_v30, %v3896_v26  ;;  %v3939_v39 = vadd.f32 %v3938_v37, %v3937_v31 }
 0x102   : > { %v5536_v43 = vadd.f32 %v3939_v39, %v3899_v34 }
 0x103   : > { %v3900_v44 = vpop.f32.mrb[4].mxu0 }
 0x104   : > { %v3940_v46 = vpop.f32.mrb[4].mxu1  ;;  %v3901_v47 = vpop.f32.mrb[5].mxu0 }
 0x105   : > { %v3902_v49 = vadd.f32 %v3901_v47, %v3900_v44  ;;  %v3941_v50 = vpop.f32.mrb[5].mxu1  ;;  %v3903_v51 = vpop.f32.mrb[6].mxu0 }
 0x106   : > { %v3942_v55 = vadd.f32 %v3941_v50, %v3940_v46  ;;  %v3943_v56 = vpop.f32.mrb[6].mxu1  ;;  %v3904_v58 = vpop.f32.mrb[7].mxu0 }
 0x107   : > { %v3905_v60 = vadd.f32 %v3904_v58, %v3903_v51  ;;  %v3944_v62 = vpop.f32.mrb[7].mxu1 }
 0x108   : > { %v5545_v57 = vadd.f32 %v3942_v55, %v3902_v49  ;;  %v3945_v1 = vadd.f32 %v3944_v62, %v3943_v56 }
 0x10a   : > { %v5557_v10 = vadd.f32 %v3945_v1, %v3905_v60 }
 0x10b   : > { %v3906_v63 = vpop.f32.mrb[8].mxu0 }
 0x10c   : > { %v3946_v2 = vpop.f32.mrb[8].mxu1  ;;  %v3907_v3 = vpop.f32.mrb[9].mxu0 }
 0x10d   : > { %v3908_v6 = vadd.f32 %v3907_v3, %v3906_v63  ;;  %v3947_v7 = vpop.f32.mrb[9].mxu1  ;;  %v3909_v8 = vpop.f32.mrb[10].mxu0 }
 0x10e   : > { %v3948_v11 = vadd.f32 %v3947_v7, %v3946_v2  ;;  %v3949_v12 = vpop.f32.mrb[10].mxu1  ;;  %v3910_v13 = vpop.f32.mrb[11].mxu0 }
 0x10f   : > { %v3911_v15 = vadd.f32 %v3910_v13, %v3909_v8  ;;  %v3950_v16 = vpop.f32.mrb[11].mxu1 }
 0x110   : > { %v5562_v17 = vadd.f32 %v3948_v11, %v3908_v6  ;;  %v3951_v18 = vadd.f32 %v3950_v16, %v3949_v12 }
 0x112   : > { %v5564_v19 = vadd.f32 %v3951_v18, %v3911_v15 }
 0x113   : > { %v3912_v22 = vpop.f32.mrb[12].mxu0 }
 0x114   : > { %v3952_v23 = vpop.f32.mrb[12].mxu1  ;;  %v3913_v24 = vpop.f32.mrb[13].mxu0 }
 0x115   : > { %v3953_v25 = vpop.f32.mrb[13].mxu1  ;;  %v3914_v26 = vadd.f32 %v3913_v24, %v3912_v22  ;;  %v3915_v28 = vpop.f32.mrb[14].mxu0 }
 0x116   : > { %v3954_v27 = vadd.f32 %v3953_v25, %v3952_v23  ;;  %v3955_v29 = vpop.f32.mrb[14].mxu1  ;;  %v3916_v30 = vpop.f32.mrb[15].mxu0 }
 0x117   : > { %v3956_v31 = vpop.f32.mrb[15].mxu1  ;;  %v3917_v33 = vadd.f32 %v3916_v30, %v3915_v28 }
 0x118   : > { %v2625_v32 = vadd.f32 %v3954_v27, %v3914_v26  ;;  %v3957_v34 = vadd.f32 %v3956_v31, %v3955_v29 }
 0x11a   : > { %v2628_v35 = vadd.f32 %v3957_v34, %v3917_v33 }
 0x11b   : > { %v3974_v37 = vpop.f32.mrb[16].mxu0 }
 0x11c   : > { %v3975_v38 = vpop.f32.mrb[17].mxu0  ;;  %v4014_v41 = vpop.f32.mrb[16].mxu1 }
 0x11d   : > { %v3976_v39 = vadd.f32 %v3975_v38, %v3974_v37  ;;  %v3977_v40 = vpop.f32.mrb[18].mxu0  ;;  %v4015_v44 = vpop.f32.mrb[17].mxu1 }
 0x11e   : > { %v3978_v42 = vpop.f32.mrb[19].mxu0  ;;  %v4016_v47 = vadd.f32 %v4015_v44, %v4014_v41  ;;  %v4017_v48 = vpop.f32.mrb[18].mxu1 }
 0x11f   : > { %v2666_v45 = vadd.f32 %v3976_v39, %v5528_v36  ;;  %v3979_v46 = vadd.f32 %v3978_v42, %v3977_v40  ;;  %v4018_v49 = vpop.f32.mrb[19].mxu1 }
 0x120   : > { %v4019_v52 = vadd.f32 %v4018_v49, %v4017_v48 }
 0x121   : > { %v2669_v50 = vadd.f32 %v3979_v46, %v5536_v43  ;;  %v2731_v51 = vadd.f32 %v4016_v47, %v2666_v45 }
 0x123   : > { %v2734_v53 = vadd.f32 %v4019_v52, %v2669_v50  ;;  %v3980_v54 = vpop.f32.mrb[20].mxu0 }
 0x124   : > { %v3981_v55 = vpop.f32.mrb[21].mxu0  ;;  %v4020_v56 = vpop.f32.mrb[20].mxu1 }
 0x125   : > { %v3982_v58 = vadd.f32 %v3981_v55, %v3980_v54  ;;  %v3983_v59 = vpop.f32.mrb[22].mxu0  ;;  %v4021_v60 = vpop.f32.mrb[21].mxu1 }
 0x126   : > { %v3984_v61 = vpop.f32.mrb[23].mxu0  ;;  %v4022_v62 = vadd.f32 %v4021_v60, %v4020_v56  ;;  %v4023_v63 = vpop.f32.mrb[22].mxu1 }
 0x127   : > { %v2674_v36 = vadd.f32 %v3982_v58, %v5545_v57  ;;  %v3985_v0 = vadd.f32 %v3984_v61, %v3983_v59  ;;  %v4024_v1 = vpop.f32.mrb[23].mxu1 }
 0x128   : > { %v4025_v2 = vadd.f32 %v4024_v1, %v4023_v63 }
 0x129   : > { %v2677_v3 = vadd.f32 %v3985_v0, %v5557_v10  ;;  %v2739_v43 = vadd.f32 %v4022_v62, %v2674_v36 }
 0x12b   : > { %v2742_v4 = vadd.f32 %v4025_v2, %v2677_v3  ;;  %v3986_v5 = vpop.f32.mrb[24].mxu0 }
 0x12c   : > { %v4026_v6 = vpop.f32.mrb[24].mxu1  ;;  %v3987_v7 = vpop.f32.mrb[25].mxu0 }
 0x12d   : > { %v4027_v8 = vpop.f32.mrb[25].mxu1  ;;  %v3988_v9 = vadd.f32 %v3987_v7, %v3986_v5  ;;  %v3989_v11 = vpop.f32.mrb[26].mxu0 }
 0x12e   : > { %v4028_v12 = vadd.f32 %v4027_v8, %v4026_v6  ;;  %v4029_v13 = vpop.f32.mrb[26].mxu1  ;;  %v3990_v14 = vpop.f32.mrb[27].mxu0 }
 0x12f   : > { %v4030_v15 = vpop.f32.mrb[27].mxu1  ;;  %v2682_v16 = vadd.f32 %v3988_v9, %v5562_v17  ;;  %v3991_v57 = vadd.f32 %v3990_v14, %v3989_v11 }
 0x130   : > { %v4031_v18 = vadd.f32 %v4030_v15, %v4029_v13 }
 0x131   : > { %v2685_v20 = vadd.f32 %v3991_v57, %v5564_v19  ;;  %v2747_v21 = vadd.f32 %v4028_v12, %v2682_v16 }
 0x133   : > { %v2750_v10 = vadd.f32 %v4031_v18, %v2685_v20  ;;  %v3992_v22 = vpop.f32.mrb[28].mxu0 }
 0x134   : > { %v3993_v23 = vpop.f32.mrb[29].mxu0  ;;  %v4032_v24 = vpop.f32.mrb[28].mxu1 }
 0x135   : > { %v3994_v25 = vadd.f32 %v3993_v23, %v3992_v22  ;;  %v3995_v26 = vpop.f32.mrb[30].mxu0  ;;  %v4033_v27 = vpop.f32.mrb[29].mxu1 }
 0x136   : > { %v3996_v28 = vpop.f32.mrb[31].mxu0  ;;  %v4034_v29 = vadd.f32 %v4033_v27, %v4032_v24  ;;  %v4035_v30 = vpop.f32.mrb[30].mxu1 }
 0x137   : > { %v2690_v31 = vadd.f32 %v3994_v25, %v2625_v32  ;;  %v3997_v33 = vadd.f32 %v3996_v28, %v3995_v26  ;;  %v4036_v34 = vpop.f32.mrb[31].mxu1 }
 0x138   : > { %v4037_v37 = vadd.f32 %v4036_v34, %v4035_v30 }
 0x139   : > { %v2693_v17 = vadd.f32 %v3997_v33, %v2628_v35  ;;  %v2755_v38 = vadd.f32 %v4034_v29, %v2690_v31 }
 0x13b   : > { %v2758_v39 = vadd.f32 %v4037_v37, %v2693_v17  ;;  %v4054_v40 = vpop.f32.mrb[32].mxu0 }
 0x13c   : > { %v4055_v19 = vpop.f32.mrb[33].mxu0  ;;  %v4094_v41 = vpop.f32.mrb[32].mxu1 }
 0x13d   : > { %v4056_v42 = vadd.f32 %v4055_v19, %v4054_v40  ;;  %v4057_v44 = vpop.f32.mrb[34].mxu0  ;;  %v4095_v45 = vpop.f32.mrb[33].mxu1 }
 0x13e   : > { %v4058_v46 = vpop.f32.mrb[35].mxu0  ;;  %v4096_v47 = vadd.f32 %v4095_v45, %v4094_v41  ;;  %v4097_v48 = vpop.f32.mrb[34].mxu1 }
 0x13f   : > { %v2796_v49 = vadd.f32 %v4056_v42, %v2731_v51  ;;  %v4059_v50 = vadd.f32 %v4058_v46, %v4057_v44  ;;  %v4098_v52 = vpop.f32.mrb[35].mxu1 }
 0x140   : > { %v4099_v54 = vadd.f32 %v4098_v52, %v4097_v48 }
 0x141   : > { %v2799_v32 = vadd.f32 %v4059_v50, %v2734_v53  ;;  %v2861_v55 = vadd.f32 %v4096_v47, %v2796_v49 }
 0x143   : > { %v2864_v56 = vadd.f32 %v4099_v54, %v2799_v32  ;;  %v4060_v58 = vpop.f32.mrb[36].mxu0 }
 0x144   : > { %v4100_v35 = vpop.f32.mrb[36].mxu1  ;;  %v4061_v59 = vpop.f32.mrb[37].mxu0 }
 0x145   : > { %v4101_v60 = vpop.f32.mrb[37].mxu1  ;;  %v4062_v61 = vadd.f32 %v4061_v59, %v4060_v58  ;;  %v4063_v62 = vpop.f32.mrb[38].mxu0 }
 0x146   : > { %v4102_v63 = vadd.f32 %v4101_v60, %v4100_v35  ;;  %v4103_v36 = vpop.f32.mrb[38].mxu1  ;;  %v4064_v0 = vpop.f32.mrb[39].mxu0 }
 0x147   : > { %v4104_v1 = vpop.f32.mrb[39].mxu1  ;;  %v2804_v2 = vadd.f32 %v4062_v61, %v2739_v43  ;;  %v4065_v3 = vadd.f32 %v4064_v0, %v4063_v62 }
 0x148   : > { %v4105_v5 = vadd.f32 %v4104_v1, %v4103_v36 }
 0x149   : > { %v2807_v51 = vadd.f32 %v4065_v3, %v2742_v4  ;;  %v2869_v6 = vadd.f32 %v4102_v63, %v2804_v2 }
 0x14b   : > { %v2872_v7 = vadd.f32 %v4105_v5, %v2807_v51  ;;  %v4066_v8 = vpop.f32.mrb[40].mxu0 }
 0x14c   : > { %v4067_v53 = vpop.f32.mrb[41].mxu0  ;;  %v4106_v9 = vpop.f32.mrb[40].mxu1 }
 0x14d   : > { %v4068_v11 = vadd.f32 %v4067_v53, %v4066_v8  ;;  %v4069_v12 = vpop.f32.mrb[42].mxu0  ;;  %v4107_v13 = vpop.f32.mrb[41].mxu1 }
 0x14e   : > { %v4070_v14 = vpop.f32.mrb[43].mxu0  ;;  %v4108_v15 = vadd.f32 %v4107_v13, %v4106_v9  ;;  %v4109_v16 = vpop.f32.mrb[42].mxu1 }
 0x14f   : > { %v2812_v57 = vadd.f32 %v4068_v11, %v2747_v21  ;;  %v4071_v18 = vadd.f32 %v4070_v14, %v4069_v12  ;;  %v4110_v20 = vpop.f32.mrb[43].mxu1 }
 0x150   : > { %v4111_v22 = vadd.f32 %v4110_v20, %v4109_v16 }
 0x151   : > { %v2815_v23 = vadd.f32 %v4071_v18, %v2750_v10  ;;  %v2877_v43 = vadd.f32 %v4108_v15, %v2812_v57 }
 0x153   : > { %v2880_v24 = vadd.f32 %v4111_v22, %v2815_v23  ;;  %v4072_v25 = vpop.f32.mrb[44].mxu0 }
 0x154   : > { %v4073_v4 = vpop.f32.mrb[45].mxu0  ;;  %v4112_v26 = vpop.f32.mrb[44].mxu1 }
 0x155   : > { %v4074_v27 = vadd.f32 %v4073_v4, %v4072_v25  ;;  %v4075_v28 = vpop.f32.mrb[46].mxu0  ;;  %v4113_v29 = vpop.f32.mrb[45].mxu1 }
 0x156   : > { %v4076_v30 = vpop.f32.mrb[47].mxu0  ;;  %v4114_v31 = vadd.f32 %v4113_v29, %v4112_v26  ;;  %v4115_v33 = vpop.f32.mrb[46].mxu1 }
 0x157   : > { %v2820_v34 = vadd.f32 %v4074_v27, %v2755_v38  ;;  %v4077_v37 = vadd.f32 %v4076_v30, %v4075_v28  ;;  %v4116_v17 = vpop.f32.mrb[47].mxu1 }
 0x158   : > { %v4117_v40 = vadd.f32 %v4116_v17, %v4115_v33 }
 0x159   : > { %v2823_v21 = vadd.f32 %v4077_v37, %v2758_v39  ;;  %v2885_v19 = vadd.f32 %v4114_v31, %v2820_v34 }
 0x15b   : > { %v2888_v41 = vadd.f32 %v4117_v40, %v2823_v21  ;;  %v4134_v42 = vpop.f32.mrb[48].mxu0 }
 0x15c   : > { %v4135_v10 = vpop.f32.mrb[49].mxu0  ;;  %v4174_v44 = vpop.f32.mrb[48].mxu1 }
 0x15d   : > { %v4136_v45 = vadd.f32 %v4135_v10, %v4134_v42  ;;  %v4137_v46 = vpop.f32.mrb[50].mxu0  ;;  %v4175_v47 = vpop.f32.mrb[49].mxu1 }
 0x15e   : > { %v4138_v48 = vpop.f32.mrb[51].mxu0  ;;  %v4176_v49 = vadd.f32 %v4175_v47, %v4174_v44  ;;  %v4177_v50 = vpop.f32.mrb[50].mxu1 }
 0x15f   : > { %v2926_v52 = vadd.f32 %v4136_v45, %v2861_v55  ;;  %v4139_v54 = vadd.f32 %v4138_v48, %v4137_v46  ;;  %v4178_v32 = vpop.f32.mrb[51].mxu1 }
 0x160   : > { %v4179_v58 = vadd.f32 %v4178_v32, %v4177_v50 }
 0x161   : > { %v2929_v38 = vadd.f32 %v4139_v54, %v2864_v56  ;;  %v2991_v35 = vadd.f32 %v4176_v49, %v2926_v52 }
 0x163   : > { %v2994_v59 = vadd.f32 %v4179_v58, %v2929_v38  ;;  %v4140_v60 = vpop.f32.mrb[52].mxu0 }
 0x164   : > { %v4141_v39 = vpop.f32.mrb[53].mxu0  ;;  %v4180_v61 = vpop.f32.mrb[52].mxu1 }
 0x165   : > { %v4142_v62 = vadd.f32 %v4141_v39, %v4140_v60  ;;  %v4143_v63 = vpop.f32.mrb[54].mxu0  ;;  %v4181_v36 = vpop.f32.mrb[53].mxu1 }
 0x166   : > { %v4144_v0 = vpop.f32.mrb[55].mxu0  ;;  %v4182_v1 = vadd.f32 %v4181_v36, %v4180_v61  ;;  %v4183_v2 = vpop.f32.mrb[54].mxu1 }
 0x167   : > { %v2934_v3 = vadd.f32 %v4142_v62, %v2869_v6  ;;  %v4145_v5 = vadd.f32 %v4144_v0, %v4143_v63  ;;  %v4184_v51 = vpop.f32.mrb[55].mxu1 }
 0x168   : > { %v4185_v8 = vadd.f32 %v4184_v51, %v4183_v2 }
 0x169   : > { %v2937_v55 = vadd.f32 %v4145_v5, %v2872_v7  ;;  %v2999_v53 = vadd.f32 %v4182_v1, %v2934_v3 }
 0x16b   : > { %v3002_v9 = vadd.f32 %v4185_v8, %v2937_v55  ;;  %v4146_v11 = vpop.f32.mrb[56].mxu0 }
 0x16c   : > { %v4147_v56 = vpop.f32.mrb[57].mxu0  ;;  %v4186_v12 = vpop.f32.mrb[56].mxu1 }
 0x16d   : > { %v4148_v13 = vadd.f32 %v4147_v56, %v4146_v11  ;;  %v4149_v14 = vpop.f32.mrb[58].mxu0  ;;  %v4187_v15 = vpop.f32.mrb[57].mxu1 }
 0x16e   : > { %v4150_v16 = vpop.f32.mrb[59].mxu0  ;;  %v4188_v57 = vadd.f32 %v4187_v15, %v4186_v12  ;;  %v4189_v18 = vpop.f32.mrb[58].mxu1 }
 0x16f   : > { %v2942_v20 = vadd.f32 %v4148_v13, %v2877_v43  ;;  %v4151_v22 = vadd.f32 %v4150_v16, %v4149_v14  ;;  %v4190_v23 = vpop.f32.mrb[59].mxu1 }
 0x170   : > { %v4191_v25 = vadd.f32 %v4190_v23, %v4189_v18 }
 0x171   : > { %v2945_v6 = vadd.f32 %v4151_v22, %v2880_v24  ;;  %v3007_v4 = vadd.f32 %v4188_v57, %v2942_v20 }
 0x173   : > { %v3010_v26 = vadd.f32 %v4191_v25, %v2945_v6  ;;  %v4152_v27 = vpop.f32.mrb[60].mxu0 }
 0x174   : > { %v4192_v7 = vpop.f32.mrb[60].mxu1  ;;  %v4153_v28 = vpop.f32.mrb[61].mxu0 }
 0x175   : > { %v4193_v29 = vpop.f32.mrb[61].mxu1  ;;  %v4154_v30 = vadd.f32 %v4153_v28, %v4152_v27  ;;  %v4155_v31 = vpop.f32.mrb[62].mxu0 }
 0x176   : > { %v4194_v33 = vadd.f32 %v4193_v29, %v4192_v7  ;;  %v4195_v34 = vpop.f32.mrb[62].mxu1  ;;  %v4156_v37 = vpop.f32.mrb[63].mxu0 }
 0x177   : > { %v4196_v17 = vpop.f32.mrb[63].mxu1  ;;  %v2950_v40 = vadd.f32 %v4154_v30, %v2885_v19  ;;  %v4157_v21 = vadd.f32 %v4156_v37, %v4155_v31 }
 0x178   : > { %v4197_v42 = vadd.f32 %v4196_v17, %v4195_v34 }
 0x179   : > { %v2953_v43 = vadd.f32 %v4157_v21, %v2888_v41  ;;  %v3015_v10 = vadd.f32 %v4194_v33, %v2950_v40 }
 0x17b   : > { %v3018_v44 = vadd.f32 %v4197_v42, %v2953_v43  ;;  %v4214_v45 = vpop.f32.mrb[64].mxu0 }
 0x17c   : > { %v4215_v24 = vpop.f32.mrb[65].mxu0  ;;  %v4254_v48 = vpop.f32.mrb[64].mxu1 }
 0x17d   : > { %v4216_v46 = vadd.f32 %v4215_v24, %v4214_v45  ;;  %v4217_v47 = vpop.f32.mrb[66].mxu0  ;;  %v4255_v50 = vpop.f32.mrb[65].mxu1 }
 0x17e   : > { %v4218_v49 = vpop.f32.mrb[67].mxu0  ;;  %v4256_v32 = vadd.f32 %v4255_v50, %v4254_v48  ;;  %v4257_v58 = vpop.f32.mrb[66].mxu1 }
 0x17f   : > { %v3056_v52 = vadd.f32 %v4216_v46, %v2991_v35  ;;  %v4219_v54 = vadd.f32 %v4218_v49, %v4217_v47  ;;  %v4258_v38 = vpop.f32.mrb[67].mxu1 }
 0x180   : > { %v4259_v19 = vadd.f32 %v4258_v38, %v4257_v58 }
 0x181   : > { %v3059_v60 = vadd.f32 %v4219_v54, %v2994_v59  ;;  %v3121_v39 = vadd.f32 %v4256_v32, %v3056_v52 }
 0x183   : > { %v3124_v61 = vadd.f32 %v4259_v19, %v3059_v60  ;;  %v4220_v62 = vpop.f32.mrb[68].mxu0 }
 0x184   : > { %v4221_v41 = vpop.f32.mrb[69].mxu0  ;;  %v4260_v63 = vpop.f32.mrb[68].mxu1 }
 0x185   : > { %v4222_v36 = vadd.f32 %v4221_v41, %v4220_v62  ;;  %v4223_v0 = vpop.f32.mrb[70].mxu0  ;;  %v4261_v1 = vpop.f32.mrb[69].mxu1 }
 0x186   : > { %v4224_v2 = vpop.f32.mrb[71].mxu0  ;;  %v4262_v3 = vadd.f32 %v4261_v1, %v4260_v63  ;;  %v4263_v5 = vpop.f32.mrb[70].mxu1 }
 0x187   : > { %v3064_v51 = vadd.f32 %v4222_v36, %v2999_v53  ;;  %v4225_v8 = vadd.f32 %v4224_v2, %v4223_v0  ;;  %v4264_v35 = vpop.f32.mrb[71].mxu1 }
 0x188   : > { %v4265_v55 = vadd.f32 %v4264_v35, %v4263_v5 }
 0x189   : > { %v3067_v11 = vadd.f32 %v4225_v8, %v3002_v9  ;;  %v3129_v56 = vadd.f32 %v4262_v3, %v3064_v51 }
 0x18b   : > { %v3132_v12 = vadd.f32 %v4265_v55, %v3067_v11  ;;  %v4226_v59 = vpop.f32.mrb[72].mxu0 }
 0x18c   : > { %v4266_v13 = vpop.f32.mrb[72].mxu1  ;;  %v4227_v14 = vpop.f32.mrb[73].mxu0 }
 0x18d   : > { %v4267_v15 = vpop.f32.mrb[73].mxu1  ;;  %v4228_v16 = vadd.f32 %v4227_v14, %v4226_v59  ;;  %v4229_v57 = vpop.f32.mrb[74].mxu0 }
 0x18e   : > { %v4268_v18 = vadd.f32 %v4267_v15, %v4266_v13  ;;  %v4269_v20 = vpop.f32.mrb[74].mxu1  ;;  %v4230_v22 = vpop.f32.mrb[75].mxu0 }
 0x18f   : > { %v4270_v23 = vpop.f32.mrb[75].mxu1  ;;  %v3072_v25 = vadd.f32 %v4228_v16, %v3007_v4  ;;  %v4231_v6 = vadd.f32 %v4230_v22, %v4229_v57 }
 0x190   : > { %v4271_v27 = vadd.f32 %v4270_v23, %v4269_v20 }
 0x191   : > { %v3075_v53 = vadd.f32 %v4231_v6, %v3010_v26  ;;  %v3137_v7 = vadd.f32 %v4268_v18, %v3072_v25 }
 0x193   : > { %v3140_v28 = vadd.f32 %v4271_v27, %v3075_v53  ;;  %v4232_v29 = vpop.f32.mrb[76].mxu0 }
 0x194   : > { %v4233_v9 = vpop.f32.mrb[77].mxu0  ;;  %v4272_v30 = vpop.f32.mrb[76].mxu1 }
 0x195   : > { %v4234_v31 = vadd.f32 %v4233_v9, %v4232_v29  ;;  %v4235_v33 = vpop.f32.mrb[78].mxu0  ;;  %v4273_v34 = vpop.f32.mrb[77].mxu1 }
 0x196   : > { %v4236_v37 = vpop.f32.mrb[79].mxu0  ;;  %v4274_v17 = vadd.f32 %v4273_v34, %v4272_v30  ;;  %v4275_v40 = vpop.f32.mrb[78].mxu1 }
 0x197   : > { %v3080_v21 = vadd.f32 %v4234_v31, %v3015_v10  ;;  %v4237_v42 = vadd.f32 %v4236_v37, %v4235_v33  ;;  %v4276_v43 = vpop.f32.mrb[79].mxu1 }
 0x198   : > { %v4277_v45 = vadd.f32 %v4276_v43, %v4275_v40 }
 0x199   : > { %v3083_v24 = vadd.f32 %v4237_v42, %v3018_v44  ;;  %v3145_v4 = vadd.f32 %v4274_v17, %v3080_v21 }
 0x19b   : > { %v3148_v46 = vadd.f32 %v4277_v45, %v3083_v24  ;;  %v4294_v47 = vpop.f32.mrb[80].mxu0 }
 0x19c   : > { %v4295_v26 = vpop.f32.mrb[81].mxu0  ;;  %v4334_v48 = vpop.f32.mrb[80].mxu1 }
 0x19d   : > { %v4296_v49 = vadd.f32 %v4295_v26, %v4294_v47  ;;  %v4297_v50 = vpop.f32.mrb[82].mxu0  ;;  %v4335_v52 = vpop.f32.mrb[81].mxu1 }
 0x19e   : > { %v4298_v54 = vpop.f32.mrb[83].mxu0  ;;  %v4336_v32 = vadd.f32 %v4335_v52, %v4334_v48  ;;  %v4337_v58 = vpop.f32.mrb[82].mxu1 }
 0x19f   : > { %v3186_v38 = vadd.f32 %v4296_v49, %v3121_v39  ;;  %v4299_v60 = vadd.f32 %v4298_v54, %v4297_v50  ;;  %v4338_v19 = vpop.f32.mrb[83].mxu1 }
 0x1a0   : > { %v4339_v62 = vadd.f32 %v4338_v19, %v4337_v58 }
 0x1a1   : > { %v3189_v10 = vadd.f32 %v4299_v60, %v3124_v61  ;;  %v3251_v41 = vadd.f32 %v4336_v32, %v3186_v38 }
 0x1a3   : > { %v4300_v63 = vpop.f32.mrb[84].mxu0  ;;  %v5574_v36 = vadd.f32 %v4339_v62, %v3189_v10 }
 0x1a4   : > { %v4301_v44 = vpop.f32.mrb[85].mxu0  ;;  %v4340_v0 = vpop.f32.mrb[84].mxu1 }
 0x1a5   : > { %v4302_v1 = vadd.f32 %v4301_v44, %v4300_v63  ;;  %v4303_v2 = vpop.f32.mrb[86].mxu0  ;;  %v4341_v3 = vpop.f32.mrb[85].mxu1 }
 0x1a6   : > { %v4304_v5 = vpop.f32.mrb[87].mxu0  ;;  %v4342_v51 = vadd.f32 %v4341_v3, %v4340_v0  ;;  %v4343_v8 = vpop.f32.mrb[86].mxu1 }
 0x1a7   : > { %v3194_v35 = vadd.f32 %v4302_v1, %v3129_v56  ;;  %v4305_v55 = vadd.f32 %v4304_v5, %v4303_v2  ;;  %v4344_v11 = vpop.f32.mrb[87].mxu1 }
 0x1a8   : > { %v4345_v39 = vadd.f32 %v4344_v11, %v4343_v8 }
 0x1a9   : > { %v3197_v59 = vadd.f32 %v4305_v55, %v3132_v12  ;;  %v3259_v13 = vadd.f32 %v4342_v51, %v3194_v35 }
 0x1ab   : > { %v4306_v14 = vpop.f32.mrb[88].mxu0  ;;  %v3262_v61 = vadd.f32 %v4345_v39, %v3197_v59 }
 0x1ac   : > { %v4307_v15 = vpop.f32.mrb[89].mxu0  ;;  %v4346_v16 = vpop.f32.mrb[88].mxu1 }
 0x1ad   : > { %v4308_v57 = vadd.f32 %v4307_v15, %v4306_v14  ;;  %v4309_v18 = vpop.f32.mrb[90].mxu0  ;;  %v4347_v20 = vpop.f32.mrb[89].mxu1 }
 0x1ae   : > { %v4310_v22 = vpop.f32.mrb[91].mxu0  ;;  %v4348_v23 = vadd.f32 %v4347_v20, %v4346_v16  ;;  %v4349_v25 = vpop.f32.mrb[90].mxu1 }
 0x1af   : > { %v3202_v6 = vadd.f32 %v4308_v57, %v3137_v7  ;;  %v4311_v27 = vadd.f32 %v4310_v22, %v4309_v18  ;;  %v4350_v53 = vpop.f32.mrb[91].mxu1 }
 0x1b0   : > { %v4351_v29 = vadd.f32 %v4350_v53, %v4349_v25 }
 0x1b1   : > { %v3205_v56 = vadd.f32 %v4311_v27, %v3140_v28  ;;  %v3267_v9 = vadd.f32 %v4348_v23, %v3202_v6  ;;  %v3415_v6 = vlaneseq }
 0x1b3   : > { %v4312_v30 = vpop.f32.mrb[92].mxu0  ;;  %v3270_v12 = vadd.f32 %v4351_v29, %v3205_v56 }
 0x1b4   : > { %v4313_v31 = vpop.f32.mrb[93].mxu0  ;;  %v4352_v33 = vpop.f32.mrb[92].mxu1 }
 0x1b5   : > { %v4314_v34 = vadd.f32 %v4313_v31, %v4312_v30  ;;  %v4315_v37 = vpop.f32.mrb[94].mxu0  ;;  %v4353_v17 = vpop.f32.mrb[93].mxu1 }
 0x1b6   : > { %v4316_v40 = vpop.f32.mrb[95].mxu0  ;;  %v4354_v21 = vadd.f32 %v4353_v17, %v4352_v33  ;;  %v4355_v42 = vpop.f32.mrb[94].mxu1 }
 0x1b7   : > { %v3210_v43 = vadd.f32 %v4314_v34, %v3145_v4  ;;  %v4317_v45 = vadd.f32 %v4316_v40, %v4315_v37  ;;  %v4356_v24 = vpop.f32.mrb[95].mxu1 }
 0x1b8   : > { %v4357_v7 = vadd.f32 %v4356_v24, %v4355_v42 }
 0x1b9   : > { %v3213_v47 = vadd.f32 %v4317_v45, %v3148_v46  ;;  %v3275_v26 = vadd.f32 %v4354_v21, %v3210_v43 }
 0x1bb   : > { %v3278_v28 = vadd.f32 %v4357_v7, %v3213_v47 }
 0x1bd   : > { %v4392_v50 = vpop.f32.mrb[96].mxu1 }
 0x1be   : > { %v3340_v54 = vadd.f32 %v4392_v50, %v3275_v26  ;;  %v3331_v58 = vpop.f32.mrb[97].mxu1 }
 0x1bf   : > { %v3332_v4 = vadd.f32 %v3331_v58, %v3267_v9  ;;  %v4393_v19 = vpop.f32.mrb[98].mxu1  ;;  %v3416_v9 = vshrl.u32 %v3415_v6, 7 }
 0x1c0   : > { %3379 = vst [vmem:[%s263_s19 + $0x30] sm:$0xff] %v3340_v54  ;;  %v3343_v62 = vadd.f32 %v4393_v19, %v3278_v28  ;;  %v3334_v63 = vpop.f32.mrb[99].mxu1  ;;  %v3400_v14 = vmul.f32 %v3340_v54, %v3340_v54 }
 0x1c1   : > { %3377 = vst [vmem:[%s263_s19 + $0x20] sm:$0xff] %v3332_v4  ;;  %v3335_v44 = vadd.f32 %v3334_v63, %v3270_v12  ;;  %v3398_v55 = vmul.f32 %v3332_v4, %v3332_v4  ;;  %vm3418_vm0 = vcmp.eq.s32.totalorder %v3416_v9, 1  ;;  %vm3417_vm1 = vcmp.eq.s32.totalorder %v3416_v9, 0 }
 0x1c2   : > { %3380 = vst [vmem:[%s263_s19 + $0x38] sm:$0xff] %v3343_v62  ;;  %v3401_v16 = vmul.f32 %v3343_v62, %v3343_v62 }
 0x1c3   : > { %3378 = vst [vmem:[%s263_s19 + $0x28] sm:$0xff] %v3335_v44  ;;  %v3399_v59 = vmul.f32 %v3335_v44, %v3335_v44 }
 0x1d1   : > { %v4388_v48 = vpop.f32.mrb[96].mxu0 }
 0x1d2   : > { %v3324_v49 = vadd.f32 %v4388_v48, %v3259_v13  ;;  %v3315_v52 = vpop.f32.mrb[97].mxu0 }
 0x1d3   : > { %v3316_v32 = vadd.f32 %v3315_v52, %v3251_v41  ;;  %v4389_v38 = vpop.f32.mrb[98].mxu0 }
 0x1d4   : > { %3375 = vst [vmem:[%s263_s19 + $0x10] sm:$0xff] %v3324_v49  ;;  %v3327_v60 = vadd.f32 %v4389_v38, %v3262_v61  ;;  %v3318_v46 = vpop.f32.mrb[99].mxu0  ;;  %v3396_v2 = vmul.f32 %v3324_v49, %v3324_v49 }
 0x1d5   : > { %3373 = vst [vmem:[%s263_s19] sm:$0xff] %v3316_v32  ;;  %v3319_v10 = vadd.f32 %v3318_v46, %v5574_v36  ;;  %v3394_v0 = vmul.f32 %v3316_v32, %v3316_v32 }
 0x1d6   : > { %3376 = vst [vmem:[%s263_s19 + $0x18] sm:$0xff] %v3327_v60  ;;  %v3397_v51 = vmul.f32 %v3327_v60, %v3327_v60 }
 0x1d7   : > { %3374 = vst [vmem:[%s263_s19 + $0x8] sm:$0xff] %v3319_v10  ;;  %v3381_v41 = vadd.f32 %v3319_v10, %v3316_v32  ;;  %v3395_v1 = vmul.f32 %v3319_v10, %v3319_v10 }
 0x1d9   : > { %v3382_v3 = vadd.f32 %v3381_v41, %v3324_v49  ;;  %v3402_v5 = vadd.f32 %v3395_v1, %v3394_v0 }
 0x1db   : > { %v3403_v8 = vadd.f32 %v3402_v5, %v3396_v2  ;;  %v3383_v35 = vadd.f32 %v3382_v3, %v3327_v60 }
 0x1dd   : > { %v3384_v11 = vadd.f32 %v3383_v35, %v3332_v4  ;;  %v3404_v36 = vadd.f32 %v3403_v8, %v3397_v51 }
 0x1df   : > { %v3385_v39 = vadd.f32 %v3384_v11, %v3335_v44  ;;  %v3405_v13 = vadd.f32 %v3404_v36, %v3398_v55 }
 0x1e1   : > { %v3386_v61 = vadd.f32 %v3385_v39, %v3340_v54  ;;  %v3406_v15 = vadd.f32 %v3405_v13, %v3399_v59 }
 0x1e3   : > { %v3387_v57 = vadd.f32 %v3386_v61, %v3343_v62  ;;  %v3407_v18 = vadd.f32 %v3406_v15, %v3400_v14 }
 0x1e5   : > { %v3388_v20 = vrot.slane %v3387_v57, 4  ;;  %v3408_v22 = vadd.f32 %v3407_v18, %v3401_v16 }
 0x1e7   : > { %v3389_v23 = vadd.f32 %v3388_v20, %v3387_v57  ;;  %v3409_v25 = vrot.slane %v3408_v22, 4 }
 0x1e9   : > { %v3390_v27 = vrot.slane %v3389_v23, 2  ;;  %v3410_v53 = vadd.f32 %v3409_v25, %v3408_v22 }
 0x1eb   : > { %v3391_v29 = vadd.f32 %v3390_v27, %v3389_v23  ;;  %v3411_v56 = vrot.slane %v3410_v53, 2 }
 0x1ed   : > { %v3412_v30 = vadd.f32 %v3411_v56, %v3410_v53  ;;  %v3392_v12 = vrot.slane %v3391_v29, 1 }
 0x1ef   : > { %v3413_v31 = vrot.slane %v3412_v30, 1  ;;  %v3393_v34 = vadd.f32 %v3392_v12, %v3391_v29 }
 0x1f1   : > { %v3414_v33 = vadd.f32 %v3413_v31, %v3412_v30 }
 0x1f3   : > { %v3419_v37 = vsel %vm3418_vm0, %v3414_v33, 0.0 }
 0x1f4   : > { %v3420_v17 = vsel %vm3417_vm1, %v3393_v34, %v3419_v37 }
 0x1f5   : > { %3421 = vst [vmem:[%s271_s22] sm:$0xff] %v3420_v17 }
 0x1f6 PF: > { %s14_s14 = sadd.s32 1, %s4805_s14   ;;  %s5599_s12 = smov %s4801_s13 }
 0x1f7   : > { %p11_p6 = scmp.ge.s32.totalorder %s14_s14, 4   ;;  %s5600_s13 = smov %s5602_s15 }
 0x1f9   :  { %13 = sbr.rel (!%p11_p6) target bundleno = 2 (0x2), region = 81 }

// kernel: sub.0
= control target key start
LH: loop header
LB: loop body
LE: loop exit
PB: predicated region body
PF: predicated region fallthrough
CT: control target
= control target key end

     0   :  { %s34_s0 = inlined_call_operand.vmem [shape: f32[2], index: 0, kind: input, shape index: {}]   ;;  %s35_s1 = inlined_call_operand.vmem [shape: f32[2], index: 1, kind: input, shape index: {}]   ;;  %s36_s2 = inlined_call_operand.vmem [shape: f32[2], index: 2, kind: output, shape index: {}]  }
   0x1   :  { %v3_v0 = vld [vmem:[%s34_s0] sm:$0x1] }
   0x2   :  { %v4_v1 = vld [vmem:[%s35_s1] sm:$0x1] }
   0x3   :  { %v7_v2 = vsub.f32 %v3_v0, %v4_v1 }
   0x5   :  { %9 = vst [vmem:[%s36_s2] sm:$0x1] %v7_v2 }

// kernel: forward.11
= control target key start
LH: loop header
LB: loop body
LE: loop exit
PB: predicated region body
PF: predicated region fallthrough
CT: control target
= control target key end

     0   :  { %v1154_v1 = vmov 0   ;;  %vm78_vm0 = vcmask 130048   ;;  %v536_v21 = vlaneseq  ;;  %s1587_s0 = inlined_call_operand.vmem [shape: bf16[16,256], index: 0, kind: input, shape index: {}]   ;;  %s1588_s1 = inlined_call_operand.vmem [shape: bf16[16,256], index: 1, kind: input, shape index: {}]   ;;  %s1589_s2 = inlined_call_operand.vmem [shape: f32[8,256], index: 2, kind: output, shape index: {0}]   ;;  %s1590_s3 = inlined_call_operand.vmem [shape: f32[8,256], index: 3, kind: output, shape index: {1}]  }
   0x1   :  { %v1148_v0 = vld [vmem:[%s1587_s0] ss:$8 sps:$4 sm:$0xff]   ;;  %159 = vmatprep.mubr.bf16.mxu0 %v1154_v1  ;;  %239 = vmatprep.mubr.bf16.mxu1 %v1154_v1  ;;  %v1151_v2 = vld [vmem:[%s1588_s1 + $0x4] ss:$8 sps:$4 sm:$0xff]  }
   0x2   :  { %36 = vxpose.xlu0.c.b16.start.end [1/1] (short) %v1148_v0, 128  ;;  %v1153_v3 = vld [vmem:[%s1588_s1] ss:$8 sps:$4 sm:$0xff]   ;;  %127 = vmatprep.subr.bf16.mxu0 %v1151_v2  ;;  %v1150_v4 = vld [vmem:[%s1587_s0 + $0x4] ss:$8 sps:$4 sm:$0xff]   ;;  %v1203_v22 = vshrl.u32 %v536_v21, 7  ;;  %v1205_v24 = vand.u32 127, %v536_v21 }
   0x3   :  { %1144 = vmatprep.subr.bf16.mxu1 %v1151_v2  ;;  %128 = vmatpush1.bf16.msra.mxu0 %v1153_v3 }
   0x4   :  { %1145 = vmatpush1.bf16.msra.mxu1 %v1153_v3  ;;  %v538_v25 = vadd.s32 8, %v1203_v22  ;;  %vm572_vm1 = vcmp.eq.s32.totalorder %v1203_v22, %v1205_v24  ;;  %v539_v40 = vadd.s32 16, %v1203_v22  ;;  %v540_v47 = vadd.s32 24, %v1203_v22 }
   0x5   :  { %v1219_v48 = vadd.s32 32, %v1203_v22  ;;  %v542_v60 = vadd.s32 40, %v1203_v22 }
   0x6   :  { %vm574_vm2 = vcmp.eq.s32.totalorder %v538_v25, %v1205_v24  ;;  %vm576_vm3 = vcmp.eq.s32.totalorder %v539_v40, %v1205_v24  ;;  %vm578_vm4 = vcmp.eq.s32.totalorder %v540_v47, %v1205_v24  ;;  %v1255_v25 = vadd.s32 128, %v1205_v24 }
   0x7   :  { %vm580_vm5 = vcmp.eq.s32.totalorder %v1219_v48, %v1205_v24  ;;  %vm582_vm6 = vcmp.eq.s32.totalorder %v542_v60, %v1205_v24  ;;  %v1283_v47 = vadd.s32 152, %v1203_v22  ;;  %v1302_v60 = vadd.s32 112, %v1203_v22 }
  0x1f   :  { %52 = vxpose.xlu0.c.b16.start.end [1/1] (short) %v1150_v4, 128 }
  0x68   :  { %v44_v5 = vpop.trf.xlu0 }
  0x69   :  { %1064 = vmatmul.mubr.msk.bf16.vlgmr.msra.gmra.mrb[0].mxu0 %vm78_vm0, %v44_v5 }
  0x6a   :  { %169 = vmatprep.mubr.bf16.mxu0 %v1154_v1 }
  0x6c   :  { %v45_v6 = vpop.trf.xlu0 }
  0x70   :  { %v46_v7 = vpop.trf.xlu0 }
  0x71   :  { %1065 = vmatmul.mubr.msk.bf16.gmra.mrb[4].mxu0 %vm78_vm0, %v45_v6  ;;  %v1234_v6 = vadd.s32 48, %v1203_v22 }
  0x72   :  { %179 = vmatprep.mubr.bf16.mxu0 %v1154_v1 }
  0x73   :  { %vm584_vm7 = vcmp.eq.s32.totalorder %v1234_v6, %v1205_v24 }
  0x74   :  { %v47_v8 = vpop.trf.xlu0 }
  0x78   :  { %v48_v9 = vpop.trf.xlu0 }
  0x79   :  { %1066 = vmatmul.mubr.msk.bf16.gmra.mrb[8].mxu0 %vm78_vm0, %v46_v7 }
  0x7a   :  { %189 = vmatprep.mubr.bf16.mxu0 %v1154_v1 }
  0x7c   :  { %v49_v10 = vpop.trf.xlu0 }
  0x80   :  { %v50_v11 = vpop.trf.xlu0 }
  0x81   :  { %1067 = vmatmul.mubr.msk.bf16.gmra.mrb[12].mxu0 %vm78_vm0, %v47_v8 }
  0x82   :  { %199 = vmatprep.mubr.bf16.mxu0 %v1154_v1 }
  0x84   :  { %v51_v12 = vpop.trf.xlu0 }
  0x88   :  { %v60_v13 = vpop.trf.xlu0 }
  0x89   :  { %1068 = vmatmul.mubr.msk.bf16.gmra.mrb[16].mxu0 %vm78_vm0, %v48_v9  ;;  %1072 = vmatmul.mubr.msk.bf16.vlgmr.msra.gmra.mrb[0].mxu1 %vm78_vm0, %v60_v13 }
  0x8a   :  { %209 = vmatprep.mubr.bf16.mxu0 %v1154_v1  ;;  %249 = vmatprep.mubr.bf16.mxu1 %v1154_v1 }
  0x8c   :  { %v61_v14 = vpop.trf.xlu0 }
  0x90   :  { %v62_v15 = vpop.trf.xlu0 }
  0x91   :  { %1069 = vmatmul.mubr.msk.bf16.gmra.mrb[20].mxu0 %vm78_vm0, %v49_v10  ;;  %1073 = vmatmul.mubr.msk.bf16.gmra.mrb[4].mxu1 %vm78_vm0, %v61_v14  ;;  %v1242_v14 = vadd.s32 56, %v1203_v22 }
  0x92   :  { %219 = vmatprep.mubr.bf16.mxu0 %v1154_v1  ;;  %259 = vmatprep.mubr.bf16.mxu1 %v1154_v1 }
  0x93   :  { %vm586_vm8 = vcmp.eq.s32.totalorder %v1242_v14, %v1205_v24 }
  0x94   :  { %v63_v16 = vpop.trf.xlu0 }
  0x98   :  { %v64_v17 = vpop.trf.xlu0 }
  0x99   :  { %1070 = vmatmul.mubr.msk.bf16.gmra.mrb[24].mxu0 %vm78_vm0, %v50_v11  ;;  %1074 = vmatmul.mubr.msk.bf16.gmra.mrb[8].mxu1 %vm78_vm0, %v62_v15 }
  0x9a   :  { %229 = vmatprep.mubr.bf16.mxu0 %v1154_v1  ;;  %269 = vmatprep.mubr.bf16.mxu1 %v1154_v1 }
  0x9c   :  { %v65_v18 = vpop.trf.xlu0 }
  0xa0   :  { %v66_v19 = vpop.trf.xlu0 }
  0xa1   :  { %1071 = vmatmul.mubr.msk.bf16.gmra.mrb[28].mxu0 %vm78_vm0, %v51_v12  ;;  %1075 = vmatmul.mubr.msk.bf16.gmra.mrb[12].mxu1 %vm78_vm0, %v63_v16 }
  0xa2   :  { %279 = vmatprep.mubr.bf16.mxu1 %v1154_v1 }
  0xa4   :  { %v67_v20 = vpop.trf.xlu0 }
  0xa9   :  { %1076 = vmatmul.mubr.msk.bf16.gmra.mrb[16].mxu1 %vm78_vm0, %v64_v17 }
  0xaa   :  { %289 = vmatprep.mubr.bf16.mxu1 %v1154_v1 }
  0xb1   :  { %1077 = vmatmul.mubr.msk.bf16.gmra.mrb[20].mxu1 %vm78_vm0, %v65_v18  ;;  %v1247_v18 = vadd.s32 64, %v1203_v22 }
  0xb2   :  { %299 = vmatprep.mubr.bf16.mxu1 %v1154_v1 }
  0xb3   :  { %vm588_vm9 = vcmp.eq.s32.totalorder %v1247_v18, %v1205_v24 }
  0xb9   :  { %1078 = vmatmul.mubr.msk.bf16.gmra.mrb[24].mxu1 %vm78_vm0, %v66_v19  ;;  %v1250_v19 = vadd.s32 128, %v1203_v22 }
  0xba   :  { %309 = vmatprep.mubr.bf16.mxu1 %v1154_v1 }
  0xbb   :  { %vm605_vm11 = vcmp.eq.s32.totalorder %v1250_v19, %v1255_v25 }
  0xc1   :  { %1079 = vmatmul.mubr.msk.bf16.gmra.mrb[28].mxu1 %vm78_vm0, %v67_v20 }
 0x13c   :  { %v161_v23 = vpop.f32.mrb[0].mxu0 }
 0x13d   :  { %v320_v26 = vmul.f32 0.015625, %v161_v23  ;;  %v163_v27 = vpop.f32.mrb[1].mxu0 }
 0x13e   :  { %v321_v28 = vmul.f32 0.015625, %v163_v27  ;;  %v165_v29 = vpop.f32.mrb[2].mxu0 }
 0x13f   :  { %v384_v30 = vmul.f32 %v320_v26, %v320_v26  ;;  %v1080_v31 = vadd.f32 -1.0, %v320_v26  ;;  %v322_v32 = vmul.f32 0.015625, %v165_v29  ;;  %v167_v33 = vpop.f32.mrb[3].mxu0  ;;  %v1258_v26 = vadd.s32 72, %v1203_v22 }
 0x140   :  { %v323_v34 = vmul.f32 0.015625, %v167_v33  ;;  %v385_v38 = vmul.f32 %v321_v28, %v321_v28 }
 0x141   :  { %v702_v35 = vmul.f32 %v1080_v31, %v1080_v31  ;;  %v386_v36 = vmul.f32 %v322_v32, %v322_v32  ;;  %v1082_v37 = vadd.f32 -1.0, %v322_v32  ;;  %v910_v41 = vsel %vm572_vm1, 0.0, %v384_v30 }
 0x142   :  { %v387_v39 = vmul.f32 %v323_v34, %v323_v34  ;;  %v1261_v31 = vadd.s32 136, %v1203_v22  ;;  %v1266_v34 = vadd.s32 80, %v1203_v22  ;;  %vm590_vm10 = vcmp.eq.s32.totalorder %v1258_v26, %v1205_v24 }
 0x143   :  { %v704_v42 = vmul.f32 %v1082_v37, %v1082_v37  ;;  %v912_v43 = vsel %vm574_vm2, 0.0, %v386_v36  ;;  %v766_v49 = vsel %vm572_vm1, %v702_v35, 0.0  ;;  %v1269_v35 = vadd.s32 144, %v1203_v22 }
 0x144   :  { %v974_v44 = vadd.f32 %v912_v43, %v910_v41  ;;  %v1011_v45 = vadd.f32 %v387_v39, %v385_v38  ;;  %v171_v46 = vpop.f32.mrb[4].mxu0  ;;  %v1275_v43 = vadd.s32 88, %v1203_v22  ;;  %vm592_vm12 = vcmp.eq.s32.totalorder %v1266_v34, %v1205_v24 }
 0x145   :  { %v768_v50 = vsel %vm574_vm2, %v704_v42, 0.0  ;;  %v324_v51 = vmul.f32 0.015625, %v171_v46  ;;  %v173_v52 = vpop.f32.mrb[5].mxu0  ;;  %vm607_vm13 = vcmp.eq.s32.totalorder %v1261_v31, %v1255_v25  ;;  %vm609_vm15 = vcmp.eq.s32.totalorder %v1269_v35, %v1255_v25 }
 0x146   :  { %v830_v53 = vadd.f32 %v768_v50, %v766_v49  ;;  %v325_v54 = vmul.f32 0.015625, %v173_v52  ;;  %v175_v55 = vpop.f32.mrb[6].mxu0  ;;  %vm594_vm14 = vcmp.eq.s32.totalorder %v1275_v43, %v1205_v24  ;;  %vm611_vm1 = vcmp.eq.s32.totalorder %v1283_v47, %v1255_v25 }
 0x147   :  { %v388_v56 = vmul.f32 %v324_v51, %v324_v51  ;;  %v1084_v57 = vadd.f32 -1.0, %v324_v51  ;;  %v326_v58 = vmul.f32 0.015625, %v175_v55  ;;  %v177_v59 = vpop.f32.mrb[7].mxu0 }
 0x148   :  { %v389_v61 = vmul.f32 %v325_v54, %v325_v54  ;;  %v327_v62 = vmul.f32 0.015625, %v177_v59 }
 0x149   :  { %v706_v63 = vmul.f32 %v1084_v57, %v1084_v57  ;;  %v914_v0 = vsel %vm576_vm3, 0.0, %v388_v56  ;;  %v390_v1 = vmul.f32 %v326_v58, %v326_v58  ;;  %v1086_v2 = vadd.f32 -1.0, %v326_v58 }
 0x14a   :  { %v975_v3 = vadd.f32 %v974_v44, %v914_v0  ;;  %v1012_v4 = vadd.f32 %v1011_v45, %v389_v61  ;;  %v391_v5 = vmul.f32 %v327_v62, %v327_v62  ;;  %v1291_v56 = vadd.s32 160, %v1203_v22 }
 0x14b   :  { %v770_v7 = vsel %vm576_vm3, %v706_v63, 0.0  ;;  %v708_v8 = vmul.f32 %v1086_v2, %v1086_v2  ;;  %v916_v9 = vsel %vm578_vm4, 0.0, %v390_v1  ;;  %v1294_v57 = vadd.s32 104, %v1203_v22 }
 0x14c   :  { %v831_v10 = vadd.f32 %v830_v53, %v770_v7  ;;  %v976_v11 = vadd.f32 %v975_v3, %v916_v9  ;;  %v1013_v12 = vadd.f32 %v1012_v4, %v391_v5  ;;  %v181_v13 = vpop.f32.mrb[8].mxu0  ;;  %v1286_v53 = vadd.s32 96, %v1203_v22 }
 0x14d   :  { %v772_v15 = vsel %vm578_vm4, %v708_v8, 0.0  ;;  %v328_v16 = vmul.f32 0.015625, %v181_v13  ;;  %v183_v17 = vpop.f32.mrb[9].mxu0  ;;  %v1299_v62 = vadd.s32 168, %v1203_v22  ;;  %v1305_v3 = vadd.s32 176, %v1203_v22 }
 0x14e   :  { %v832_v20 = vadd.f32 %v831_v10, %v772_v15  ;;  %v329_v21 = vmul.f32 0.015625, %v183_v17  ;;  %v185_v23 = vpop.f32.mrb[10].mxu0  ;;  %v1310_v7 = vadd.s32 120, %v1203_v22  ;;  %v1313_v8 = vadd.s32 184, %v1203_v22 }
 0x14f   :  { %v392_v27 = vmul.f32 %v328_v16, %v328_v16  ;;  %v1088_v28 = vadd.f32 -1.0, %v328_v16  ;;  %v330_v29 = vmul.f32 0.015625, %v185_v23  ;;  %v187_v30 = vpop.f32.mrb[11].mxu0  ;;  %v1325_v23 = vadd.s32 192, %v1203_v22 }
 0x150   :  { %v393_v32 = vmul.f32 %v329_v21, %v329_v21  ;;  %v331_v33 = vmul.f32 0.015625, %v187_v30  ;;  %vm596_vm0 = vcmp.eq.s32.totalorder %v1286_v53, %v1205_v24  ;;  %vm598_vm2 = vcmp.eq.s32.totalorder %v1294_v57, %v1205_v24 }
 0x151   :  { %v710_v36 = vmul.f32 %v1088_v28, %v1088_v28  ;;  %v918_v37 = vsel %vm580_vm5, 0.0, %v392_v27  ;;  %v394_v38 = vmul.f32 %v330_v29, %v330_v29  ;;  %v1090_v39 = vadd.f32 -1.0, %v330_v29 }
 0x152   :  { %v977_v40 = vadd.f32 %v976_v11, %v918_v37  ;;  %v1014_v41 = vadd.f32 %v1013_v12, %v393_v32  ;;  %v395_v42 = vmul.f32 %v331_v33, %v331_v33  ;;  %v1328_v33 = vadd.s32 200, %v1203_v22 }
 0x153   :  { %v774_v44 = vsel %vm580_vm5, %v710_v36, 0.0  ;;  %v712_v45 = vmul.f32 %v1090_v39, %v1090_v39  ;;  %v920_v46 = vsel %vm582_vm6, 0.0, %v394_v38  ;;  %v1336_v39 = vadd.s32 208, %v1203_v22 }
 0x154   :  { %v833_v49 = vadd.f32 %v832_v20, %v774_v44  ;;  %v978_v50 = vadd.f32 %v977_v40, %v920_v46  ;;  %v1015_v51 = vadd.f32 %v1014_v41, %v395_v42  ;;  %v191_v52 = vpop.f32.mrb[12].mxu0  ;;  %v1339_v40 = vadd.s32 216, %v1203_v22 }
 0x155   :  { %v776_v54 = vsel %vm582_vm6, %v712_v45, 0.0  ;;  %v332_v55 = vmul.f32 0.015625, %v191_v52  ;;  %v193_v48 = vpop.f32.mrb[13].mxu0  ;;  %vm613_vm3 = vcmp.eq.s32.totalorder %v1291_v56, %v1255_v25  ;;  %vm600_vm4 = vcmp.eq.s32.totalorder %v1302_v60, %v1205_v24 }
 0x156   :  { %v834_v58 = vadd.f32 %v833_v49, %v776_v54  ;;  %v333_v59 = vmul.f32 0.015625, %v193_v48  ;;  %v195_v61 = vpop.f32.mrb[14].mxu0  ;;  %vm615_vm5 = vcmp.eq.s32.totalorder %v1299_v62, %v1255_v25  ;;  %vm602_vm6 = vcmp.eq.s32.totalorder %v1310_v7, %v1205_v24 }
 0x157   :  { %v396_v63 = vmul.f32 %v332_v55, %v332_v55  ;;  %v1092_v0 = vadd.f32 -1.0, %v332_v55  ;;  %v334_v1 = vmul.f32 0.015625, %v195_v61  ;;  %v197_v2 = vpop.f32.mrb[15].mxu0  ;;  %v1344_v55 = vadd.s32 224, %v1203_v22 }
 0x158   :  { %v397_v4 = vmul.f32 %v333_v59, %v333_v59  ;;  %v335_v5 = vmul.f32 0.015625, %v197_v2  ;;  %v1347_v59 = vadd.s32 232, %v1203_v22  ;;  %v1350_v61 = vadd.s32 240, %v1203_v22 }
 0x159   :  { %v714_v9 = vmul.f32 %v1092_v0, %v1092_v0  ;;  %v922_v10 = vsel %vm584_vm7, 0.0, %v396_v63  ;;  %v398_v11 = vmul.f32 %v334_v1, %v334_v1  ;;  %v1094_v12 = vadd.f32 -1.0, %v334_v1 }
 0x15a   :  { %v979_v13 = vadd.f32 %v978_v50, %v922_v10  ;;  %v1016_v15 = vadd.f32 %v1015_v51, %v397_v4  ;;  %v399_v16 = vmul.f32 %v335_v5, %v335_v5  ;;  %v1360_v10 = vadd.s32 248, %v1203_v22 }
 0x15b   :  { %v778_v17 = vsel %vm584_vm7, %v714_v9, 0.0  ;;  %v716_v20 = vmul.f32 %v1094_v12, %v1094_v12  ;;  %v924_v21 = vsel %vm586_vm8, 0.0, %v398_v11  ;;  %vm617_vm7 = vcmp.eq.s32.totalorder %v1305_v3, %v1255_v25 }
 0x15c   :  { %v835_v27 = vadd.f32 %v834_v58, %v778_v17  ;;  %v980_v28 = vadd.f32 %v979_v13, %v924_v21  ;;  %v1017_v29 = vadd.f32 %v1016_v15, %v399_v16  ;;  %v201_v30 = vpop.f32.mrb[16].mxu0  ;;  %v241_v32 = vpop.f32.mrb[0].mxu1 }
 0x15d   :  { %v780_v6 = vsel %vm586_vm8, %v716_v20, 0.0  ;;  %v336_v36 = vmul.f32 0.015625, %v201_v30  ;;  %v203_v37 = vpop.f32.mrb[17].mxu0  ;;  %v243_v38 = vpop.f32.mrb[1].mxu1  ;;  %v352_v42 = vmul.f32 0.015625, %v241_v32  ;;  %vm619_vm8 = vcmp.eq.s32.totalorder %v1313_v8, %v1255_v25 }
 0x15e   :  { %v836_v41 = vadd.f32 %v835_v27, %v780_v6  ;;  %v337_v44 = vmul.f32 0.015625, %v203_v37  ;;  %v353_v45 = vmul.f32 0.015625, %v243_v38  ;;  %v205_v46 = vpop.f32.mrb[18].mxu0  ;;  %v245_v49 = vpop.f32.mrb[2].mxu1 }
 0x15f   :  { %v400_v14 = vmul.f32 %v336_v36, %v336_v36  ;;  %v1096_v50 = vadd.f32 -1.0, %v336_v36  ;;  %v338_v51 = vmul.f32 0.015625, %v205_v46  ;;  %v207_v52 = vpop.f32.mrb[19].mxu0  ;;  %v247_v54 = vpop.f32.mrb[3].mxu1  ;;  %v1355_v5 = vmul.f32 %v352_v42, %v352_v42 }
 0x160   :  { %v401_v48 = vmul.f32 %v337_v44, %v337_v44  ;;  %v1113_v58 = vadd.f32 -1.0, %v353_v45  ;;  %v417_v12 = vmul.f32 %v353_v45, %v353_v45  ;;  %v354_v20 = vmul.f32 0.015625, %v245_v49 }
 0x161   :  { %v718_v63 = vmul.f32 %v1096_v50, %v1096_v50  ;;  %v926_v0 = vsel %vm588_vm9, 0.0, %v400_v14  ;;  %v402_v1 = vmul.f32 %v338_v51, %v338_v51  ;;  %v1098_v2 = vadd.f32 -1.0, %v338_v51 }
 0x162   :  { %v981_v4 = vadd.f32 %v980_v28, %v926_v0  ;;  %v1018_v9 = vadd.f32 %v1017_v29, %v401_v48  ;;  %v339_v21 = vmul.f32 0.015625, %v207_v52  ;;  %v735_v22 = vmul.f32 %v1113_v58, %v1113_v58 }
 0x163   :  { %v782_v11 = vsel %vm588_vm9, %v718_v63, 0.0  ;;  %v720_v13 = vmul.f32 %v1098_v2, %v1098_v2  ;;  %v928_v15 = vsel %vm590_vm10, 0.0, %v402_v1  ;;  %v355_v29 = vmul.f32 0.015625, %v247_v54 }
 0x164   :  { %v837_v16 = vadd.f32 %v836_v41, %v782_v11  ;;  %v982_v17 = vadd.f32 %v981_v4, %v928_v15  ;;  %v211_v27 = vpop.f32.mrb[20].mxu0  ;;  %v251_v28 = vpop.f32.mrb[4].mxu1  ;;  %v403_v37 = vmul.f32 %v339_v21, %v339_v21  ;;  %v1380_v51 = vsel %vm605_vm11, 0.0, %v417_v12 }
 0x165   :  { %v784_v18 = vsel %vm590_vm10, %v720_v13, 0.0  ;;  %v340_v30 = vmul.f32 0.015625, %v211_v27  ;;  %v213_v32 = vpop.f32.mrb[21].mxu0  ;;  %v253_v6 = vpop.f32.mrb[5].mxu1  ;;  %v1115_v45 = vadd.f32 -1.0, %v355_v29  ;;  %v356_v14 = vmul.f32 0.015625, %v251_v28 }
 0x166   :  { %v838_v36 = vadd.f32 %v837_v16, %v784_v18  ;;  %v341_v38 = vmul.f32 0.015625, %v213_v32  ;;  %v357_v41 = vmul.f32 0.015625, %v253_v6  ;;  %v215_v42 = vpop.f32.mrb[22].mxu0  ;;  %v255_v44 = vpop.f32.mrb[6].mxu1  ;;  %v1382_v52 = vmul.f32 %v354_v20, %v354_v20 }
 0x167   :  { %v404_v46 = vmul.f32 %v340_v30, %v340_v30  ;;  %v1100_v49 = vadd.f32 -1.0, %v340_v30  ;;  %v217_v50 = vpop.f32.mrb[23].mxu0  ;;  %v257_v26 = vpop.f32.mrb[7].mxu1  ;;  %v1019_v54 = vadd.f32 %v1018_v9, %v403_v37  ;;  %v799_v58 = vsel %vm605_vm11, %v735_v22, 0.0 }
 0x168   :  { %v405_v48 = vmul.f32 %v341_v38, %v341_v38  ;;  %v737_v63 = vmul.f32 %v1115_v45, %v1115_v45  ;;  %v419_v2 = vmul.f32 %v355_v29, %v355_v29  ;;  %v1117_v13 = vadd.f32 -1.0, %v357_v41 }
 0x169   :  { %v722_v0 = vmul.f32 %v1100_v49, %v1100_v49  ;;  %v930_v1 = vsel %vm592_vm12, 0.0, %v404_v46  ;;  %v1396_v19 = vmul.f32 %v356_v14, %v356_v14  ;;  %v342_v15 = vmul.f32 0.015625, %v215_v42 }
 0x16a   :  { %v983_v4 = vadd.f32 %v982_v17, %v930_v1  ;;  %v1020_v11 = vadd.f32 %v1019_v54, %v405_v48  ;;  %v801_v12 = vsel %vm607_vm13, %v737_v63, 0.0  ;;  %v739_v21 = vmul.f32 %v1117_v13, %v1117_v13 }
 0x16b   :  { %v786_v9 = vsel %vm592_vm12, %v722_v0, 0.0  ;;  %v883_v16 = vadd.f32 %v801_v12, %v799_v58  ;;  %v343_v17 = vmul.f32 0.015625, %v217_v50  ;;  %v421_v22 = vmul.f32 %v357_v41, %v357_v41 }
 0x16c   :  { %v839_v20 = vadd.f32 %v838_v36, %v786_v9  ;;  %v221_v27 = vpop.f32.mrb[24].mxu0  ;;  %v261_v28 = vpop.f32.mrb[8].mxu1  ;;  %v406_v18 = vmul.f32 %v342_v15, %v342_v15  ;;  %v1102_v29 = vadd.f32 -1.0, %v342_v15  ;;  %v359_v30 = vmul.f32 0.015625, %v257_v26 }
 0x16d   :  { %v223_v32 = vpop.f32.mrb[25].mxu0  ;;  %v263_v6 = vpop.f32.mrb[9].mxu1  ;;  %v1405_v34 = vsel %vm607_vm13, 0.0, %v419_v2  ;;  %v803_v36 = vsel %vm609_vm15, %v739_v21, 0.0  ;;  %v407_v37 = vmul.f32 %v343_v17, %v343_v17  ;;  %v344_v38 = vmul.f32 0.015625, %v221_v27 }
 0x16e   :  { %v225_v41 = vpop.f32.mrb[26].mxu0  ;;  %v265_v42 = vpop.f32.mrb[10].mxu1  ;;  %v884_v45 = vadd.f32 %v883_v16, %v803_v36  ;;  %v724_v46 = vmul.f32 %v1102_v29, %v1102_v29  ;;  %v932_v49 = vsel %vm594_vm14, 0.0, %v406_v18  ;;  %v358_v14 = vmul.f32 0.015625, %v255_v44 }
 0x16f   :  { %v227_v50 = vpop.f32.mrb[27].mxu0  ;;  %v267_v26 = vpop.f32.mrb[11].mxu1  ;;  %v984_v31 = vadd.f32 %v983_v4, %v932_v49  ;;  %v1021_v54 = vadd.f32 %v1020_v11, %v407_v37  ;;  %v1119_v48 = vadd.f32 -1.0, %v359_v30  ;;  %v408_v58 = vmul.f32 %v344_v38, %v344_v38 }
 0x170   :  { %v1418_v63 = vsel %vm609_vm15, 0.0, %v421_v22  ;;  %v788_v0 = vsel %vm594_vm14, %v724_v46, 0.0  ;;  %v423_v1 = vmul.f32 %v359_v30, %v359_v30  ;;  %v1104_v44 = vadd.f32 -1.0, %v344_v38 }
 0x171   :  { %v840_v2 = vadd.f32 %v839_v20, %v788_v0  ;;  %v741_v13 = vmul.f32 %v1119_v48, %v1119_v48  ;;  %v934_v4 = vsel %vm596_vm0, 0.0, %v408_v58  ;;  %v345_v11 = vmul.f32 0.015625, %v223_v32 }
 0x172   :  { %v726_v12 = vmul.f32 %v1104_v44, %v1104_v44  ;;  %v985_v35 = vadd.f32 %v984_v31, %v934_v4  ;;  %v361_v9 = vmul.f32 0.015625, %v263_v6  ;;  %v346_v15 = vmul.f32 0.015625, %v225_v41 }
 0x173   :  { %v1428_v16 = vmul.f32 %v358_v14, %v358_v14  ;;  %v805_v43 = vsel %vm611_vm1, %v741_v13, 0.0  ;;  %v409_v20 = vmul.f32 %v345_v11, %v345_v11  ;;  %v347_v21 = vmul.f32 0.015625, %v227_v50 }
 0x174   :  { %v231_v17 = vpop.f32.mrb[28].mxu0  ;;  %v271_v27 = vpop.f32.mrb[12].mxu1  ;;  %v885_v22 = vadd.f32 %v884_v45, %v805_v43  ;;  %v790_v18 = vsel %vm596_vm0, %v726_v12, 0.0  ;;  %v360_v29 = vmul.f32 0.015625, %v261_v28  ;;  %v1121_v30 = vadd.f32 -1.0, %v361_v9 }
 0x175   :  { %v233_v32 = vpop.f32.mrb[29].mxu0  ;;  %v273_v6 = vpop.f32.mrb[13].mxu1  ;;  %v841_v36 = vadd.f32 %v840_v2, %v790_v18  ;;  %v1022_v37 = vadd.f32 %v1021_v54, %v409_v20  ;;  %v410_v38 = vmul.f32 %v346_v15, %v346_v15  ;;  %v1106_v41 = vadd.f32 -1.0, %v346_v15 }
 0x176   :  { %v235_v46 = vpop.f32.mrb[30].mxu0  ;;  %v275_v45 = vpop.f32.mrb[14].mxu1  ;;  %v1443_v53 = vsel %vm611_vm1, 0.0, %v423_v1  ;;  %v425_v28 = vmul.f32 %v361_v9, %v361_v9  ;;  %v743_v49 = vmul.f32 %v1121_v30, %v1121_v30  ;;  %v411_v14 = vmul.f32 %v347_v21, %v347_v21 }
 0x177   :  { %v237_v50 = vpop.f32.mrb[31].mxu0  ;;  %v277_v31 = vpop.f32.mrb[15].mxu1  ;;  %v728_v48 = vmul.f32 %v1106_v41, %v1106_v41  ;;  %v936_v54 = vsel %vm598_vm2, 0.0, %v410_v38  ;;  %v363_v58 = vmul.f32 0.015625, %v267_v26  ;;  %v348_v0 = vmul.f32 0.015625, %v231_v17 }
 0x178   :  { %v807_v44 = vsel %vm613_vm3, %v743_v49, 0.0  ;;  %v986_v2 = vadd.f32 %v985_v35, %v936_v54  ;;  %v362_v47 = vmul.f32 0.015625, %v265_v42  ;;  %v1023_v1 = vadd.f32 %v1022_v37, %v411_v14 }
 0x179   :  { %v1451_v13 = vmul.f32 %v360_v29, %v360_v29  ;;  %v886_v4 = vadd.f32 %v885_v22, %v807_v44  ;;  %v792_v11 = vsel %vm598_vm2, %v728_v48, 0.0  ;;  %v1123_v12 = vadd.f32 -1.0, %v363_v58 }
 0x17a   :  { %v1461_v26 = vsel %vm613_vm3, 0.0, %v425_v28  ;;  %v842_v9 = vadd.f32 %v841_v36, %v792_v11  ;;  %v412_v35 = vmul.f32 %v348_v0, %v348_v0  ;;  %v1108_v42 = vadd.f32 -1.0, %v348_v0 }
 0x17b   :  { %v745_v15 = vmul.f32 %v1123_v12, %v1123_v12  ;;  %v364_v43 = vmul.f32 0.015625, %v271_v27  ;;  %v349_v20 = vmul.f32 0.015625, %v233_v32  ;;  %v365_v21 = vmul.f32 0.015625, %v273_v6 }
 0x17c   :  { %v281_v17 = vpop.f32.mrb[16].mxu1  ;;  %v1463_v22 = vmul.f32 %v362_v47, %v362_v47  ;;  %v730_v57 = vmul.f32 %v1108_v42, %v1108_v42  ;;  %v938_v18 = vsel %vm600_vm4, 0.0, %v412_v35  ;;  %v350_v29 = vmul.f32 0.015625, %v235_v46 }
 0x17d   :  { %v283_v30 = vpop.f32.mrb[17].mxu1  ;;  %v427_v56 = vmul.f32 %v363_v58, %v363_v58  ;;  %v809_v36 = vsel %vm615_vm5, %v745_v15, 0.0  ;;  %v987_v37 = vadd.f32 %v986_v2, %v938_v18  ;;  %v413_v38 = vmul.f32 %v349_v20, %v349_v20 }
 0x17e   :  { %v285_v27 = vpop.f32.mrb[18].mxu1  ;;  %v887_v32 = vadd.f32 %v886_v4, %v809_v36  ;;  %v794_v6 = vsel %vm600_vm4, %v730_v57, 0.0  ;;  %v1125_v41 = vadd.f32 -1.0, %v365_v21  ;;  %v414_v28 = vmul.f32 %v350_v29, %v350_v29 }
 0x17f   :  { %v287_v46 = vpop.f32.mrb[19].mxu1  ;;  %v843_v49 = vadd.f32 %v842_v9, %v794_v6  ;;  %v1476_v14 = vmul.f32 %v364_v43, %v364_v43  ;;  %v1024_v48 = vadd.f32 %v1023_v1, %v413_v38  ;;  %v1110_v54 = vadd.f32 -1.0, %v350_v29 }
 0x180   :  { %v429_v58 = vmul.f32 %v365_v21, %v365_v21  ;;  %v747_v0 = vmul.f32 %v1125_v41, %v1125_v41  ;;  %v940_v44 = vsel %vm602_vm6, 0.0, %v414_v28  ;;  %v351_v2 = vmul.f32 0.015625, %v237_v50 }
 0x181   :  { %vm621_vm9 = vcmp.eq.s32.totalorder %v1325_v23, %v1255_v25  ;;  %v732_v60 = vmul.f32 %v1110_v54, %v1110_v54  ;;  %v988_v47 = vadd.f32 %v987_v37, %v940_v44  ;;  %v366_v4 = vmul.f32 0.015625, %v275_v45 }
 0x182   :  { %v367_v11 = vmul.f32 0.015625, %v277_v31  ;;  %v1486_v12 = vsel %vm615_vm5, 0.0, %v427_v56  ;;  %v811_v1 = vsel %vm617_vm7, %v747_v0, 0.0  ;;  %v415_v9 = vmul.f32 %v351_v2, %v351_v2 }
 0x183   :  { %v369_v35 = vmul.f32 0.015625, %v283_v30  ;;  %v888_v42 = vadd.f32 %v887_v32, %v811_v1  ;;  %v796_v50 = vsel %vm602_vm6, %v732_v60, 0.0  ;;  %v989_v15 = vadd.f32 %v988_v47, %v1355_v5 }
 0x184   :  { %v368_v45 = vmul.f32 0.015625, %v281_v17  ;;  %v291_v31 = vpop.f32.mrb[20].mxu1  ;;  %v1498_v62 = vsel %vm617_vm7, 0.0, %v429_v58  ;;  %v844_v43 = vadd.f32 %v843_v49, %v796_v50  ;;  %v1025_v20 = vadd.f32 %v1024_v48, %v415_v9 }
 0x185   :  { %v1127_v21 = vadd.f32 -1.0, %v367_v11  ;;  %v293_v57 = vpop.f32.mrb[21].mxu1  ;;  %v990_v18 = vadd.f32 %v989_v15, %v1382_v52  ;;  %v430_v29 = vmul.f32 %v366_v4, %v366_v4  ;;  %v431_v30 = vmul.f32 %v367_v11, %v367_v11 }
 0x186   :  { %v1129_v56 = vadd.f32 -1.0, %v369_v35  ;;  %vm623_vm10 = vcmp.eq.s32.totalorder %v1328_v33, %v1255_v25  ;;  %v295_v24 = vpop.f32.mrb[22].mxu1  ;;  %v861_v7 = vrot.slane %v844_v43, 4  ;;  %v1026_v5 = vadd.f32 %v1025_v20, %v1380_v51 }
 0x187   :  { %v749_v17 = vmul.f32 %v1127_v21, %v1127_v21  ;;  %v370_v3 = vmul.f32 0.015625, %v285_v27  ;;  %v297_v36 = vpop.f32.mrb[23].mxu1  ;;  %v991_v37 = vadd.f32 %v990_v18, %v1396_v19  ;;  %v432_v38 = vmul.f32 %v368_v45, %v368_v45 }
 0x188   :  { %v751_v32 = vmul.f32 %v1129_v56, %v1129_v56  ;;  %v371_v6 = vmul.f32 0.015625, %v287_v46  ;;  %v862_v41 = vadd.f32 %v861_v7, %v844_v43  ;;  %v1027_v52 = vadd.f32 %v1026_v5, %v1405_v34 }
 0x189   :  { %v813_v28 = vsel %vm619_vm8, %v749_v17, 0.0  ;;  %v433_v49 = vmul.f32 %v369_v35, %v369_v35  ;;  %vm625_vm11 = vcmp.eq.s32.totalorder %v1336_v39, %v1255_v25  ;;  %v992_v51 = vadd.f32 %v991_v37, %v1428_v16 }
 0x18a   :  { %v889_v27 = vadd.f32 %v888_v42, %v813_v28  ;;  %v957_v19 = vsel %vm619_vm8, 0.0, %v431_v30  ;;  %v815_v46 = vsel %vm621_vm9, %v751_v32, 0.0  ;;  %v863_v34 = vrot.slane %v862_v41, 2 }
 0x18b   :  { %v1028_v48 = vadd.f32 %v1027_v52, %v1418_v63  ;;  %v1131_v54 = vadd.f32 -1.0, %v371_v6  ;;  %v372_v58 = vmul.f32 0.015625, %v291_v31  ;;  %v993_v0 = vadd.f32 %v992_v51, %v1451_v13 }
 0x18c   :  { %v890_v44 = vadd.f32 %v889_v27, %v815_v46  ;;  %v434_v2 = vmul.f32 %v370_v3, %v370_v3  ;;  %v373_v60 = vmul.f32 0.015625, %v293_v57  ;;  %vm627_vm12 = vcmp.eq.s32.totalorder %v1339_v40, %v1255_v25  ;;  %v301_v16 = vpop.f32.mrb[24].mxu1 }
 0x18d   :  { %v864_v8 = vadd.f32 %v863_v34, %v862_v41  ;;  %v1029_v47 = vadd.f32 %v1028_v48, %v1443_v53  ;;  %v959_v4 = vsel %vm621_vm9, 0.0, %v433_v49  ;;  %v753_v11 = vmul.f32 %v1131_v54, %v1131_v54  ;;  %v303_v63 = vpop.f32.mrb[25].mxu1 }
 0x18e   :  { %v994_v1 = vadd.f32 %v993_v0, %v1463_v22  ;;  %v435_v9 = vmul.f32 %v371_v6, %v371_v6  ;;  %v1133_v13 = vadd.f32 -1.0, %v373_v60  ;;  %v375_v35 = vmul.f32 0.015625, %v297_v36  ;;  %v305_v42 = vpop.f32.mrb[26].mxu1 }
 0x18f   :  { %v865_v50 = vrot.slane %v864_v8, 1  ;;  %v1030_v15 = vadd.f32 %v1029_v47, %v1461_v26  ;;  %v817_v45 = vsel %vm623_vm10, %v753_v11, 0.0  ;;  %v436_v53 = vmul.f32 %v372_v58, %v372_v58  ;;  %v307_v31 = vpop.f32.mrb[27].mxu1 }
 0x190   :  { %v995_v23 = vadd.f32 %v994_v1, %v1476_v14  ;;  %v891_v43 = vadd.f32 %v890_v44, %v817_v45  ;;  %v755_v20 = vmul.f32 %v1133_v13, %v1133_v13  ;;  %v374_v21 = vmul.f32 0.015625, %v295_v24 }
 0x191   :  { %vm629_vm13 = vcmp.eq.s32.totalorder %v1344_v55, %v1255_v25  ;;  %v866_v22 = vadd.f32 %v865_v50, %v864_v8  ;;  %v1031_v57 = vadd.f32 %v1030_v15, %v1486_v12  ;;  %v437_v18 = vmul.f32 %v373_v60, %v373_v60 }
 0x192   :  { %v1135_v30 = vadd.f32 -1.0, %v375_v35  ;;  %v996_v26 = vadd.f32 %v995_v23, %v430_v29  ;;  %v819_v56 = vsel %vm625_vm11, %v755_v20, 0.0  ;;  %v439_v7 = vmul.f32 %v375_v35, %v375_v35 }
 0x193   :  { %v377_v5 = vmul.f32 0.015625, %v303_v63  ;;  %v1032_v14 = vadd.f32 %v1031_v57, %v1498_v62  ;;  %v892_v17 = vadd.f32 %v891_v43, %v819_v56  ;;  %vm631_vm14 = vcmp.eq.s32.totalorder %v1347_v59, %v1255_v25  ;;  %906 = vst [vmem:[%s1589_s2] sm:$0xff] %v866_v22 }
 0x194   :  { %v757_v3 = vmul.f32 %v1135_v30, %v1135_v30  ;;  %v997_v24 = vadd.f32 %v996_v26, %v432_v38  ;;  %v961_v12 = vsel %vm623_vm10, 0.0, %v435_v9  ;;  %v438_v36 = vmul.f32 %v374_v21, %v374_v21  ;;  %v311_v37 = vpop.f32.mrb[28].mxu1 }
 0x195   :  { %v376_v29 = vmul.f32 0.015625, %v301_v16  ;;  %v1033_v32 = vadd.f32 %v1032_v14, %v957_v19  ;;  %v1137_v6 = vadd.f32 -1.0, %v377_v5  ;;  %v378_v41 = vmul.f32 0.015625, %v305_v42  ;;  %v313_v52 = vpop.f32.mrb[29].mxu1 }
 0x196   :  { %v821_v62 = vsel %vm627_vm12, %v757_v3, 0.0  ;;  %vm633_vm15 = vcmp.eq.s32.totalorder %v1350_v61, %v1255_v25  ;;  %v998_v33 = vadd.f32 %v997_v24, %v434_v2  ;;  %v963_v38 = vsel %vm625_vm11, 0.0, %v437_v18  ;;  %v315_v51 = vpop.f32.mrb[30].mxu1 }
 0x197   :  { %v893_v28 = vadd.f32 %v892_v17, %v821_v62  ;;  %v379_v49 = vmul.f32 0.015625, %v307_v31  ;;  %v1034_v27 = vadd.f32 %v1033_v32, %v959_v4  ;;  %v965_v19 = vsel %vm627_vm12, 0.0, %v439_v7  ;;  %v317_v48 = vpop.f32.mrb[31].mxu1 }
 0x198   :  { %v759_v46 = vmul.f32 %v1137_v6, %v1137_v6  ;;  %v380_v34 = vmul.f32 0.015625, %v311_v37  ;;  %v999_v54 = vadd.f32 %v998_v33, %v436_v53  ;;  %v440_v58 = vmul.f32 %v376_v29, %v376_v29 }
 0x199   :  { %v1139_v0 = vadd.f32 -1.0, %v379_v49  ;;  %v381_v44 = vmul.f32 0.015625, %v313_v52  ;;  %v1035_v2 = vadd.f32 %v1034_v27, %v961_v12  ;;  %v441_v60 = vmul.f32 %v377_v5, %v377_v5 }
 0x19a   :  { %v823_v39 = vsel %vm629_vm13, %v759_v46, 0.0  ;;  %v442_v16 = vmul.f32 %v378_v41, %v378_v41  ;;  %v1000_v8 = vadd.f32 %v999_v54, %v438_v36  ;;  %v382_v11 = vmul.f32 0.015625, %v315_v51 }
 0x19b   :  { %v894_v47 = vadd.f32 %v893_v28, %v823_v39  ;;  %v761_v4 = vmul.f32 %v1139_v0, %v1139_v0  ;;  %v1036_v40 = vadd.f32 %v1035_v2, %v963_v38  ;;  %v443_v63 = vmul.f32 %v379_v49, %v379_v49 }
 0x19c   :  { %v444_v1 = vmul.f32 %v380_v34, %v380_v34  ;;  %v1141_v9 = vadd.f32 -1.0, %v381_v44  ;;  %v1001_v13 = vadd.f32 %v1000_v8, %v440_v58  ;;  %v445_v42 = vmul.f32 %v381_v44, %v381_v44 }
 0x19d   :  { %v825_v35 = vsel %vm631_vm14, %v761_v4, 0.0  ;;  %v383_v50 = vmul.f32 0.015625, %v317_v48  ;;  %v1037_v15 = vadd.f32 %v1036_v40, %v965_v19  ;;  %v967_v45 = vsel %vm629_vm13, 0.0, %v441_v60 }
 0x19e   :  { %v895_v53 = vadd.f32 %v894_v47, %v825_v35  ;;  %v763_v31 = vmul.f32 %v1141_v9, %v1141_v9  ;;  %v1002_v23 = vadd.f32 %v1001_v13, %v442_v16  ;;  %v446_v43 = vmul.f32 %v382_v11, %v382_v11 }
 0x19f   :  { %v447_v20 = vmul.f32 %v383_v50, %v383_v50  ;;  %v1143_v21 = vadd.f32 -1.0, %v383_v50  ;;  %v1038_v22 = vadd.f32 %v1037_v15, %v967_v45  ;;  %v969_v57 = vsel %vm631_vm14, 0.0, %v443_v63 }
 0x1a0   :  { %v827_v18 = vsel %vm633_vm15, %v763_v31, 0.0  ;;  %vm635_vm0 = vcmp.eq.s32.totalorder %v1360_v10, %v1255_v25  ;;  %v1003_v55 = vadd.f32 %v1002_v23, %v444_v1  ;;  %v971_v26 = vsel %vm633_vm15, 0.0, %v445_v42 }
 0x1a1   :  { %v896_v30 = vadd.f32 %v895_v53, %v827_v18  ;;  %v765_v56 = vmul.f32 %v1143_v21, %v1143_v21  ;;  %v1039_v7 = vadd.f32 %v1038_v22, %v969_v57  ;;  %v973_v17 = vsel %vm635_vm0, 0.0, %v447_v20 }
 0x1a2   :  { %v1004_v5 = vadd.f32 %v1003_v55, %v446_v43 }
 0x1a3   :  { %v829_v14 = vsel %vm635_vm0, %v765_v56, 0.0  ;;  %v1040_v59 = vadd.f32 %v1039_v7, %v971_v26 }
 0x1a4   :  { %v897_v3 = vadd.f32 %v896_v30, %v829_v14  ;;  %v1005_v24 = vrot.slane %v1004_v5, 4 }
 0x1a5   :  { %v1041_v36 = vadd.f32 %v1040_v59, %v973_v17 }
 0x1a6   :  { %v898_v12 = vrot.slane %v897_v3, 4  ;;  %v1006_v29 = vadd.f32 %v1005_v24, %v1004_v5 }
 0x1a7   :  { %v1042_v32 = vrot.slane %v1041_v36, 4 }
 0x1a8   :  { %v899_v37 = vadd.f32 %v898_v12, %v897_v3  ;;  %v1007_v10 = vrot.slane %v1006_v29, 2 }
 0x1a9   :  { %v1043_v6 = vadd.f32 %v1042_v32, %v1041_v36 }
 0x1aa   :  { %v900_v62 = vrot.slane %v899_v37, 2  ;;  %v1008_v41 = vadd.f32 %v1007_v10, %v1006_v29 }
 0x1ab   :  { %v1044_v25 = vrot.slane %v1043_v6, 2 }
 0x1ac   :  { %v901_v52 = vadd.f32 %v900_v62, %v899_v37  ;;  %v1009_v61 = vrot.slane %v1008_v41, 1 }
 0x1ad   :  { %v1045_v38 = vadd.f32 %v1044_v25, %v1043_v6 }
 0x1ae   :  { %v902_v33 = vrot.slane %v901_v52, 1  ;;  %v1010_v28 = vadd.f32 %v1009_v61, %v1008_v41 }
 0x1af   :  { %v1046_v51 = vrot.slane %v1045_v38, 1 }
 0x1b0   :  { %v903_v49 = vadd.f32 %v902_v33, %v901_v52  ;;  %1050 = vst [vmem:[%s1590_s3] sm:$0xff] %v1010_v28 }
 0x1b1   :  { %v1047_v27 = vadd.f32 %v1046_v51, %v1045_v38 }
 0x1b2   :  { %907 = vst [vmem:[%s1589_s2 + $0x8] sm:$0xff] %v903_v49 }
 0x1b3   :  { %1051 = vst [vmem:[%s1590_s3 + $0x8] sm:$0xff] %v1047_v27 }

// kernel: forward.10
= control target key start
LH: loop header
LB: loop body
LE: loop exit
PB: predicated region body
PF: predicated region fallthrough
CT: control target
= control target key end

     0   :  { %v2682_v1 = vmov 0   ;;  %vm175_vm0 = vcmask 1041408   ;;  %s2671_s2 = inlined_call_operand.vmem [shape: bf16[128,256], index: 2, kind: input, shape index: {}]   ;;  %s2672_s3 = inlined_call_operand.vmem [shape: bf16[256,256], index: 3, kind: input, shape index: {}]   ;;  %s2673_s0 = inlined_call_operand.vmem [shape: bf16[2,128], index: 0, kind: input, shape index: {}]   ;;  %s2674_s4 = inlined_call_operand.vmem [shape: bf16[256,256], index: 4, kind: input, shape index: {}]   ;;  %s2675_s5 = inlined_call_operand.vmem [shape: f32[1,256], index: 5, kind: input, shape index: {}]   ;;  %s2676_s6 = inlined_call_operand.vmem [shape: f32[1,256], index: 6, kind: input, shape index: {}]   ;;  %s2677_s1 = inlined_call_operand.vmem [shape: bf16[2,128], index: 1, kind: input, shape index: {}]   ;;  %s2678_s7 = inlined_call_operand.vmem [shape: f32[1,256], index: 7, kind: input, shape index: {}]   ;;  %s2679_s8 = inlined_call_operand.vmem [shape: f32[1,256], index: 8, kind: input, shape index: {}]   ;;  %s2680_s9 = inlined_call_operand.vmem [shape: bf16[2,256], index: 9, kind: output, shape index: {0}]   ;;  %s2681_s10 = inlined_call_operand.vmem [shape: bf16[2,256], index: 10, kind: output, shape index: {1}]  }
   0x1   :  { %v2081_v0 = vld [vmem:[%s2671_s2 + $0x4] ss:$8 sps:$4 sm:$0xff]   ;;  %164 = vmatprep.mubr.bf16.mxu0 %v2682_v1  ;;  %v2087_v2 = vld [vmem:[%s2671_s2] ss:$8 sps:$4 sm:$0xff]   ;;  %v2093_v3 = vld [vmem:[%s2671_s2 + $0x14] ss:$8 sps:$4 sm:$0xff]  }
   0x2   :  { %132 = vmatprep.subr.bf16.mxu0 %v2081_v0  ;;  %v2099_v4 = vld [vmem:[%s2671_s2 + $0x10] ss:$8 sps:$4 sm:$0xff]   ;;  %v2105_v5 = vld [vmem:[%s2671_s2 + $0x24] ss:$8 sps:$4 sm:$0xff]   ;;  %v2111_v6 = vld [vmem:[%s2671_s2 + $0x20] ss:$8 sps:$4 sm:$0xff]  }
   0x3   :  { %133 = vmatpush1.bf16.msra.mxu0 %v2087_v2  ;;  %v2117_v7 = vld [vmem:[%s2671_s2 + $0x34] ss:$8 sps:$4 sm:$0xff]   ;;  %v2122_v8 = vld [vmem:[%s2671_s2 + $0x30] ss:$8 sps:$4 sm:$0xff]   ;;  %v2127_v9 = vld [vmem:[%s2671_s2 + $0x44] ss:$8 sps:$4 sm:$0xff]  }
   0x4   :  { %134 = vmatprep.subr.bf16.mxu0 %v2093_v3  ;;  %v2133_v10 = vld [vmem:[%s2672_s3 + $0x4] ss:$8 sps:$4 sm:$0xff]   ;;  %v2139_v11 = vld [vmem:[%s2672_s3] ss:$8 sps:$4 sm:$0xff]   ;;  %v2145_v12 = vld [vmem:[%s2672_s3 + $0x14] ss:$8 sps:$4 sm:$0xff]  }
   0x5   :  { %447 = vmatprep.subr.bf16.mxu1 %v2133_v10  ;;  %v2150_v13 = vld [vmem:[%s2671_s2 + $0x40] ss:$8 sps:$4 sm:$0xff]   ;;  %v2156_v14 = vld [vmem:[%s2672_s3 + $0x10] ss:$8 sps:$4 sm:$0xff]   ;;  %v2163_v15 = vld [vmem:[%s2672_s3 + $0x24] ss:$8 sps:$4 sm:$0xff]  }
   0x6   :  { %448 = vmatpush1.bf16.msra.mxu1 %v2139_v11  ;;  %v2169_v16 = vld [vmem:[%s2671_s2 + $0x54] ss:$8 sps:$4 sm:$0xff]   ;;  %v2174_v17 = vld [vmem:[%s2671_s2 + $0x50] ss:$8 sps:$4 sm:$0xff]   ;;  %v2179_v18 = vld [vmem:[%s2672_s3 + $0x20] ss:$8 sps:$4 sm:$0xff]  }
   0x7   :  { %135 = vmatpush1.bf16.msra.mxu0 %v2099_v4  ;;  %449 = vmatprep.subr.bf16.mxu1 %v2145_v12  ;;  %v2184_v19 = vld [vmem:[%s2672_s3 + $0x34] ss:$8 sps:$4 sm:$0xff]   ;;  %v2189_v20 = vld [vmem:[%s2671_s2 + $0x64] ss:$8 sps:$4 sm:$0xff]   ;;  %v2198_v21 = vld [vmem:[%s2672_s3 + $0x30] ss:$8 sps:$4 sm:$0xff]  }
   0x8   :  { %136 = vmatprep.subr.bf16.mxu0 %v2105_v5  ;;  %v2203_v22 = vld [vmem:[%s2671_s2 + $0x60] ss:$8 sps:$4 sm:$0xff]   ;;  %v2208_v23 = vld [vmem:[%s2672_s3 + $0x44] ss:$8 sps:$4 sm:$0xff]   ;;  %v2213_v24 = vld [vmem:[%s2671_s2 + $0x74] ss:$8 sps:$4 sm:$0xff]  }
   0x9   :  { %v2223_v25 = vld [vmem:[%s2672_s3 + $0x40] ss:$8 sps:$4 sm:$0xff]   ;;  %v2229_v26 = vld [vmem:[%s2671_s2 + $0x70] ss:$8 sps:$4 sm:$0xff]   ;;  %v2241_v28 = vld [vmem:[%s2672_s3 + $0x54] ss:$8 sps:$4 sm:$0xff]  }
   0xa   :  { %450 = vmatpush1.bf16.msra.mxu1 %v2156_v14  ;;  %v35_v27 = vld [vmem:[%s2673_s0] sm:$0x1]  ;;  %2705 = vst [vmem:[#allocation2_spill] sm:$0xff] %v2241_v28  ;;  %v2246_v29 = vld [vmem:[%s2672_s3 + $0x50] ss:$8 sps:$4 sm:$0xff]  }
   0xb   :  { %137 = vmatpush1.bf16.msra.mxu0 %v2111_v6  ;;  %451 = vmatprep.subr.bf16.mxu1 %v2163_v15  ;;  %2706 = vst [vmem:[#allocation3_spill] sm:$0xff] %v2246_v29  ;;  %v2253_v30 = vld [vmem:[%s2672_s3 + $0x64] ss:$8 sps:$4 sm:$0xff]   ;;  %v2258_v31 = vld [vmem:[%s2672_s3 + $0x60] ss:$8 sps:$4 sm:$0xff]  }
   0xc   :  { %138 = vmatprep.subr.bf16.mxu0 %v2117_v7  ;;  %2707 = vst [vmem:[#allocation4_spill] sm:$0xff] %v2253_v30  ;;  %2708 = vst [vmem:[#allocation5_spill] sm:$0xff] %v2258_v31  ;;  %v2265_v32 = vld [vmem:[%s2672_s3 + $0x74] ss:$8 sps:$4 sm:$0xff]   ;;  %v2270_v33 = vld [vmem:[%s2672_s3 + $0x70] ss:$8 sps:$4 sm:$0xff]  }
   0xd   :  { %2709 = vst [vmem:[#allocation6_spill] sm:$0xff] %v2265_v32  ;;  %2710 = vst [vmem:[#allocation7_spill] sm:$0xff] %v2270_v33  ;;  %v2277_v34 = vld [vmem:[%s2672_s3 + $0x84] ss:$8 sps:$4 sm:$0xff]   ;;  %v2282_v35 = vld [vmem:[%s2672_s3 + $0x80] ss:$8 sps:$4 sm:$0xff]  }
   0xe   :  { %452 = vmatpush1.bf16.msra.mxu1 %v2179_v18  ;;  %2711 = vst [vmem:[#allocation8_spill] sm:$0xff] %v2277_v34  ;;  %2712 = vst [vmem:[#allocation9_spill] sm:$0xff] %v2282_v35  ;;  %v2289_v36 = vld [vmem:[%s2672_s3 + $0x94] ss:$8 sps:$4 sm:$0xff]   ;;  %v2294_v37 = vld [vmem:[%s2672_s3 + $0x90] ss:$8 sps:$4 sm:$0xff]  }
   0xf   :  { %139 = vmatpush1.bf16.msra.mxu0 %v2122_v8  ;;  %453 = vmatprep.subr.bf16.mxu1 %v2184_v19  ;;  %2713 = vst [vmem:[#allocation10_spill] sm:$0xff] %v2289_v36  ;;  %2714 = vst [vmem:[#allocation11_spill] sm:$0xff] %v2294_v37  ;;  %v2301_v38 = vld [vmem:[%s2672_s3 + $0xa4] ss:$8 sps:$4 sm:$0xff]   ;;  %v2306_v39 = vld [vmem:[%s2672_s3 + $0xa0] ss:$8 sps:$4 sm:$0xff]  }
  0x10   :  { %140 = vmatprep.subr.bf16.mxu0 %v2127_v9  ;;  %2715 = vst [vmem:[#allocation12_spill] sm:$0xff] %v2301_v38  ;;  %2716 = vst [vmem:[#allocation13_spill] sm:$0xff] %v2306_v39  ;;  %v2313_v40 = vld [vmem:[%s2672_s3 + $0xb4] ss:$8 sps:$4 sm:$0xff]   ;;  %v2318_v41 = vld [vmem:[%s2672_s3 + $0xb0] ss:$8 sps:$4 sm:$0xff]  }
  0x11   :  { %2717 = vst [vmem:[#allocation14_spill] sm:$0xff] %v2313_v40  ;;  %2718 = vst [vmem:[#allocation15_spill] sm:$0xff] %v2318_v41  ;;  %v2325_v42 = vld [vmem:[%s2672_s3 + $0xc4] ss:$8 sps:$4 sm:$0xff]   ;;  %v2330_v43 = vld [vmem:[%s2672_s3 + $0xc0] ss:$8 sps:$4 sm:$0xff]  }
  0x12   :  { %454 = vmatpush1.bf16.msra.mxu1 %v2198_v21  ;;  %2719 = vst [vmem:[#allocation16_spill] sm:$0xff] %v2325_v42  ;;  %2720 = vst [vmem:[#allocation17_spill] sm:$0xff] %v2330_v43  ;;  %v2337_v44 = vld [vmem:[%s2672_s3 + $0xd4] ss:$8 sps:$4 sm:$0xff]   ;;  %v2342_v45 = vld [vmem:[%s2672_s3 + $0xd0] ss:$8 sps:$4 sm:$0xff]  }
  0x13   :  { %141 = vmatpush1.bf16.msra.mxu0 %v2150_v13  ;;  %455 = vmatprep.subr.bf16.mxu1 %v2208_v23  ;;  %2721 = vst [vmem:[#allocation18_spill] sm:$0xff] %v2337_v44  ;;  %2722 = vst [vmem:[#allocation19_spill] sm:$0xff] %v2342_v45  ;;  %v2349_v46 = vld [vmem:[%s2672_s3 + $0xe4] ss:$8 sps:$4 sm:$0xff]   ;;  %v2354_v47 = vld [vmem:[%s2672_s3 + $0xe0] ss:$8 sps:$4 sm:$0xff]  }
  0x14   :  { %142 = vmatprep.subr.bf16.mxu0 %v2169_v16  ;;  %2723 = vst [vmem:[#allocation20_spill] sm:$0xff] %v2349_v46  ;;  %2724 = vst [vmem:[#allocation21_spill] sm:$0xff] %v2354_v47  ;;  %v2359_v48 = vld [vmem:[%s2672_s3 + $0xf4] ss:$8 sps:$4 sm:$0xff]   ;;  %v2366_v49 = vld [vmem:[%s2672_s3 + $0xf0] ss:$8 sps:$4 sm:$0xff]  }
  0x15   :  { %2725 = vst [vmem:[#allocation22_spill] sm:$0xff] %v2359_v48  ;;  %2726 = vst [vmem:[#allocation23_spill] sm:$0xff] %v2366_v49  ;;  %v2374_v50 = vld [vmem:[%s2674_s4] ss:$8 sps:$4 sm:$0xff]   ;;  %v2379_v51 = vld [vmem:[%s2674_s4 + $0x4] ss:$8 sps:$4 sm:$0xff]  }
  0x16   :  { %456 = vmatpush1.bf16.msra.mxu1 %v2223_v25  ;;  %v2384_v52 = vld [vmem:[%s2674_s4 + $0x14] ss:$8 sps:$4 sm:$0xff]   ;;  %v2391_v53 = vld [vmem:[%s2674_s4 + $0x10] ss:$8 sps:$4 sm:$0xff]   ;;  %v2397_v54 = vld [vmem:[%s2674_s4 + $0x24] ss:$8 sps:$4 sm:$0xff]  }
  0x17   :  { %143 = vmatpush1.bf16.msra.mxu0 %v2174_v17  ;;  %457 = vmatprep.subr.bf16.mxu1 %v2241_v28  ;;  %v2402_v55 = vld [vmem:[%s2674_s4 + $0x20] ss:$8 sps:$4 sm:$0xff]   ;;  %v2407_v56 = vld [vmem:[%s2674_s4 + $0x34] ss:$8 sps:$4 sm:$0xff]   ;;  %v2414_v57 = vld [vmem:[%s2674_s4 + $0x30] ss:$8 sps:$4 sm:$0xff]  }
  0x18   :  { %144 = vmatprep.subr.bf16.mxu0 %v2189_v20  ;;  %v2419_v58 = vld [vmem:[%s2674_s4 + $0x44] ss:$8 sps:$4 sm:$0xff]   ;;  %v2427_v59 = vld [vmem:[%s2674_s4 + $0x40] ss:$8 sps:$4 sm:$0xff]  }
  0x1a   :  { %458 = vmatpush1.bf16.msra.mxu1 %v2246_v29 }
  0x1b   :  { %145 = vmatpush1.bf16.msra.mxu0 %v2203_v22  ;;  %459 = vmatprep.subr.bf16.mxu1 %v2253_v30 }
  0x1c   :  { %146 = vmatprep.subr.bf16.mxu0 %v2213_v24 }
  0x1e   :  { %460 = vmatpush1.bf16.msra.mxu1 %v2258_v31 }
  0x1f   :  { %147 = vmatpush1.bf16.msra.mxu0 %v2229_v26  ;;  %461 = vmatprep.subr.bf16.mxu1 %v2265_v32 }
  0x20   :  { %760 = vmatprep.subr.bf16.mxu0 %v2379_v51 }
  0x22   :  { %165 = vmatmul.mubr.bf16.vlgmr.msra.gmra.mrb[0].mxu0 %v35_v27  ;;  %462 = vmatpush1.bf16.msra.mxu1 %v2270_v33 }
  0x23   :  { %463 = vmatprep.subr.bf16.mxu1 %v2277_v34  ;;  %761 = vmatpush1.bf16.msra.mxu0 %v2374_v50 }
  0x24   :  { %762 = vmatprep.subr.bf16.mxu0 %v2384_v52 }
  0x26   :  { %464 = vmatpush1.bf16.msra.mxu1 %v2282_v35 }
  0x27   :  { %465 = vmatprep.subr.bf16.mxu1 %v2289_v36  ;;  %763 = vmatpush1.bf16.msra.mxu0 %v2391_v53 }
  0x28   :  { %764 = vmatprep.subr.bf16.mxu0 %v2397_v54 }
  0x2a   :  { %466 = vmatpush1.bf16.msra.mxu1 %v2294_v37 }
  0x2b   :  { %467 = vmatprep.subr.bf16.mxu1 %v2301_v38  ;;  %765 = vmatpush1.bf16.msra.mxu0 %v2402_v55 }
  0x2c   :  { %766 = vmatprep.subr.bf16.mxu0 %v2407_v56 }
  0x2e   :  { %468 = vmatpush1.bf16.msra.mxu1 %v2306_v39 }
  0x2f   :  { %469 = vmatprep.subr.bf16.mxu1 %v2313_v40  ;;  %767 = vmatpush1.bf16.msra.mxu0 %v2414_v57 }
  0x30   :  { %768 = vmatprep.subr.bf16.mxu0 %v2419_v58 }
  0x32   :  { %470 = vmatpush1.bf16.msra.mxu1 %v2318_v41 }
  0x33   :  { %471 = vmatprep.subr.bf16.mxu1 %v2325_v42  ;;  %769 = vmatpush1.bf16.msra.mxu0 %v2427_v59 }
  0x36   :  { %472 = vmatpush1.bf16.msra.mxu1 %v2330_v43 }
  0x37   :  { %473 = vmatprep.subr.bf16.mxu1 %v2337_v44 }
  0x3a   :  { %474 = vmatpush1.bf16.msra.mxu1 %v2342_v45 }
  0x3b   :  { %475 = vmatprep.subr.bf16.mxu1 %v2349_v46 }
  0x3e   :  { %476 = vmatpush1.bf16.msra.mxu1 %v2354_v47 }
  0x3f   :  { %477 = vmatprep.subr.bf16.mxu1 %v2359_v48 }
  0x42   :  { %478 = vmatpush1.bf16.msra.mxu1 %v2366_v49 }
  0x43   :  { %967 = vmatprep.subr.bf16.mxu1 %v2081_v0 }
  0xf5   :  { %v2431_v60 = vpop.f32.mrb[0].mxu0 }
  0xf6   :  { %v176_v61 = vsel %vm175_vm0, %v2431_v60, 0.0  ;;  %v193_v62 = vmul.f32 %v2431_v60, %v2431_v60  ;;  %v168_v63 = vpop.f32.mrb[1].mxu0 }
  0xf7   :  { %v177_v0 = vrot.slane %v176_v61, 4  ;;  %v183_v27 = vsel %vm175_vm0, %v168_v63, 0.0  ;;  %v194_v1 = vmul.f32 %v168_v63, %v168_v63  ;;  %v170_v49 = vpop.f32.mrb[2].mxu0 }
  0xf8   :  { %v195_v48 = vsel %vm175_vm0, %v193_v62, 0.0  ;;  %v184_v47 = vrot.slane %v183_v27, 4  ;;  %v171_v46 = vpop.f32.mrb[3].mxu0 }
  0xf9   :  { %v178_v45 = vadd.f32 %v177_v0, %v176_v61  ;;  %v196_v44 = vrot.slane %v195_v48, 4  ;;  %v202_v43 = vsel %vm175_vm0, %v194_v1, 0.0 }
  0xfa   :  { %v185_v42 = vadd.f32 %v184_v47, %v183_v27  ;;  %v203_v41 = vrot.slane %v202_v43, 4 }
  0xfb   :  { %v179_v40 = vrot.slane %v178_v45, 2  ;;  %v197_v39 = vadd.f32 %v196_v44, %v195_v48 }
  0xfc   :  { %v186_v38 = vrot.slane %v185_v42, 2  ;;  %v204_v37 = vadd.f32 %v203_v41, %v202_v43 }
  0xfd   :  { %v180_v36 = vadd.f32 %v179_v40, %v178_v45  ;;  %v198_v35 = vrot.slane %v197_v39, 2  ;;  %v226_v45 = vlaneseq }
  0xfe   :  { %v187_v34 = vadd.f32 %v186_v38, %v185_v42  ;;  %v205_v33 = vrot.slane %v204_v37, 2 }
  0xff   :  { %v181_v32 = vrot.slane %v180_v36, 1  ;;  %v199_v49 = vadd.f32 %v198_v35, %v197_v39 }
 0x100   :  { %v188_v31 = vrot.slane %v187_v34, 1  ;;  %v206_v62 = vadd.f32 %v205_v33, %v204_v37 }
 0x101   :  { %v182_v30 = vadd.f32 %v181_v32, %v180_v36  ;;  %v200_v46 = vrot.slane %v199_v49, 1  ;;  %v2440_v32 = vshrl.u32 %v226_v45, 7 }
 0x102   :  { %v189_v61 = vadd.f32 %v188_v31, %v187_v34  ;;  %v207_v0 = vrot.slane %v206_v62, 1  ;;  %v173_v31 = vld [vmem:[%s2675_s5] sm:$0x3] }
 0x103   :  { %v191_v29 = vmul.f32 0.5, %v182_v30  ;;  %v201_v1 = vadd.f32 %v200_v46, %v199_v49  ;;  %v2443_v30 = vsub.s32 0, %v2440_v32  ;;  %v2449_v33 = vsub.s32 1, %v2440_v32 }
 0x104   :  { %v192_v47 = vmul.f32 0.5, %v189_v61  ;;  %v208_v27 = vadd.f32 %v207_v0, %v206_v62 }
 0x105   :  { %v209_v28 = vmul.f32 0.5, %v201_v1  ;;  %v211_v44 = vmul.f32 %v191_v29, %v191_v29  ;;  %v217_v34 = vsub.f32 %v2431_v60, %v191_v29  ;;  %v229_v36 = vrot.slane %v173_v31, %v2443_v30 }
 0x106   :  { %v210_v48 = vmul.f32 0.5, %v208_v27  ;;  %v212_v41 = vmul.f32 %v192_v47, %v192_v47  ;;  %v218_v49 = vsub.f32 %v168_v63, %v192_v47  ;;  %v233_v62 = vrot.slane %v173_v31, %v2449_v33 }
 0x107   :  { %v213_v40 = vsub.f32 %v209_v28, %v211_v44  ;;  %v174_v28 = vld [vmem:[%s2676_s6] sm:$0x3]  ;;  %v2727_v63 = vmov 0  }
 0x108   :  { %v214_v43 = vsub.f32 %v210_v48, %v212_v41  ;;  %v242_v0 = vrot.slane %v174_v28, %v2443_v30  ;;  %v246_v27 = vrot.slane %v174_v28, %v2449_v33 }
 0x109   :  { %v215_v38 = vmax.f32 %v213_v40, 0.0 }
 0x10a   :  { %v216_v42 = vmax.f32 %v214_v43, 0.0 }
 0x10b   :  { %v219_v35 = vadd.f32 1e-05, %v215_v38 }
 0x10c   :  { %v220_v39 = vadd.f32 1e-05, %v216_v42 }
 0x10d   :  { %1997 = vrsqrt.f32 %v219_v35 }
 0x10e   :  { %1999 = vrsqrt.f32 %v220_v39 }
 0x117   :  { %v1998_v37 = vpop.eup %1997 }
 0x118   :  { %v2000_v46 = vpop.eup %1999  ;;  %v223_v61 = vmul.f32 %v1998_v37, %v217_v34 }
 0x119   :  { %v224_v1 = vmul.f32 %v2000_v46, %v218_v49 }
 0x11a   :  { %v236_v44 = vmul.f32 %v229_v36, %v223_v61 }
 0x11b   :  { %v237_v48 = vmul.f32 %v233_v62, %v224_v1 }
 0x11c   :  { %v249_v41 = vadd.f32 %v242_v0, %v236_v44 }
 0x11d   :  { %v250_v40 = vadd.f32 %v246_v27, %v237_v48 }
 0x11e   :  { %v251_v43 = vmax.f32 %v249_v41, 0.0 }
 0x11f   :  { %v252_v38 = vmax.f32 %v250_v40, 0.0 }
 0x120   :  { %v253_v60 = vpack.c.bf16 %v251_v43, %v251_v43 }
 0x121   :  { %v254_v29 = vpack.c.bf16 %v252_v38, %v252_v38 }
 0x123   :  { %479 = vmatprep.mubr.bf16.mxu1 %v254_v29 }
 0x124   :  { %480 = vmatmul.mubr.bf16.vlgmr.msra.gmra.mrb[0].mxu1 %v253_v60 }
 0x125   :  { %968 = vmatpush1.bf16.msra.mxu1 %v2087_v2  ;;  %999 = vmatprep.mubr.bf16.mxu1 %v2727_v63  ;;  %v870_v2 = vld [vmem:[%s2677_s1] sm:$0x1] }
 0x126   :  { %969 = vmatprep.subr.bf16.mxu1 %v2093_v3  ;;  %v1966_v3 = vld [vmem:[%s2674_s4 + $0x54] ss:$8 sps:$4 sm:$0xff]  }
 0x127   :  { %770 = vmatprep.subr.bf16.mxu0 %v1966_v3 }
 0x129   :  { %970 = vmatpush1.bf16.msra.mxu1 %v2099_v4  ;;  %v1964_v4 = vld [vmem:[%s2674_s4 + $0x50] ss:$8 sps:$4 sm:$0xff]  }
 0x12a   :  { %971 = vmatprep.subr.bf16.mxu1 %v2105_v5  ;;  %771 = vmatpush1.bf16.msra.mxu0 %v1964_v4  ;;  %v1969_v5 = vld [vmem:[%s2674_s4 + $0x64] ss:$8 sps:$4 sm:$0xff]  }
 0x12b   :  { %772 = vmatprep.subr.bf16.mxu0 %v1969_v5 }
 0x12d   :  { %972 = vmatpush1.bf16.msra.mxu1 %v2111_v6  ;;  %v1967_v6 = vld [vmem:[%s2674_s4 + $0x60] ss:$8 sps:$4 sm:$0xff]  }
 0x12e   :  { %973 = vmatprep.subr.bf16.mxu1 %v2117_v7  ;;  %773 = vmatpush1.bf16.msra.mxu0 %v1967_v6  ;;  %v1972_v7 = vld [vmem:[%s2674_s4 + $0x74] ss:$8 sps:$4 sm:$0xff]  }
 0x12f   :  { %774 = vmatprep.subr.bf16.mxu0 %v1972_v7 }
 0x131   :  { %974 = vmatpush1.bf16.msra.mxu1 %v2122_v8  ;;  %v1970_v8 = vld [vmem:[%s2674_s4 + $0x70] ss:$8 sps:$4 sm:$0xff]  }
 0x132   :  { %975 = vmatprep.subr.bf16.mxu1 %v2127_v9  ;;  %775 = vmatpush1.bf16.msra.mxu0 %v1970_v8  ;;  %v1975_v9 = vld [vmem:[%s2674_s4 + $0x84] ss:$8 sps:$4 sm:$0xff]  }
 0x133   :  { %776 = vmatprep.subr.bf16.mxu0 %v1975_v9 }
 0x135   :  { %976 = vmatpush1.bf16.msra.mxu1 %v2150_v13  ;;  %v1973_v13 = vld [vmem:[%s2674_s4 + $0x80] ss:$8 sps:$4 sm:$0xff]  }
 0x136   :  { %977 = vmatprep.subr.bf16.mxu1 %v2169_v16  ;;  %777 = vmatpush1.bf16.msra.mxu0 %v1973_v13  ;;  %v1978_v16 = vld [vmem:[%s2674_s4 + $0x94] ss:$8 sps:$4 sm:$0xff]  }
 0x137   :  { %778 = vmatprep.subr.bf16.mxu0 %v1978_v16 }
 0x139   :  { %978 = vmatpush1.bf16.msra.mxu1 %v2174_v17  ;;  %v1976_v17 = vld [vmem:[%s2674_s4 + $0x90] ss:$8 sps:$4 sm:$0xff]  }
 0x13a   :  { %979 = vmatprep.subr.bf16.mxu1 %v2189_v20  ;;  %779 = vmatpush1.bf16.msra.mxu0 %v1976_v17  ;;  %v1981_v20 = vld [vmem:[%s2674_s4 + $0xa4] ss:$8 sps:$4 sm:$0xff]  }
 0x13b   :  { %780 = vmatprep.subr.bf16.mxu0 %v1981_v20 }
 0x13d   :  { %980 = vmatpush1.bf16.msra.mxu1 %v2203_v22  ;;  %v1979_v22 = vld [vmem:[%s2674_s4 + $0xa0] ss:$8 sps:$4 sm:$0xff]  }
 0x13e   :  { %981 = vmatprep.subr.bf16.mxu1 %v2213_v24  ;;  %781 = vmatpush1.bf16.msra.mxu0 %v1979_v22  ;;  %v1984_v24 = vld [vmem:[%s2674_s4 + $0xb4] ss:$8 sps:$4 sm:$0xff]  }
 0x13f   :  { %782 = vmatprep.subr.bf16.mxu0 %v1984_v24 }
 0x141   :  { %982 = vmatpush1.bf16.msra.mxu1 %v2229_v26  ;;  %v1982_v26 = vld [vmem:[%s2674_s4 + $0xb0] ss:$8 sps:$4 sm:$0xff]  }
 0x142   :  { %1593 = vmatprep.subr.bf16.mxu1 %v2379_v51  ;;  %783 = vmatpush1.bf16.msra.mxu0 %v1982_v26  ;;  %v1985_v51 = vld [vmem:[%s2674_s4 + $0xc0] ss:$8 sps:$4 sm:$0xff]  }
 0x144   :  { %1000 = vmatmul.mubr.bf16.vlgmr.msra.gmra.mrb[4].mxu1 %v870_v2 }
 0x145   :  { %1594 = vmatpush1.bf16.msra.mxu1 %v2374_v50  ;;  %v1987_v50 = vld [vmem:[%s2674_s4 + $0xc4] ss:$8 sps:$4 sm:$0xff]  }
 0x146   :  { %1595 = vmatprep.subr.bf16.mxu1 %v2384_v52  ;;  %784 = vmatprep.subr.bf16.mxu0 %v1987_v50  ;;  %v1990_v52 = vld [vmem:[%s2674_s4 + $0xd4] ss:$8 sps:$4 sm:$0xff]  }
 0x147   :  { %785 = vmatpush1.bf16.msra.mxu0 %v1985_v51 }
 0x148   :  { %786 = vmatprep.subr.bf16.mxu0 %v1990_v52 }
 0x149   :  { %1596 = vmatpush1.bf16.msra.mxu1 %v2391_v53  ;;  %v1988_v53 = vld [vmem:[%s2674_s4 + $0xd0] ss:$8 sps:$4 sm:$0xff]  }
 0x14a   :  { %1597 = vmatprep.subr.bf16.mxu1 %v2397_v54  ;;  %v1993_v54 = vld [vmem:[%s2674_s4 + $0xe4] ss:$8 sps:$4 sm:$0xff]  }
 0x14b   :  { %787 = vmatpush1.bf16.msra.mxu0 %v1988_v53 }
 0x14c   :  { %788 = vmatprep.subr.bf16.mxu0 %v1993_v54 }
 0x14d   :  { %1598 = vmatpush1.bf16.msra.mxu1 %v2402_v55  ;;  %v1991_v55 = vld [vmem:[%s2674_s4 + $0xe0] ss:$8 sps:$4 sm:$0xff]  }
 0x14e   :  { %1599 = vmatprep.subr.bf16.mxu1 %v2407_v56  ;;  %v1996_v56 = vld [vmem:[%s2674_s4 + $0xf4] ss:$8 sps:$4 sm:$0xff]  }
 0x14f   :  { %789 = vmatpush1.bf16.msra.mxu0 %v1991_v55 }
 0x150   :  { %790 = vmatprep.subr.bf16.mxu0 %v1996_v56 }
 0x151   :  { %1600 = vmatpush1.bf16.msra.mxu1 %v2414_v57  ;;  %v1994_v57 = vld [vmem:[%s2674_s4 + $0xf0] ss:$8 sps:$4 sm:$0xff]  }
 0x152   :  { %1601 = vmatprep.subr.bf16.mxu1 %v2419_v58 }
 0x153   :  { %791 = vmatpush1.bf16.msra.mxu0 %v1994_v57 }
 0x154   :  { %1280 = vmatprep.subr.bf16.mxu0 %v2133_v10 }
 0x155   :  { %1602 = vmatpush1.bf16.msra.mxu1 %v2427_v59 }
 0x156   :  { %1603 = vmatprep.subr.bf16.mxu1 %v1966_v3 }
 0x159   :  { %1604 = vmatpush1.bf16.msra.mxu1 %v1964_v4 }
 0x15a   :  { %1605 = vmatprep.subr.bf16.mxu1 %v1969_v5 }
 0x15d   :  { %1606 = vmatpush1.bf16.msra.mxu1 %v1967_v6 }
 0x15e   :  { %1607 = vmatprep.subr.bf16.mxu1 %v1972_v7 }
 0x161   :  { %1608 = vmatpush1.bf16.msra.mxu1 %v1970_v8 }
 0x162   :  { %1609 = vmatprep.subr.bf16.mxu1 %v1975_v9 }
 0x165   :  { %1610 = vmatpush1.bf16.msra.mxu1 %v1973_v13 }
 0x166   :  { %1611 = vmatprep.subr.bf16.mxu1 %v1978_v16 }
 0x169   :  { %1612 = vmatpush1.bf16.msra.mxu1 %v1976_v17 }
 0x16a   :  { %1613 = vmatprep.subr.bf16.mxu1 %v1981_v20 }
 0x16d   :  { %1614 = vmatpush1.bf16.msra.mxu1 %v1979_v22 }
 0x16e   :  { %1615 = vmatprep.subr.bf16.mxu1 %v1984_v24 }
 0x171   :  { %1616 = vmatpush1.bf16.msra.mxu1 %v1982_v26 }
 0x172   :  { %1617 = vmatprep.subr.bf16.mxu1 %v1987_v50 }
 0x175   :  { %1618 = vmatpush1.bf16.msra.mxu1 %v1985_v51 }
 0x176   :  { %1619 = vmatprep.subr.bf16.mxu1 %v1990_v52  ;;  %v488_v52 = vld [vmem:[%s2678_s7] sm:$0x3] }
 0x179   :  { %1620 = vmatpush1.bf16.msra.mxu1 %v1988_v53  ;;  %v489_v53 = vld [vmem:[%s2679_s8] sm:$0x3] }
 0x17a   :  { %1621 = vmatprep.subr.bf16.mxu1 %v1993_v54  ;;  %v542_v54 = vrot.slane %v488_v52, %v2443_v30 }
 0x17d   :  { %1622 = vmatpush1.bf16.msra.mxu1 %v1991_v55 }
 0x17e   :  { %1623 = vmatprep.subr.bf16.mxu1 %v1996_v56  ;;  %v546_v56 = vrot.slane %v488_v52, %v2449_v33 }
 0x181   :  { %1624 = vmatpush1.bf16.msra.mxu1 %v1994_v57 }
 0x1f7   :  { %v2555_v58 = vpop.f32.mrb[0].mxu1 }
 0x1f8   :  { %v490_v59 = vsel %vm175_vm0, %v2555_v58, 0.0  ;;  %v506_v47 = vmul.f32 %v2555_v58, %v2555_v58  ;;  %v2561_v42 = vpop.f32.mrb[1].mxu1 }
 0x1f9   :  { %v491_v45 = vrot.slane %v490_v59, 4  ;;  %v497_v35 = vsel %vm175_vm0, %v2561_v42, 0.0  ;;  %v507_v39 = vmul.f32 %v2561_v42, %v2561_v42  ;;  %v485_v31 = vpop.f32.mrb[2].mxu1 }
 0x1fa   :  { %v508_v10 = vsel %vm175_vm0, %v506_v47, 0.0  ;;  %v498_v28 = vrot.slane %v497_v35, 4  ;;  %v486_v34 = vpop.f32.mrb[3].mxu1 }
 0x1fb   :  { %v492_v36 = vadd.f32 %v491_v45, %v490_v59  ;;  %v509_v37 = vrot.slane %v508_v10, 4  ;;  %v515_v49 = vsel %vm175_vm0, %v507_v39, 0.0 }
 0x1fc   :  { %v499_v62 = vadd.f32 %v498_v28, %v497_v35  ;;  %v516_v46 = vrot.slane %v515_v49, 4  ;;  %v555_v35 = vrot.slane %v489_v53, %v2443_v30 }
 0x1fd   :  { %v493_v61 = vrot.slane %v492_v36, 2  ;;  %v510_v0 = vadd.f32 %v509_v37, %v508_v10 }
 0x1fe   :  { %v500_v1 = vrot.slane %v499_v62, 2  ;;  %v517_v27 = vadd.f32 %v516_v46, %v515_v49  ;;  %v559_v46 = vrot.slane %v489_v53, %v2449_v33 }
 0x1ff   :  { %v494_v44 = vadd.f32 %v493_v61, %v492_v36  ;;  %v511_v48 = vrot.slane %v510_v0, 2 }
 0x200   :  { %v501_v41 = vadd.f32 %v500_v1, %v499_v62  ;;  %v518_v40 = vrot.slane %v517_v27, 2 }
 0x201   :  { %v495_v43 = vrot.slane %v494_v44, 1  ;;  %v512_v38 = vadd.f32 %v511_v48, %v510_v0 }
 0x202   :  { %v502_v29 = vrot.slane %v501_v41, 1  ;;  %v519_v60 = vadd.f32 %v518_v40, %v517_v27 }
 0x203   :  { %v496_v63 = vadd.f32 %v495_v43, %v494_v44  ;;  %v513_v2 = vrot.slane %v512_v38, 1 }
 0x204   :  { %v503_v3 = vadd.f32 %v502_v29, %v501_v41  ;;  %v520_v4 = vrot.slane %v519_v60, 1 }
 0x205   :  { %v504_v5 = vmul.f32 0.5, %v496_v63  ;;  %v514_v6 = vadd.f32 %v513_v2, %v512_v38 }
 0x206   :  { %v505_v7 = vmul.f32 0.5, %v503_v3  ;;  %v521_v8 = vadd.f32 %v520_v4, %v519_v60 }
 0x207   :  { %v522_v9 = vmul.f32 0.5, %v514_v6  ;;  %v524_v13 = vmul.f32 %v504_v5, %v504_v5  ;;  %v530_v57 = vsub.f32 %v2555_v58, %v504_v5 }
 0x208   :  { %v523_v16 = vmul.f32 0.5, %v521_v8  ;;  %v525_v17 = vmul.f32 %v505_v7, %v505_v7  ;;  %v531_v31 = vsub.f32 %v2561_v42, %v505_v7 }
 0x209   :  { %v526_v20 = vsub.f32 %v522_v9, %v524_v13 }
 0x20a   :  { %v527_v22 = vsub.f32 %v523_v16, %v525_v17 }
 0x20b   :  { %v528_v24 = vmax.f32 %v526_v20, 0.0 }
 0x20c   :  { %v529_v26 = vmax.f32 %v527_v22, 0.0 }
 0x20d   :  { %v532_v50 = vadd.f32 1e-05, %v528_v24 }
 0x20e   :  { %v533_v51 = vadd.f32 1e-05, %v529_v26 }
 0x20f   :  { %2001 = vrsqrt.f32 %v532_v50 }
 0x210   :  { %2003 = vrsqrt.f32 %v533_v51 }
 0x217   :  { %v2576_v55 = vpop.f32.mrb[4].mxu1 }
 0x218   :  { %v1010_v59 = vsel %vm175_vm0, %v2576_v55, 0.0  ;;  %v1026_v47 = vmul.f32 %v2576_v55, %v2576_v55  ;;  %v2584_v45 = vpop.f32.mrb[5].mxu1 }
 0x219   :  { %v2002_v39 = vpop.eup %2001  ;;  %v1011_v10 = vrot.slane %v1010_v59, 4  ;;  %v1017_v28 = vsel %vm175_vm0, %v2584_v45, 0.0  ;;  %v1027_v58 = vmul.f32 %v2584_v45, %v2584_v45  ;;  %v1005_v34 = vpop.f32.mrb[6].mxu1 }
 0x21a   :  { %v2004_v36 = vpop.eup %2003  ;;  %v536_v37 = vmul.f32 %v2002_v39, %v530_v57  ;;  %v1028_v49 = vsel %vm175_vm0, %v1026_v47, 0.0  ;;  %v1018_v62 = vrot.slane %v1017_v28, 4  ;;  %v1006_v61 = vpop.f32.mrb[7].mxu1 }
 0x21b   :  { %v537_v0 = vmul.f32 %v2004_v36, %v531_v31  ;;  %v1012_v1 = vadd.f32 %v1011_v10, %v1010_v59  ;;  %v1029_v27 = vrot.slane %v1028_v49, 4  ;;  %v1035_v42 = vsel %vm175_vm0, %v1027_v58, 0.0 }
 0x21c   :  { %v549_v44 = vmul.f32 %v542_v54, %v536_v37  ;;  %v1019_v48 = vadd.f32 %v1018_v62, %v1017_v28  ;;  %v1036_v41 = vrot.slane %v1035_v42, 4  ;;  %v2729_v62 = vld [vmem:[#allocation3_spill] sm:$0xff] }
 0x21d   :  { %v1013_v40 = vrot.slane %v1012_v1, 2  ;;  %v1030_v43 = vadd.f32 %v1029_v27, %v1028_v49  ;;  %v550_v38 = vmul.f32 %v546_v56, %v537_v0 }
 0x21e   :  { %v1020_v29 = vrot.slane %v1019_v48, 2  ;;  %v1037_v60 = vadd.f32 %v1036_v41, %v1035_v42  ;;  %v562_v63 = vadd.f32 %v555_v35, %v549_v44  ;;  %v2732_v42 = vld [vmem:[#allocation6_spill] sm:$0xff] }
 0x21f   :  { %v1014_v2 = vadd.f32 %v1013_v40, %v1012_v1  ;;  %v1031_v3 = vrot.slane %v1030_v43, 2  ;;  %v563_v4 = vadd.f32 %v559_v46, %v550_v38  ;;  %v2731_v1 = vld [vmem:[#allocation5_spill] sm:$0xff]  ;;  %v2734_v40 = vld [vmem:[#allocation8_spill] sm:$0xff]  ;;  %v2736_v38 = vld [vmem:[#allocation10_spill] sm:$0xff] }
 0x220   :  { %v1021_v5 = vadd.f32 %v1020_v29, %v1019_v48  ;;  %v1038_v6 = vrot.slane %v1037_v60, 2  ;;  %v564_v7 = vmax.f32 %v562_v63, 0.0  ;;  %v2733_v48 = vld [vmem:[#allocation7_spill] sm:$0xff]  ;;  %v2739_v63 = vld [vmem:[#allocation13_spill] sm:$0xff] }
 0x221   :  { %v1015_v8 = vrot.slane %v1014_v2, 1  ;;  %v1032_v9 = vadd.f32 %v1031_v3, %v1030_v43  ;;  %v565_v13 = vmax.f32 %v563_v4, 0.0  ;;  %v2735_v43 = vld [vmem:[#allocation9_spill] sm:$0xff]  ;;  %v2737_v29 = vld [vmem:[#allocation11_spill] sm:$0xff]  ;;  %v2742_v4 = vld [vmem:[#allocation16_spill] sm:$0xff] }
 0x222   :  { %v1022_v16 = vrot.slane %v1021_v5, 1  ;;  %v1039_v17 = vadd.f32 %v1038_v6, %v1037_v60  ;;  %v566_v51 = vpack.c.bf16 %v564_v7, %v564_v7  ;;  %v2738_v60 = vld [vmem:[#allocation12_spill] sm:$0xff]  ;;  %v2741_v3 = vld [vmem:[#allocation15_spill] sm:$0xff]  ;;  %v2744_v6 = vld [vmem:[#allocation18_spill] sm:$0xff] }
 0x223   :  { %v1016_v20 = vadd.f32 %v1015_v8, %v1014_v2  ;;  %v1033_v22 = vrot.slane %v1032_v9, 1  ;;  %v567_v24 = vpack.c.bf16 %v565_v13, %v565_v13  ;;  %v2740_v2 = vld [vmem:[#allocation14_spill] sm:$0xff]  ;;  %v2745_v7 = vld [vmem:[#allocation19_spill] sm:$0xff]  ;;  %v2746_v8 = vld [vmem:[#allocation20_spill] sm:$0xff] }
 0x224   :  { %v1023_v26 = vadd.f32 %v1022_v16, %v1021_v5  ;;  %v1040_v50 = vrot.slane %v1039_v17, 1  ;;  %v2743_v5 = vld [vmem:[#allocation17_spill] sm:$0xff]  ;;  %v2748_v13 = vld [vmem:[#allocation22_spill] sm:$0xff] }
 0x225   :  { %v1024_v52 = vmul.f32 0.5, %v1016_v20  ;;  %v1034_v53 = vadd.f32 %v1033_v22, %v1032_v9  ;;  %792 = vmatprep.mubr.bf16.mxu0 %v567_v24  ;;  %v2747_v9 = vld [vmem:[#allocation21_spill] sm:$0xff] }
 0x226   :  { %v1025_v54 = vmul.f32 0.5, %v1023_v26  ;;  %v1041_v56 = vadd.f32 %v1040_v50, %v1039_v17  ;;  %793 = vmatmul.mubr.bf16.vlgmr.msra.gmra.mrb[4].mxu0 %v566_v51  ;;  %v2749_v17 = vld [vmem:[#allocation23_spill] sm:$0xff] }
 0x227   :  { %v1042_v57 = vmul.f32 0.5, %v1034_v53  ;;  %v1044_v59 = vmul.f32 %v1024_v52, %v1024_v52  ;;  %1281 = vmatpush1.bf16.msra.mxu0 %v2139_v11  ;;  %v1008_v11 = vld [vmem:[%s2675_s5] sm:$0x3] }
 0x228   :  { %v1043_v47 = vmul.f32 0.5, %v1041_v56  ;;  %v1045_v35 = vmul.f32 %v1025_v54, %v1025_v54  ;;  %1282 = vmatprep.subr.bf16.mxu0 %v2145_v12  ;;  %v1050_v12 = vsub.f32 %v2576_v55, %v1024_v52 }
 0x229   :  { %v1046_v39 = vsub.f32 %v1042_v57, %v1044_v59 }
 0x22a   :  { %v1047_v31 = vsub.f32 %v1043_v47, %v1045_v35 }
 0x22b   :  { %v1048_v10 = vmax.f32 %v1046_v39, 0.0  ;;  %1283 = vmatpush1.bf16.msra.mxu0 %v2156_v14  ;;  %v1009_v14 = vld [vmem:[%s2676_s6] sm:$0x3] }
 0x22c   :  { %v1049_v28 = vmax.f32 %v1047_v31, 0.0  ;;  %1284 = vmatprep.subr.bf16.mxu0 %v2163_v15  ;;  %v1051_v15 = vsub.f32 %v2584_v45, %v1025_v54  ;;  %v1075_v37 = vrot.slane %v1009_v14, %v2443_v30  ;;  %v1079_v46 = vrot.slane %v1009_v14, %v2449_v33  ;;  %v2730_v45 = vld [vmem:[#allocation4_spill] sm:$0xff] }
 0x22d   :  { %v1052_v58 = vadd.f32 1e-05, %v1048_v10 }
 0x22e   :  { %v1053_v34 = vadd.f32 1e-05, %v1049_v28 }
 0x22f   :  { %2005 = vrsqrt.f32 %v1052_v58  ;;  %1285 = vmatpush1.bf16.msra.mxu0 %v2179_v18  ;;  %v1062_v18 = vrot.slane %v1008_v11, %v2443_v30 }
 0x230   :  { %2007 = vrsqrt.f32 %v1053_v34  ;;  %1286 = vmatprep.subr.bf16.mxu0 %v2184_v19  ;;  %v2728_v19 = vld [vmem:[#allocation2_spill] sm:$0xff] }
 0x233   :  { %1287 = vmatpush1.bf16.msra.mxu0 %v2198_v21 }
 0x234   :  { %1288 = vmatprep.subr.bf16.mxu0 %v2208_v23  ;;  %v1066_v23 = vrot.slane %v1008_v11, %v2449_v33 }
 0x237   :  { %1289 = vmatpush1.bf16.msra.mxu0 %v2223_v25 }
 0x238   :  { %1290 = vmatprep.subr.bf16.mxu0 %v2728_v19 }
 0x239   :  { %v2006_v21 = vpop.eup %2005 }
 0x23a   :  { %v2008_v36 = vpop.eup %2007  ;;  %v1056_v49 = vmul.f32 %v2006_v21, %v1050_v12 }
 0x23b   :  { %v1057_v55 = vmul.f32 %v2008_v36, %v1051_v15  ;;  %1291 = vmatpush1.bf16.msra.mxu0 %v2729_v62 }
 0x23c   :  { %v1069_v61 = vmul.f32 %v1062_v18, %v1056_v49  ;;  %1292 = vmatprep.subr.bf16.mxu0 %v2730_v45 }
 0x23d   :  { %v1070_v25 = vmul.f32 %v1066_v23, %v1057_v55 }
 0x23e   :  { %v1082_v0 = vadd.f32 %v1075_v37, %v1069_v61 }
 0x23f   :  { %1293 = vmatpush1.bf16.msra.mxu0 %v2731_v1  ;;  %v1083_v27 = vadd.f32 %v1079_v46, %v1070_v25 }
 0x240   :  { %1294 = vmatprep.subr.bf16.mxu0 %v2732_v42  ;;  %v1084_v16 = vmax.f32 %v1082_v0, 0.0 }
 0x241   :  { %v1085_v44 = vmax.f32 %v1083_v27, 0.0 }
 0x242   :  { %v1086_v20 = vpack.c.bf16 %v1084_v16, %v1084_v16 }
 0x243   :  { %1295 = vmatpush1.bf16.msra.mxu0 %v2733_v48  ;;  %v1087_v41 = vpack.c.bf16 %v1085_v44, %v1085_v44 }
 0x244   :  { %1296 = vmatprep.subr.bf16.mxu0 %v2734_v40 }
 0x245   :  { %1312 = vmatprep.mubr.bf16.mxu0 %v1087_v41 }
 0x247   :  { %1297 = vmatpush1.bf16.msra.mxu0 %v2735_v43 }
 0x248   :  { %1298 = vmatprep.subr.bf16.mxu0 %v2736_v38 }
 0x24b   :  { %1299 = vmatpush1.bf16.msra.mxu0 %v2737_v29  ;;  %v2022_v29 = vmov 1966171168  }
 0x24c   :  { %1300 = vmatprep.subr.bf16.mxu0 %v2738_v60  ;;  %v855_v60 = vunpack.c.l.s4 %v2022_v29 }
 0x24f   :  { %1301 = vmatpush1.bf16.msra.mxu0 %v2739_v63  ;;  %v856_v63 = vunpack.c.0.s8 %v855_v60 }
 0x250   :  { %1302 = vmatprep.subr.bf16.mxu0 %v2740_v2 }
 0x253   :  { %1303 = vmatpush1.bf16.msra.mxu0 %v2741_v3 }
 0x254   :  { %1304 = vmatprep.subr.bf16.mxu0 %v2742_v4 }
 0x257   :  { %1305 = vmatpush1.bf16.msra.mxu0 %v2743_v5 }
 0x258   :  { %1306 = vmatprep.subr.bf16.mxu0 %v2744_v6 }
 0x25b   :  { %1307 = vmatpush1.bf16.msra.mxu0 %v2745_v7 }
 0x25c   :  { %1308 = vmatprep.subr.bf16.mxu0 %v2746_v8  ;;  %v2643_v8 = vsub.s32 %v856_v63, %v2440_v32 }
 0x25f   :  { %1309 = vmatpush1.bf16.msra.mxu0 %v2747_v9 }
 0x260   :  { %1310 = vmatprep.subr.bf16.mxu0 %v2748_v13 }
 0x263   :  { %1311 = vmatpush1.bf16.msra.mxu0 %v2749_v17 }
 0x266   :  { %1313 = vmatmul.mubr.bf16.vlgmr.msra.gmra.mrb[8].mxu0 %v1086_v20 }
 0x2f9   :  { %v794_v22 = vpop.f32.mrb[4].mxu0 }
 0x2fa   :  { %v801_v24 = vsel %vm175_vm0, %v794_v22, 0.0  ;;  %v817_v26 = vmul.f32 %v794_v22, %v794_v22  ;;  %v796_v50 = vpop.f32.mrb[5].mxu0 }
 0x2fb   :  { %v802_v51 = vrot.slane %v801_v24, 4  ;;  %v808_v52 = vsel %vm175_vm0, %v796_v50, 0.0  ;;  %v818_v53 = vmul.f32 %v796_v50, %v796_v50  ;;  %v798_v54 = vpop.f32.mrb[6].mxu0 }
 0x2fc   :  { %v819_v56 = vsel %vm175_vm0, %v817_v26, 0.0  ;;  %v809_v57 = vrot.slane %v808_v52, 4  ;;  %v799_v59 = vpop.f32.mrb[7].mxu0 }
 0x2fd   :  { %v803_v47 = vadd.f32 %v802_v51, %v801_v24  ;;  %v820_v35 = vrot.slane %v819_v56, 4  ;;  %v826_v39 = vsel %vm175_vm0, %v818_v53, 0.0 }
 0x2fe   :  { %v810_v31 = vadd.f32 %v809_v57, %v808_v52  ;;  %v827_v10 = vrot.slane %v826_v39, 4 }
 0x2ff   :  { %v804_v28 = vrot.slane %v803_v47, 2  ;;  %v821_v58 = vadd.f32 %v820_v35, %v819_v56 }
 0x300   :  { %v811_v34 = vrot.slane %v810_v31, 2  ;;  %v828_v11 = vadd.f32 %v827_v10, %v826_v39 }
 0x301   :  { %v805_v12 = vadd.f32 %v804_v28, %v803_v47  ;;  %v822_v14 = vrot.slane %v821_v58, 2 }
 0x302   :  { %v812_v15 = vadd.f32 %v811_v34, %v810_v31  ;;  %v829_v18 = vrot.slane %v828_v11, 2 }
 0x303   :  { %v806_v19 = vrot.slane %v805_v12, 1  ;;  %v823_v21 = vadd.f32 %v822_v14, %v821_v58 }
 0x304   :  { %v813_v23 = vrot.slane %v812_v15, 1  ;;  %v830_v36 = vadd.f32 %v829_v18, %v828_v11 }
 0x305   :  { %v807_v37 = vadd.f32 %v806_v19, %v805_v12  ;;  %v824_v49 = vrot.slane %v823_v21, 1 }
 0x306   :  { %v814_v55 = vadd.f32 %v813_v23, %v812_v15  ;;  %v831_v62 = vrot.slane %v830_v36, 1 }
 0x307   :  { %v815_v46 = vmul.f32 0.5, %v807_v37  ;;  %v825_v61 = vadd.f32 %v824_v49, %v823_v21 }
 0x308   :  { %v816_v45 = vmul.f32 0.5, %v814_v55  ;;  %v832_v25 = vadd.f32 %v831_v62, %v830_v36 }
 0x309   :  { %v833_v0 = vmul.f32 0.5, %v825_v61  ;;  %v835_v1 = vmul.f32 %v815_v46, %v815_v46  ;;  %v841_v2 = vsub.f32 %v794_v22, %v815_v46 }
 0x30a   :  { %v834_v27 = vmul.f32 0.5, %v832_v25  ;;  %v836_v42 = vmul.f32 %v816_v45, %v816_v45  ;;  %v842_v4 = vsub.f32 %v796_v50, %v816_v45 }
 0x30b   :  { %v837_v44 = vsub.f32 %v833_v0, %v835_v1 }
 0x30c   :  { %v838_v48 = vsub.f32 %v834_v27, %v836_v42 }
 0x30d   :  { %v839_v41 = vmax.f32 %v837_v44, 0.0 }
 0x30e   :  { %v840_v40 = vmax.f32 %v838_v48, 0.0 }
 0x30f   :  { %v843_v43 = vadd.f32 1e-05, %v839_v41  ;;  %v1321_v41 = vld [vmem:[%s2678_s7] sm:$0x3] }
 0x310   :  { %v844_v38 = vadd.f32 1e-05, %v840_v40  ;;  %v1322_v40 = vld [vmem:[%s2679_s8] sm:$0x3]  ;;  %v1379_v63 = vrot.slane %v1321_v41, %v2449_v33 }
 0x311   :  { %2009 = vrsqrt.f32 %v843_v43 }
 0x312   :  { %2011 = vrsqrt.f32 %v844_v38  ;;  %v1375_v38 = vrot.slane %v1321_v41, %v2443_v30 }
 0x31b   :  { %v2010_v3 = vpop.eup %2009 }
 0x31c   :  { %v2012_v5 = vpop.eup %2011  ;;  %v847_v6 = vmul.f32 %v2010_v3, %v841_v2 }
 0x31d   :  { %v848_v7 = vmul.f32 %v2012_v5, %v842_v4  ;;  %v1388_v4 = vrot.slane %v1322_v40, %v2443_v30 }
 0x31f   :  { %v1791_v9 = vpack.c.bf16 %v848_v7, %v847_v6  ;;  %v1392_v6 = vrot.slane %v1322_v40, %v2449_v33 }
 0x321   :  { %v860_v13 = vrot.slane %v1791_v9, %v2643_v8 }
 0x323   :  { %1792 = vst.sshfl [vmem:[%s2680_s9] sm:$0x5 pattern:$0x73625140] %v860_v13 }
 0x339   :  { %v1314_v16 = vpop.f32.mrb[8].mxu0 }
 0x33a   :  { %v1323_v17 = vsel %vm175_vm0, %v1314_v16, 0.0  ;;  %v1339_v20 = vmul.f32 %v1314_v16, %v1314_v16  ;;  %v1316_v22 = vpop.f32.mrb[9].mxu0 }
 0x33b   :  { %v1324_v24 = vrot.slane %v1323_v17, 4  ;;  %v1330_v26 = vsel %vm175_vm0, %v1316_v22, 0.0  ;;  %v1340_v50 = vmul.f32 %v1316_v22, %v1316_v22  ;;  %v1318_v51 = vpop.f32.mrb[10].mxu0 }
 0x33c   :  { %v1341_v32 = vsel %vm175_vm0, %v1339_v20, 0.0  ;;  %v1331_v52 = vrot.slane %v1330_v26, 4  ;;  %v1319_v53 = vpop.f32.mrb[11].mxu0 }
 0x33d   :  { %v1325_v54 = vadd.f32 %v1324_v24, %v1323_v17  ;;  %v1342_v56 = vrot.slane %v1341_v32, 4  ;;  %v1348_v57 = vsel %vm175_vm0, %v1340_v50, 0.0 }
 0x33e   :  { %v1332_v59 = vadd.f32 %v1331_v52, %v1330_v26  ;;  %v1349_v47 = vrot.slane %v1348_v57, 4 }
 0x33f   :  { %v1326_v35 = vrot.slane %v1325_v54, 2  ;;  %v1343_v39 = vadd.f32 %v1342_v56, %v1341_v32 }
 0x340   :  { %v1333_v31 = vrot.slane %v1332_v59, 2  ;;  %v1350_v10 = vadd.f32 %v1349_v47, %v1348_v57 }
 0x341   :  { %v1327_v28 = vadd.f32 %v1326_v35, %v1325_v54  ;;  %v1344_v58 = vrot.slane %v1343_v39, 2 }
 0x342   :  { %v1334_v34 = vadd.f32 %v1333_v31, %v1332_v59  ;;  %v1351_v11 = vrot.slane %v1350_v10, 2 }
 0x343   :  { %v1328_v12 = vrot.slane %v1327_v28, 1  ;;  %v1345_v14 = vadd.f32 %v1344_v58, %v1343_v39 }
 0x344   :  { %v1335_v15 = vrot.slane %v1334_v34, 1  ;;  %v1352_v18 = vadd.f32 %v1351_v11, %v1350_v10 }
 0x345   :  { %v1329_v19 = vadd.f32 %v1328_v12, %v1327_v28  ;;  %v1346_v21 = vrot.slane %v1345_v14, 1 }
 0x346   :  { %v1336_v23 = vadd.f32 %v1335_v15, %v1334_v34  ;;  %v1353_v36 = vrot.slane %v1352_v18, 1 }
 0x347   :  { %v1337_v37 = vmul.f32 0.5, %v1329_v19  ;;  %v1347_v49 = vadd.f32 %v1346_v21, %v1345_v14 }
 0x348   :  { %v1338_v55 = vmul.f32 0.5, %v1336_v23  ;;  %v1354_v62 = vadd.f32 %v1353_v36, %v1352_v18 }
 0x349   :  { %v1355_v46 = vmul.f32 0.5, %v1347_v49  ;;  %v1357_v61 = vmul.f32 %v1337_v37, %v1337_v37  ;;  %v1363_v43 = vsub.f32 %v1314_v16, %v1337_v37 }
 0x34a   :  { %v1356_v45 = vmul.f32 0.5, %v1354_v62  ;;  %v1358_v25 = vmul.f32 %v1338_v55, %v1338_v55  ;;  %v1364_v60 = vsub.f32 %v1316_v22, %v1338_v55 }
 0x34b   :  { %v1359_v0 = vsub.f32 %v1355_v46, %v1357_v61 }
 0x34c   :  { %v1360_v1 = vsub.f32 %v1356_v45, %v1358_v25 }
 0x34d   :  { %v1361_v27 = vmax.f32 %v1359_v0, 0.0 }
 0x34e   :  { %v1362_v42 = vmax.f32 %v1360_v1, 0.0 }
 0x34f   :  { %v1365_v44 = vadd.f32 1e-05, %v1361_v27 }
 0x350   :  { %v1366_v48 = vadd.f32 1e-05, %v1362_v42 }
 0x351   :  { %2013 = vrsqrt.f32 %v1365_v44 }
 0x352   :  { %2015 = vrsqrt.f32 %v1366_v48 }
 0x35b   :  { %v2014_v29 = vpop.eup %2013 }
 0x35c   :  { %v2016_v2 = vpop.eup %2015  ;;  %v1369_v3 = vmul.f32 %v2014_v29, %v1363_v43 }
 0x35d   :  { %v1370_v5 = vmul.f32 %v2016_v2, %v1364_v60 }
 0x35e   :  { %v1382_v7 = vmul.f32 %v1375_v38, %v1369_v3 }
 0x35f   :  { %v1383_v9 = vmul.f32 %v1379_v63, %v1370_v5 }
 0x360   :  { %v1395_v13 = vadd.f32 %v1388_v4, %v1382_v7 }
 0x361   :  { %v1396_v17 = vadd.f32 %v1392_v6, %v1383_v9 }
 0x362   :  { %v1397_v20 = vmax.f32 %v1395_v13, 0.0 }
 0x363   :  { %v1398_v24 = vmax.f32 %v1396_v17, 0.0 }
 0x364   :  { %v1399_v26 = vpack.c.bf16 %v1397_v20, %v1397_v20 }
 0x365   :  { %v1400_v16 = vpack.c.bf16 %v1398_v24, %v1398_v24 }
 0x367   :  { %1625 = vmatprep.mubr.bf16.mxu1 %v1400_v16 }
 0x368   :  { %1626 = vmatmul.mubr.bf16.vlgmr.msra.gmra.mrb[8].mxu1 %v1399_v26 }
 0x43b   :  { %v1627_v22 = vpop.f32.mrb[8].mxu1 }
 0x43c   :  { %v1634_v50 = vsel %vm175_vm0, %v1627_v22, 0.0  ;;  %v1650_v51 = vmul.f32 %v1627_v22, %v1627_v22  ;;  %v1629_v32 = vpop.f32.mrb[9].mxu1 }
 0x43d   :  { %v1635_v52 = vrot.slane %v1634_v50, 4  ;;  %v1641_v30 = vsel %vm175_vm0, %v1629_v32, 0.0  ;;  %v1651_v53 = vmul.f32 %v1629_v32, %v1629_v32  ;;  %v1631_v33 = vpop.f32.mrb[10].mxu1 }
 0x43e   :  { %v1652_v54 = vsel %vm175_vm0, %v1650_v51, 0.0  ;;  %v1642_v56 = vrot.slane %v1641_v30, 4  ;;  %v1632_v57 = vpop.f32.mrb[11].mxu1 }
 0x43f   :  { %v1636_v59 = vadd.f32 %v1635_v52, %v1634_v50  ;;  %v1653_v47 = vrot.slane %v1652_v54, 4  ;;  %v1659_v35 = vsel %vm175_vm0, %v1651_v53, 0.0 }
 0x440   :  { %v1643_v39 = vadd.f32 %v1642_v56, %v1641_v30  ;;  %v1660_v31 = vrot.slane %v1659_v35, 4 }
 0x441   :  { %v1637_v10 = vrot.slane %v1636_v59, 2  ;;  %v1654_v28 = vadd.f32 %v1653_v47, %v1652_v54 }
 0x442   :  { %v1644_v58 = vrot.slane %v1643_v39, 2  ;;  %v1661_v34 = vadd.f32 %v1660_v31, %v1659_v35 }
 0x443   :  { %v1638_v11 = vadd.f32 %v1637_v10, %v1636_v59  ;;  %v1655_v12 = vrot.slane %v1654_v28, 2 }
 0x444   :  { %v1645_v14 = vadd.f32 %v1644_v58, %v1643_v39  ;;  %v1662_v15 = vrot.slane %v1661_v34, 2 }
 0x445   :  { %v1639_v18 = vrot.slane %v1638_v11, 1  ;;  %v1656_v19 = vadd.f32 %v1655_v12, %v1654_v28 }
 0x446   :  { %v1646_v21 = vrot.slane %v1645_v14, 1  ;;  %v1663_v23 = vadd.f32 %v1662_v15, %v1661_v34 }
 0x447   :  { %v1640_v36 = vadd.f32 %v1639_v18, %v1638_v11  ;;  %v1657_v37 = vrot.slane %v1656_v19, 1 }
 0x448   :  { %v1647_v49 = vadd.f32 %v1646_v21, %v1645_v14  ;;  %v1664_v55 = vrot.slane %v1663_v23, 1 }
 0x449   :  { %v1648_v62 = vmul.f32 0.5, %v1640_v36  ;;  %v1658_v46 = vadd.f32 %v1657_v37, %v1656_v19 }
 0x44a   :  { %v1649_v61 = vmul.f32 0.5, %v1647_v49  ;;  %v1665_v45 = vadd.f32 %v1664_v55, %v1663_v23 }
 0x44b   :  { %v1666_v25 = vmul.f32 0.5, %v1658_v46  ;;  %v1668_v0 = vmul.f32 %v1648_v62, %v1648_v62  ;;  %v1674_v38 = vsub.f32 %v1627_v22, %v1648_v62 }
 0x44c   :  { %v1667_v1 = vmul.f32 0.5, %v1665_v45  ;;  %v1669_v27 = vmul.f32 %v1649_v61, %v1649_v61  ;;  %v1675_v60 = vsub.f32 %v1629_v32, %v1649_v61 }
 0x44d   :  { %v1670_v42 = vsub.f32 %v1666_v25, %v1668_v0 }
 0x44e   :  { %v1671_v44 = vsub.f32 %v1667_v1, %v1669_v27 }
 0x44f   :  { %v1672_v48 = vmax.f32 %v1670_v42, 0.0 }
 0x450   :  { %v1673_v41 = vmax.f32 %v1671_v44, 0.0 }
 0x451   :  { %v1676_v40 = vadd.f32 1e-05, %v1672_v48 }
 0x452   :  { %v1677_v43 = vadd.f32 1e-05, %v1673_v41 }
 0x453   :  { %2017 = vrsqrt.f32 %v1676_v40 }
 0x454   :  { %2019 = vrsqrt.f32 %v1677_v43 }
 0x45d   :  { %v2018_v29 = vpop.eup %2017 }
 0x45e   :  { %v2020_v63 = vpop.eup %2019  ;;  %v1680_v2 = vmul.f32 %v2018_v29, %v1674_v38 }
 0x45f   :  { %v1681_v3 = vmul.f32 %v2020_v63, %v1675_v60 }
 0x461   :  { %v1873_v4 = vpack.c.bf16 %v1681_v3, %v1680_v2 }
 0x463   :  { %v1693_v5 = vrot.slane %v1873_v4, %v2643_v8 }
 0x465   :  { %1874 = vst.sshfl [vmem:[%s2681_s10] sm:$0x5 pattern:$0x73625140] %v1693_v5 }

</bundles_post_ra>
